<compile_context>
chip_gen: v6e
topology: v6e:2x2x1
jax: 0.10.0
libtpu: 0.0.40
codegen_flags: <defaults>
</compile_context>

<pallas_src>
import functools
import math

import numpy as np
import jax
import jax.numpy as jnp
from jax import lax
from jax.experimental import pallas as pl
from jax.experimental.pallas import tpu as pltpu


MATMUL_DTYPE = jnp.float32      # flip to jnp.bfloat16 for native-MXU operands


def _pad8(n):
    return -(-n // 8) * 8


# --------------------------- fused forward kernel -----------------------------
def _lno_forward_kernel(in_ref, w_ref, o_ref, *, offs, B, N1, N2, x_dim, y1_dim,
                        D, n_mode, n_head, n_layer, n_block, y2_dim):
    M = n_mode
    dh = D // n_head
    scale = 1.0 / math.sqrt(dh)
    NX = B * (N1 + N2)
    NY = B * N1
    x_rows = _pad8(NX)

    def W(name):                                   # static-offset slice of the weight slab
        off, r, c = offs[name]
        return w_ref[off:off + r, 0:c]

    def dot(a, b):
        return jnp.dot(a.astype(MATMUL_DTYPE), b.astype(MATMUL_DTYPE),
                       preferred_element_type=jnp.float32)

    def dot_t(a, b, dims):                         # dot_general with explicit contraction
        return lax.dot_general(a.astype(MATMUL_DTYPE), b.astype(MATMUL_DTYPE),
                               (dims, ((), ())),
                               preferred_element_type=jnp.float32)

    def mlp_hidden(x, name):
        r = jnp.tanh(dot(x, W(f'{name}.Wi')) + W(f'{name}.bi'))
        for l in range(n_layer):                   # static unroll, weights in VMEM
            r = r + jnp.tanh(dot(r, W(f'{name}.Wh{l}')) + W(f'{name}.bh{l}'))
        return r

    def mlp(x, name):
        return dot(mlp_hidden(x, name), W(f'{name}.Wo')) + W(f'{name}.bo')

    def layernorm(x, g, b, eps=1e-5):
        mu = jnp.mean(x, axis=-1, keepdims=True)
        var = jnp.mean((x - mu) ** 2, axis=-1, keepdims=True)
        return (x - mu) * lax.rsqrt(var + eps) * g + b

    def softmax_rows(s):
        s = s - jnp.max(s, axis=-1, keepdims=True)
        e = jnp.exp(s)
        return e * pl.reciprocal(jnp.sum(e, axis=-1, keepdims=True), approx=True)

    # ---- unpack the single lane-packed input slab (static slices) ----
    xs = in_ref[0:NX, 0:x_dim]                     # x1 rows then x2 rows
    ys = in_ref[x_rows:x_rows + NY, 0:y1_dim]      # y rows

    # ---- point-wise projector MLPs, batch-folded over rows (one pass each) ----
    xp = mlp(xs, 'trunk')                          # (B*(N1+N2), D)
    x1p = xp[0:NY, :]                              # (B*N1, D)
    x2p = xp[NY:NX, :]                             # (B*N2, D)
    yp = mlp(ys, 'branch')                         # (B*N1, D)

    # ---- encode: softmax over the sequence axis (per batch), z_b = se_b^T @ yp_b ----
    s_enc = mlp(x1p, 'enc')                        # (B*N1, n_mode)
    z_parts = []
    for b in range(B):                             # static loop over the tiny batch
        s_b = s_enc[b * N1:(b + 1) * N1, :]
        s_b = s_b - jnp.max(s_b, axis=0, keepdims=True)
        e_b = jnp.exp(s_b)
        se_b = e_b * pl.reciprocal(jnp.sum(e_b, axis=0, keepdims=True), approx=True)
        z_parts.append(dot_t(se_b, yp[b * N1:(b + 1) * N1, :], ((0,), (0,))))
    z = jnp.concatenate(z_parts, axis=0)           # (B*M, D)

    # ---- per-head lane masks (hoisted out of the block/head loops) ----
    lane = lax.broadcasted_iota(jnp.int32, (n_head, D), 1)
    hidx = lax.broadcasted_iota(jnp.int32, (n_head, D), 0)
    masks = ((lane >= hidx * dh) & (lane < (hidx + 1) * dh)).astype(jnp.float32)

    # ---- attention blocks: pointwise parts batch-folded, head-packed attention ----
    for blk in range(n_block):                     # static unroll over blocks
        pre = f'blk{blk}'
        # z = z + proj(attn(ln1(z)))    (dropout p=0 -> identity)
        h = layernorm(z, W(f'{pre}.ln1g'), W(f'{pre}.ln1b'))
        q = dot(h, W(f'{pre}.wq')) + W(f'{pre}.bq')          # (B*M, D)
        k = dot(h, W(f'{pre}.wk')) + W(f'{pre}.bk')
        v = dot(h, W(f'{pre}.wv')) + W(f'{pre}.bv')
        att_parts = []
        for b in range(B):
            qb = q[b * M:(b + 1) * M, :]
            kb = k[b * M:(b + 1) * M, :]
            vb = v[b * M:(b + 1) * M, :]
            # head-packed: ONE score matmul + ONE softmax + ONE P@V matmul
            qh = (qb[None, :, :] * masks[:, None, :]).reshape(n_head * M, D)
            sc = dot_t(qh, kb, ((1,), (1,))) * scale          # (n_head*M, M)
            pr = softmax_rows(sc)
            ov = dot(pr, vb)                                  # (n_head*M, D)
            att_parts.append(
                jnp.sum(ov.reshape(n_head, M, D) * masks[:, None, :], axis=0))
        att = jnp.concatenate(att_parts, axis=0)              # (B*M, D)
        z = z + dot(att, W(f'{pre}.wp')) + W(f'{pre}.bp')
        # z = z + MLP(ln2(z))
        h2 = layernorm(z, W(f'{pre}.ln2g'), W(f'{pre}.ln2b'))
        m1 = jnp.tanh(dot(h2, W(f'{pre}.w1')) + W(f'{pre}.b1'))
        z = z + dot(m1, W(f'{pre}.w2')) + W(f'{pre}.b2')

    # ---- decode: row softmax over modes, r_b = sd_b @ z_b ----
    sd = softmax_rows(mlp(x2p, 'dec'))                        # (B*N2, n_mode)
    dec_parts = [dot(sd[b * N2:(b + 1) * N2, :], z[b * M:(b + 1) * M, :])
                 for b in range(B)]
    r = jnp.concatenate(dec_parts, axis=0)                    # (B*N2, D)

    # ---- output MLP; final layer emitted transposed -> lane-dense store ----
    ro = mlp_hidden(r, 'out')                                 # (B*N2, D)
    out_t = dot_t(W('out.WoT'), ro, ((1,), (1,))) + W('out.boT')   # (y2_dim, B*N2)
    o_ref[...] = out_t.astype(o_ref.dtype)


# --------------------------- wrapper -------------------------------------------
def _pack_inputs(x1, x2, y):
    """One row-stacked, column-padded input slab -> one input DMA."""
    B, N1, x_dim = x1.shape
    N2 = x2.shape[1]
    y1_dim = y.shape[-1]
    width = max(x_dim, y1_dim)
    NX, NY = B * (N1 + N2), B * N1
    xs = jnp.concatenate([x1.reshape(B * N1, x_dim),
                          x2.reshape(B * N2, x_dim)], axis=0)
    xs = jnp.pad(xs, ((0, _pad8(NX) - NX), (0, width - x_dim)))
    ys = jnp.pad(y.reshape(NY, y1_dim), ((0, _pad8(NY) - NY), (0, width - y1_dim)))
    return jnp.concatenate([xs, ys], axis=0)


def lno_triple_forward(model, x1, x2, y):
    """Whole LNO_triple forward in a single pallas_call (one grid step)."""
    offs = model['offs']
    w_slab = model['slab']
    D, n_mode, n_head = model['D'], model['n_mode'], model['n_head']
    n_layer, n_block, y2_dim = model['n_layer'], model['n_block'], model['y2_dim']

    B, N1, x_dim = x1.shape
    N2 = x2.shape[1]
    y1_dim = y.shape[-1]
    assert D % n_head == 0, "n_dim must be divisible by n_head"

    in_slab = _pack_inputs(x1, x2, y)

    kernel = functools.partial(
        _lno_forward_kernel, offs=offs, B=B, N1=N1, N2=N2, x_dim=x_dim,
        y1_dim=y1_dim, D=D, n_mode=n_mode, n_head=n_head, n_layer=n_layer,
        n_block=n_block, y2_dim=y2_dim)

    # Advisory cost estimate for XLA's scheduler (rough but shape-derived).
    M = n_mode
    NX, NY = B * (N1 + N2), B * N1

    def mm(r, k, c):
        return 2 * r * k * c

    def mlp_fl(rows, din, dout):
        return mm(rows, din, D) + n_layer * mm(rows, D, D) + mm(rows, D, dout)

    flops = (mlp_fl(NX, x_dim, D) + mlp_fl(NY, y1_dim, D)
             + mlp_fl(B * N1, D, M) + mlp_fl(B * N2, D, M)
             + B * mm(M, N1, D)
             + n_block * (4 * mm(B * M, D, D) + mm(B * M, D, 2 * D)
                          + mm(B * M, 2 * D, D)
                          + B * (mm(n_head * M, D, M) + mm(n_head * M, M, D)))
             + B * mm(N2, M, D)
             + mlp_fl(B * N2, D, y2_dim))
    transcendentals = ((NX + NY + B * N1 + B * N2 + B * N2) * D * (1 + n_layer)
                       + B * N1 * M + B * N2 * M
                       + n_block * (B * n_head * M * M + B * M * 2 * D))
    bytes_accessed = 4 * (int(in_slab.size) + int(w_slab.size) + y2_dim * B * N2)

    out_t = pl.pallas_call(
        kernel,
        out_shape=jax.ShapeDtypeStruct((y2_dim, B * N2), jnp.float32),
        grid=(1,),
        in_specs=[pl.BlockSpec(in_slab.shape, lambda i: (0, 0)),
                  pl.BlockSpec(w_slab.shape, lambda i: (0, 0))],
        out_specs=pl.BlockSpec((y2_dim, B * N2), lambda i: (0, 0)),
        compiler_params=pltpu.CompilerParams(dimension_semantics=("arbitrary",)),
        cost_estimate=pl.CostEstimate(flops=int(flops),
                                      transcendentals=int(transcendentals),
                                      bytes_accessed=int(bytes_accessed)),
    )(in_slab, w_slab)

    # lane-dense (y2_dim, B*N2) -> (B, N2, y2_dim): wrapper-side layout plumbing
    return out_t.reshape(y2_dim, B, N2).transpose(1, 2, 0)


# --------------------------- weight packing (host-side, once) ------------------
def pack_params(arrays, *, n_layer, n_block, dtype=jnp.float32):
    """Pack every weight leaf into ONE contiguous slab (rows padded to 8)."""
    entries = []

    def add(name, a):
        a = np.asarray(a, np.float32)
        if a.ndim == 1:
            a = a.reshape(1, -1)
        entries.append((name, a))

    for nm in ('trunk', 'branch', 'enc', 'dec', 'out'):
        mp = arrays[nm]
        add(f'{nm}.Wi', mp['Wi'])
        add(f'{nm}.bi', mp['bi'])
        for l in range(n_layer):
            add(f'{nm}.Wh{l}', mp['Wh'][l])
            add(f'{nm}.bh{l}', mp['bh'][l])
        if nm == 'out':
            # final layer stored transposed so the kernel's last store is lane-dense
            add('out.WoT', np.asarray(mp['Wo']).T)                 # (y2_dim, D)
            add('out.boT', np.asarray(mp['bo']).reshape(-1, 1))    # (y2_dim, 1)
        else:
            add(f'{nm}.Wo', mp['Wo'])
            add(f'{nm}.bo', mp['bo'])
    for b, bp in enumerate(arrays['blocks']):
        p = f'blk{b}'
        for k in ('ln1g', 'ln1b', 'wq', 'bq', 'wk', 'bk', 'wv', 'bv',
                  'wp', 'bp', 'ln2g', 'ln2b', 'w1', 'b1', 'w2', 'b2'):
            add(f'{p}.{k}', bp[k])

    width = max(a.shape[1] for _, a in entries)
    assert width <= 128
    offs, row = {}, 0
    for name, a in entries:
        r, c = a.shape
        offs[name] = (row, r, c)
        row += _pad8(r)
    slab = np.zeros((row, width), np.float32)
    for name, a in entries:
        o, r, c = offs[name]
        slab[o:o + r, :c] = a
    return jnp.asarray(slab, dtype), offs


# --------------------------- deterministic init --------------------------------
def _linear_init(key, din, dout, scale=0.1):
    kw, kb = jax.random.split(key)
    W = scale * jax.random.normal(kw, (din, dout), jnp.float32)
    b = scale * jax.random.normal(kb, (dout,), jnp.float32)
    return W, b.reshape(1, dout)


def init_mlp(key, din, dh, dout, n_layer):
    keys = jax.random.split(key, n_layer + 2)
    Wi, bi = _linear_init(keys[0], din, dh)
    Wh, bh = [], []
    for i in range(n_layer):
        w, b = _linear_init(keys[1 + i], dh, dh)
        Wh.append(w)
        bh.append(b)
    Wo, bo = _linear_init(keys[n_layer + 1], dh, dout)
    return {'Wi': Wi, 'bi': bi, 'Wh': Wh, 'bh': bh, 'Wo': Wo, 'bo': bo}


def init_block(key, D):
    ks = jax.random.split(key, 6)
    wq, bq = _linear_init(ks[0], D, D)
    wk, bk = _linear_init(ks[1], D, D)
    wv, bv = _linear_init(ks[2], D, D)
    wp, bp = _linear_init(ks[3], D, D)
    w1, b1 = _linear_init(ks[4], D, 2 * D)
    w2, b2 = _linear_init(ks[5], 2 * D, D)
    return {'ln1g': jnp.ones((1, D), jnp.float32), 'ln1b': jnp.zeros((1, D), jnp.float32),
            'wq': wq, 'bq': bq, 'wk': wk, 'bk': bk, 'wv': wv, 'bv': bv,
            'wp': wp, 'bp': bp,
            'ln2g': jnp.ones((1, D), jnp.float32), 'ln2b': jnp.zeros((1, D), jnp.float32),
            'w1': w1, 'b1': b1, 'w2': w2, 'b2': b2}


def init_arrays(key, *, n_block, n_mode, n_dim, n_layer, x_dim, y1_dim, y2_dim):
    keys = jax.random.split(key, 5 + n_block)
    return {
        'trunk': init_mlp(keys[0], x_dim, n_dim, n_dim, n_layer),
        'branch': init_mlp(keys[1], y1_dim, n_dim, n_dim, n_layer),
        'out': init_mlp(keys[2], n_dim, n_dim, y2_dim, n_layer),
        'enc': init_mlp(keys[3], n_dim, n_dim, n_mode, n_layer),
        'dec': init_mlp(keys[4], n_dim, n_dim, n_mode, n_layer),
        'blocks': [init_block(keys[5 + i], n_dim) for i in range(n_block)],
    }


# --------------------------- pure-JAX reference --------------------------------
_HP = lax.Precision.HIGHEST


def _ref_mlp(x, mp):
    r = jnp.tanh(jnp.dot(x, mp['Wi'], precision=_HP) + mp['bi'])
    for Wl, bl in zip(mp['Wh'], mp['bh']):
        r = r + jnp.tanh(jnp.dot(r, Wl, precision=_HP) + bl)
    return jnp.dot(r, mp['Wo'], precision=_HP) + mp['bo']


def _ref_layernorm(x, g, b, eps=1e-5):
    mu = jnp.mean(x, axis=-1, keepdims=True)
    var = jnp.mean((x - mu) ** 2, axis=-1, keepdims=True)
    return (x - mu) / jnp.sqrt(var + eps) * g + b


def lno_triple_reference(arrays, n_head, x1, x2, y):
    B = x1.shape[0]
    x1p = _ref_mlp(x1, arrays['trunk'])
    x2p = _ref_mlp(x2, arrays['trunk'])
    yp = _ref_mlp(y, arrays['branch'])
    se = jax.nn.softmax(_ref_mlp(x1p, arrays['enc']), axis=1)
    sd = jax.nn.softmax(_ref_mlp(x2p, arrays['dec']), axis=-1)
    z = jnp.einsum('bij,bic->bjc', se, yp, precision=_HP)
    D = z.shape[-1]
    dh = D // n_head
    for bp in arrays['blocks']:
        h = _ref_layernorm(z, bp['ln1g'], bp['ln1b'])
        q = jnp.dot(h, bp['wq'], precision=_HP) + bp['bq']
        k = jnp.dot(h, bp['wk'], precision=_HP) + bp['bk']
        v = jnp.dot(h, bp['wv'], precision=_HP) + bp['bv']

        def split(t):
            return t.reshape(B, -1, n_head, dh).transpose(0, 2, 1, 3)

        qh, kh, vh = split(q), split(k), split(v)
        sc = jnp.einsum('bhic,bhjc->bhij', qh, kh, precision=_HP) / math.sqrt(dh)
        p = jax.nn.softmax(sc, axis=-1)
        o = jnp.einsum('bhij,bhjc->bhic', p, vh, precision=_HP)
        o = o.transpose(0, 2, 1, 3).reshape(B, -1, D)
        z = z + jnp.dot(o, bp['wp'], precision=_HP) + bp['bp']
        h2 = _ref_layernorm(z, bp['ln2g'], bp['ln2b'])
        m1 = jnp.tanh(jnp.dot(h2, bp['w1'], precision=_HP) + bp['b1'])
        z = z + jnp.dot(m1, bp['w2'], precision=_HP) + bp['b2']
    r = jnp.einsum('bij,bjc->bic', sd, z, precision=_HP)
    return _ref_mlp(r, arrays['out'])


# ----------------------------------- main --------------------------------------
if __name__ == "__main__":
    B, N1, N2 = 2, 16, 16
    x_dim, y1_dim, y2_dim = 2, 3, 1              # model_attr['time'] = False
    n_dim, n_mode, n_head, n_layer, n_block = 32, 8, 4, 2, 2

    key = jax.random.PRNGKey(0)
    kp, k1, k2, k3 = jax.random.split(key, 4)

    arrays = init_arrays(kp, n_block=n_block, n_mode=n_mode, n_dim=n_dim,
                         n_layer=n_layer, x_dim=x_dim, y1_dim=y1_dim, y2_dim=y2_dim)
    slab, offs = pack_params(arrays, n_layer=n_layer, n_block=n_block)
    model = dict(slab=slab, offs=offs, D=n_dim, n_mode=n_mode, n_head=n_head,
                 n_layer=n_layer, n_block=n_block, y2_dim=y2_dim)

    x1 = jax.random.normal(k1, (B, N1, x_dim), jnp.float32)
    x2 = jax.random.normal(k2, (B, N2, x_dim), jnp.float32)
    y = jax.random.normal(k3, (B, N1, y1_dim), jnp.float32)

    fwd = jax.jit(functools.partial(lno_triple_forward, model))
    out = fwd(x1, x2, y)
    jax.block_until_ready(out)
    assert out.shape == (B, N2, y2_dim)

    ref = lno_triple_reference(arrays, n_head, x1, x2, y)
    np.testing.assert_allclose(np.asarray(out), np.asarray(ref),
                               rtol=2e-2, atol=2e-3)

    print("KERNEL_OK")
</pallas_src>

<mosaic_0001>
module attributes {stable_mosaic.version = 11 : i64} {
  func.func @_lno_forward_kernel(%arg0: i32, %arg1: memref<96x3xf32, #tpu.memory_space<vmem>>, %arg2: memref<1336x64xf32, #tpu.memory_space<vmem>>, %arg3: memref<1x32xf32, #tpu.memory_space<vmem>>) attributes {dimension_semantics = [#tpu.dimension_semantics<arbitrary>], iteration_bounds = array<i64: 1>, scalar_prefetch = 0 : i64, scratch_operands = 0 : i64, tpu.core_type = #tpu.core_type<tc>, window_params = [{pipeline_mode = #tpu.pipeline_mode<synchronous>, transform_indices = @transform_0, window_bounds = array<i64: 96, 3>}, {pipeline_mode = #tpu.pipeline_mode<synchronous>, transform_indices = @transform_1, window_bounds = array<i64: 1336, 64>}, {pipeline_mode = #tpu.pipeline_mode<synchronous>, transform_indices = @transform_2, window_bounds = array<i64: 1, 32>}]} {
    %c0 = arith.constant 0 : index
    %c0_0 = arith.constant 0 : index
    %0 = vector.load %arg1[%c0, %c0_0] : memref<96x3xf32, #tpu.memory_space<vmem>>, vector<64x2xf32>
    %c64 = arith.constant 64 : index
    %c0_1 = arith.constant 0 : index
    %1 = vector.load %arg1[%c64, %c0_1] : memref<96x3xf32, #tpu.memory_space<vmem>>, vector<32x3xf32>
    %c0_2 = arith.constant 0 : index
    %c0_3 = arith.constant 0 : index
    %2 = vector.load %arg2[%c0_2, %c0_3] : memref<1336x64xf32, #tpu.memory_space<vmem>>, vector<2x32xf32>
    %cst = arith.constant dense<0.000000e+00> : vector<64x32xf32>
    %3 = tpu.matmul %0, %2, %cst {dimension_numbers = #tpu.dot_dimension_numbers<[1], [0], [0], [1], [0, 0, 1, 1], [], []>} : vector<64x2xf32>, vector<2x32xf32>, vector<64x32xf32> -> vector<64x32xf32>
    %c8 = arith.constant 8 : index
    %c0_4 = arith.constant 0 : index
    %4 = vector.load %arg2[%c8, %c0_4] : memref<1336x64xf32, #tpu.memory_space<vmem>>, vector<1x32xf32>
    %5 = vector.broadcast %4 : vector<1x32xf32> to vector<64x32xf32>
    %6 = arith.addf %3, %5 : vector<64x32xf32>
    %7 = math.tanh %6 : vector<64x32xf32>
    %c16 = arith.constant 16 : index
    %c0_5 = arith.constant 0 : index
    %8 = vector.load %arg2[%c16, %c0_5] : memref<1336x64xf32, #tpu.memory_space<vmem>>, vector<32x32xf32>
    %cst_6 = arith.constant dense<0.000000e+00> : vector<64x32xf32>
    %9 = tpu.matmul %7, %8, %cst_6 {dimension_numbers = #tpu.dot_dimension_numbers<[1], [0], [0], [1], [0, 0, 1, 1], [], []>} : vector<64x32xf32>, vector<32x32xf32>, vector<64x32xf32> -> vector<64x32xf32>
    %c48 = arith.constant 48 : index
    %c0_7 = arith.constant 0 : index
    %10 = vector.load %arg2[%c48, %c0_7] : memref<1336x64xf32, #tpu.memory_space<vmem>>, vector<1x32xf32>
    %11 = vector.broadcast %10 : vector<1x32xf32> to vector<64x32xf32>
    %12 = arith.addf %9, %11 : vector<64x32xf32>
    %13 = math.tanh %12 : vector<64x32xf32>
    %14 = arith.addf %7, %13 : vector<64x32xf32>
    %c56 = arith.constant 56 : index
    %c0_8 = arith.constant 0 : index
    %15 = vector.load %arg2[%c56, %c0_8] : memref<1336x64xf32, #tpu.memory_space<vmem>>, vector<32x32xf32>
    %cst_9 = arith.constant dense<0.000000e+00> : vector<64x32xf32>
    %16 = tpu.matmul %14, %15, %cst_9 {dimension_numbers = #tpu.dot_dimension_numbers<[1], [0], [0], [1], [0, 0, 1, 1], [], []>} : vector<64x32xf32>, vector<32x32xf32>, vector<64x32xf32> -> vector<64x32xf32>
    %c88 = arith.constant 88 : index
    %c0_10 = arith.constant 0 : index
    %17 = vector.load %arg2[%c88, %c0_10] : memref<1336x64xf32, #tpu.memory_space<vmem>>, vector<1x32xf32>
    %18 = vector.broadcast %17 : vector<1x32xf32> to vector<64x32xf32>
    %19 = arith.addf %16, %18 : vector<64x32xf32>
    %20 = math.tanh %19 : vector<64x32xf32>
    %21 = arith.addf %14, %20 : vector<64x32xf32>
    %c96 = arith.constant 96 : index
    %c0_11 = arith.constant 0 : index
    %22 = vector.load %arg2[%c96, %c0_11] : memref<1336x64xf32, #tpu.memory_space<vmem>>, vector<32x32xf32>
    %cst_12 = arith.constant dense<0.000000e+00> : vector<64x32xf32>
    %23 = tpu.matmul %21, %22, %cst_12 {dimension_numbers = #tpu.dot_dimension_numbers<[1], [0], [0], [1], [0, 0, 1, 1], [], []>} : vector<64x32xf32>, vector<32x32xf32>, vector<64x32xf32> -> vector<64x32xf32>
    %c128 = arith.constant 128 : index
    %c0_13 = arith.constant 0 : index
    %24 = vector.load %arg2[%c128, %c0_13] : memref<1336x64xf32, #tpu.memory_space<vmem>>, vector<1x32xf32>
    %25 = vector.broadcast %24 : vector<1x32xf32> to vector<64x32xf32>
    %26 = arith.addf %23, %25 : vector<64x32xf32>
    %27 = vector.extract_strided_slice %26 {offsets = [0, 0], sizes = [32, 32], strides = [1, 1]} : vector<64x32xf32> to vector<32x32xf32>
    %28 = vector.extract_strided_slice %26 {offsets = [32, 0], sizes = [32, 32], strides = [1, 1]} : vector<64x32xf32> to vector<32x32xf32>
    %c136 = arith.constant 136 : index
    %c0_14 = arith.constant 0 : index
    %29 = vector.load %arg2[%c136, %c0_14] : memref<1336x64xf32, #tpu.memory_space<vmem>>, vector<3x32xf32>
    %cst_15 = arith.constant dense<0.000000e+00> : vector<32x32xf32>
    %30 = tpu.matmul %1, %29, %cst_15 {dimension_numbers = #tpu.dot_dimension_numbers<[1], [0], [0], [1], [0, 0, 1, 1], [], []>} : vector<32x3xf32>, vector<3x32xf32>, vector<32x32xf32> -> vector<32x32xf32>
    %c144 = arith.constant 144 : index
    %c0_16 = arith.constant 0 : index
    %31 = vector.load %arg2[%c144, %c0_16] : memref<1336x64xf32, #tpu.memory_space<vmem>>, vector<1x32xf32>
    %32 = vector.broadcast %31 : vector<1x32xf32> to vector<32x32xf32>
    %33 = arith.addf %30, %32 : vector<32x32xf32>
    %34 = math.tanh %33 : vector<32x32xf32>
    %c152 = arith.constant 152 : index
    %c0_17 = arith.constant 0 : index
    %35 = vector.load %arg2[%c152, %c0_17] : memref<1336x64xf32, #tpu.memory_space<vmem>>, vector<32x32xf32>
    %cst_18 = arith.constant dense<0.000000e+00> : vector<32x32xf32>
    %36 = tpu.matmul %34, %35, %cst_18 {dimension_numbers = #tpu.dot_dimension_numbers<[1], [0], [0], [1], [0, 0, 1, 1], [], []>} : vector<32x32xf32>, vector<32x32xf32>, vector<32x32xf32> -> vector<32x32xf32>
    %c184 = arith.constant 184 : index
    %c0_19 = arith.constant 0 : index
    %37 = vector.load %arg2[%c184, %c0_19] : memref<1336x64xf32, #tpu.memory_space<vmem>>, vector<1x32xf32>
    %38 = vector.broadcast %37 : vector<1x32xf32> to vector<32x32xf32>
    %39 = arith.addf %36, %38 : vector<32x32xf32>
    %40 = math.tanh %39 : vector<32x32xf32>
    %41 = arith.addf %34, %40 : vector<32x32xf32>
    %c192 = arith.constant 192 : index
    %c0_20 = arith.constant 0 : index
    %42 = vector.load %arg2[%c192, %c0_20] : memref<1336x64xf32, #tpu.memory_space<vmem>>, vector<32x32xf32>
    %cst_21 = arith.constant dense<0.000000e+00> : vector<32x32xf32>
    %43 = tpu.matmul %41, %42, %cst_21 {dimension_numbers = #tpu.dot_dimension_numbers<[1], [0], [0], [1], [0, 0, 1, 1], [], []>} : vector<32x32xf32>, vector<32x32xf32>, vector<32x32xf32> -> vector<32x32xf32>
    %c224 = arith.constant 224 : index
    %c0_22 = arith.constant 0 : index
    %44 = vector.load %arg2[%c224, %c0_22] : memref<1336x64xf32, #tpu.memory_space<vmem>>, vector<1x32xf32>
    %45 = vector.broadcast %44 : vector<1x32xf32> to vector<32x32xf32>
    %46 = arith.addf %43, %45 : vector<32x32xf32>
    %47 = math.tanh %46 : vector<32x32xf32>
    %48 = arith.addf %41, %47 : vector<32x32xf32>
    %c232 = arith.constant 232 : index
    %c0_23 = arith.constant 0 : index
    %49 = vector.load %arg2[%c232, %c0_23] : memref<1336x64xf32, #tpu.memory_space<vmem>>, vector<32x32xf32>
    %cst_24 = arith.constant dense<0.000000e+00> : vector<32x32xf32>
    %50 = tpu.matmul %48, %49, %cst_24 {dimension_numbers = #tpu.dot_dimension_numbers<[1], [0], [0], [1], [0, 0, 1, 1], [], []>} : vector<32x32xf32>, vector<32x32xf32>, vector<32x32xf32> -> vector<32x32xf32>
    %c264 = arith.constant 264 : index
    %c0_25 = arith.constant 0 : index
    %51 = vector.load %arg2[%c264, %c0_25] : memref<1336x64xf32, #tpu.memory_space<vmem>>, vector<1x32xf32>
    %52 = vector.broadcast %51 : vector<1x32xf32> to vector<32x32xf32>
    %53 = arith.addf %50, %52 : vector<32x32xf32>
    %c272 = arith.constant 272 : index
    %c0_26 = arith.constant 0 : index
    %54 = vector.load %arg2[%c272, %c0_26] : memref<1336x64xf32, #tpu.memory_space<vmem>>, vector<32x32xf32>
    %cst_27 = arith.constant dense<0.000000e+00> : vector<32x32xf32>
    %55 = tpu.matmul %27, %54, %cst_27 {dimension_numbers = #tpu.dot_dimension_numbers<[1], [0], [0], [1], [0, 0, 1, 1], [], []>} : vector<32x32xf32>, vector<32x32xf32>, vector<32x32xf32> -> vector<32x32xf32>
    %c304 = arith.constant 304 : index
    %c0_28 = arith.constant 0 : index
    %56 = vector.load %arg2[%c304, %c0_28] : memref<1336x64xf32, #tpu.memory_space<vmem>>, vector<1x32xf32>
    %57 = vector.broadcast %56 : vector<1x32xf32> to vector<32x32xf32>
    %58 = arith.addf %55, %57 : vector<32x32xf32>
    %59 = math.tanh %58 : vector<32x32xf32>
    %c312 = arith.constant 312 : index
    %c0_29 = arith.constant 0 : index
    %60 = vector.load %arg2[%c312, %c0_29] : memref<1336x64xf32, #tpu.memory_space<vmem>>, vector<32x32xf32>
    %cst_30 = arith.constant dense<0.000000e+00> : vector<32x32xf32>
    %61 = tpu.matmul %59, %60, %cst_30 {dimension_numbers = #tpu.dot_dimension_numbers<[1], [0], [0], [1], [0, 0, 1, 1], [], []>} : vector<32x32xf32>, vector<32x32xf32>, vector<32x32xf32> -> vector<32x32xf32>
    %c344 = arith.constant 344 : index
    %c0_31 = arith.constant 0 : index
    %62 = vector.load %arg2[%c344, %c0_31] : memref<1336x64xf32, #tpu.memory_space<vmem>>, vector<1x32xf32>
    %63 = vector.broadcast %62 : vector<1x32xf32> to vector<32x32xf32>
    %64 = arith.addf %61, %63 : vector<32x32xf32>
    %65 = math.tanh %64 : vector<32x32xf32>
    %66 = arith.addf %59, %65 : vector<32x32xf32>
    %c352 = arith.constant 352 : index
    %c0_32 = arith.constant 0 : index
    %67 = vector.load %arg2[%c352, %c0_32] : memref<1336x64xf32, #tpu.memory_space<vmem>>, vector<32x32xf32>
    %cst_33 = arith.constant dense<0.000000e+00> : vector<32x32xf32>
    %68 = tpu.matmul %66, %67, %cst_33 {dimension_numbers = #tpu.dot_dimension_numbers<[1], [0], [0], [1], [0, 0, 1, 1], [], []>} : vector<32x32xf32>, vector<32x32xf32>, vector<32x32xf32> -> vector<32x32xf32>
    %c384 = arith.constant 384 : index
    %c0_34 = arith.constant 0 : index
    %69 = vector.load %arg2[%c384, %c0_34] : memref<1336x64xf32, #tpu.memory_space<vmem>>, vector<1x32xf32>
    %70 = vector.broadcast %69 : vector<1x32xf32> to vector<32x32xf32>
    %71 = arith.addf %68, %70 : vector<32x32xf32>
    %72 = math.tanh %71 : vector<32x32xf32>
    %73 = arith.addf %66, %72 : vector<32x32xf32>
    %c392 = arith.constant 392 : index
    %c0_35 = arith.constant 0 : index
    %74 = vector.load %arg2[%c392, %c0_35] : memref<1336x64xf32, #tpu.memory_space<vmem>>, vector<32x8xf32>
    %cst_36 = arith.constant dense<0.000000e+00> : vector<32x8xf32>
    %75 = tpu.matmul %73, %74, %cst_36 {dimension_numbers = #tpu.dot_dimension_numbers<[1], [0], [0], [1], [0, 0, 1, 1], [], []>} : vector<32x32xf32>, vector<32x8xf32>, vector<32x8xf32> -> vector<32x8xf32>
    %c424 = arith.constant 424 : index
    %c0_37 = arith.constant 0 : index
    %76 = vector.load %arg2[%c424, %c0_37] : memref<1336x64xf32, #tpu.memory_space<vmem>>, vector<1x8xf32>
    %77 = vector.broadcast %76 : vector<1x8xf32> to vector<32x8xf32>
    %78 = arith.addf %75, %77 : vector<32x8xf32>
    %79 = vector.extract_strided_slice %78 {offsets = [0, 0], sizes = [16, 8], strides = [1, 1]} : vector<32x8xf32> to vector<16x8xf32>
    %cst_38 = arith.constant dense<0xFF800000> : vector<8xf32>
    %80 = vector.multi_reduction <maximumf>, %79, %cst_38 [0] : vector<16x8xf32> to vector<8xf32>
    %81 = vector.shape_cast %80 : vector<8xf32> to vector<1x8xf32>
    %82 = vector.broadcast %81 : vector<1x8xf32> to vector<16x8xf32>
    %83 = arith.subf %79, %82 : vector<16x8xf32>
    %84 = math.exp %83 : vector<16x8xf32>
    %cst_39 = arith.constant dense<0.000000e+00> : vector<8xf32>
    %85 = vector.multi_reduction <add>, %84, %cst_39 [0] : vector<16x8xf32> to vector<8xf32>
    %86 = vector.shape_cast %85 : vector<8xf32> to vector<1x8xf32>
    %87 = tpu.reciprocal %86 {approx = true} : vector<1x8xf32> -> vector<1x8xf32>
    %88 = vector.broadcast %87 : vector<1x8xf32> to vector<16x8xf32>
    %89 = arith.mulf %84, %88 : vector<16x8xf32>
    %90 = vector.extract_strided_slice %53 {offsets = [0, 0], sizes = [16, 32], strides = [1, 1]} : vector<32x32xf32> to vector<16x32xf32>
    %cst_40 = arith.constant dense<0.000000e+00> : vector<8x32xf32>
    %91 = tpu.matmul %89, %90, %cst_40 {dimension_numbers = #tpu.dot_dimension_numbers<[0], [0], [1], [1], [0, 1, 1, 1], [], []>} : vector<16x8xf32>, vector<16x32xf32>, vector<8x32xf32> -> vector<8x32xf32>
    %92 = vector.extract_strided_slice %78 {offsets = [16, 0], sizes = [16, 8], strides = [1, 1]} : vector<32x8xf32> to vector<16x8xf32>
    %cst_41 = arith.constant dense<0xFF800000> : vector<8xf32>
    %93 = vector.multi_reduction <maximumf>, %92, %cst_41 [0] : vector<16x8xf32> to vector<8xf32>
    %94 = vector.shape_cast %93 : vector<8xf32> to vector<1x8xf32>
    %95 = vector.broadcast %94 : vector<1x8xf32> to vector<16x8xf32>
    %96 = arith.subf %92, %95 : vector<16x8xf32>
    %97 = math.exp %96 : vector<16x8xf32>
    %cst_42 = arith.constant dense<0.000000e+00> : vector<8xf32>
    %98 = vector.multi_reduction <add>, %97, %cst_42 [0] : vector<16x8xf32> to vector<8xf32>
    %99 = vector.shape_cast %98 : vector<8xf32> to vector<1x8xf32>
    %100 = tpu.reciprocal %99 {approx = true} : vector<1x8xf32> -> vector<1x8xf32>
    %101 = vector.broadcast %100 : vector<1x8xf32> to vector<16x8xf32>
    %102 = arith.mulf %97, %101 : vector<16x8xf32>
    %103 = vector.extract_strided_slice %53 {offsets = [16, 0], sizes = [16, 32], strides = [1, 1]} : vector<32x32xf32> to vector<16x32xf32>
    %cst_43 = arith.constant dense<0.000000e+00> : vector<8x32xf32>
    %104 = tpu.matmul %102, %103, %cst_43 {dimension_numbers = #tpu.dot_dimension_numbers<[0], [0], [1], [1], [0, 1, 1, 1], [], []>} : vector<16x8xf32>, vector<16x32xf32>, vector<8x32xf32> -> vector<8x32xf32>
    %105 = tpu.concatenate %91, %104 in 0 : vector<8x32xf32>, vector<8x32xf32> -> vector<16x32xf32>
    %106 = tpu.iota {dimensions = array<i32: 1>} : vector<4x32xi32>
    %107 = tpu.iota {dimensions = array<i32: 0>} : vector<4x32xi32>
    %c8_i32 = arith.constant 8 : i32
    %108 = vector.broadcast %c8_i32 : i32 to vector<4x32xi32>
    %109 = arith.muli %107, %108 : vector<4x32xi32>
    %110 = arith.cmpi sge, %106, %109 : vector<4x32xi32>
    %c1_i32 = arith.constant 1 : i32
    %111 = vector.broadcast %c1_i32 : i32 to vector<4x32xi32>
    %112 = arith.addi %107, %111 : vector<4x32xi32>
    %c8_i32_44 = arith.constant 8 : i32
    %113 = vector.broadcast %c8_i32_44 : i32 to vector<4x32xi32>
    %114 = arith.muli %112, %113 : vector<4x32xi32>
    %115 = arith.cmpi slt, %106, %114 : vector<4x32xi32>
    %116 = arith.andi %110, %115 : vector<4x32xi1>
    %117 = arith.extui %116 : vector<4x32xi1> to vector<4x32xi32>
    %118 = arith.sitofp %117 : vector<4x32xi32> to vector<4x32xf32>
    %c728 = arith.constant 728 : index
    %c0_45 = arith.constant 0 : index
    %119 = vector.load %arg2[%c728, %c0_45] : memref<1336x64xf32, #tpu.memory_space<vmem>>, vector<1x32xf32>
    %c736 = arith.constant 736 : index
    %c0_46 = arith.constant 0 : index
    %120 = vector.load %arg2[%c736, %c0_46] : memref<1336x64xf32, #tpu.memory_space<vmem>>, vector<1x32xf32>
    %cst_47 = arith.constant dense<0.000000e+00> : vector<16xf32>
    %121 = vector.multi_reduction <add>, %105, %cst_47 [1] : vector<16x32xf32> to vector<16xf32>
    %122 = vector.shape_cast %121 : vector<16xf32> to vector<16x1xf32>
    %cst_48 = arith.constant 3.200000e+01 : f32
    %123 = vector.broadcast %cst_48 : f32 to vector<16x1xf32>
    %124 = arith.divf %122, %123 : vector<16x1xf32>
    %125 = vector.broadcast %124 : vector<16x1xf32> to vector<16x32xf32>
    %126 = arith.subf %105, %125 : vector<16x32xf32>
    %127 = arith.mulf %126, %126 : vector<16x32xf32>
    %cst_49 = arith.constant dense<0.000000e+00> : vector<16xf32>
    %128 = vector.multi_reduction <add>, %127, %cst_49 [1] : vector<16x32xf32> to vector<16xf32>
    %129 = vector.shape_cast %128 : vector<16xf32> to vector<16x1xf32>
    %cst_50 = arith.constant 3.200000e+01 : f32
    %130 = vector.broadcast %cst_50 : f32 to vector<16x1xf32>
    %131 = arith.divf %129, %130 : vector<16x1xf32>
    %132 = vector.broadcast %124 : vector<16x1xf32> to vector<16x32xf32>
    %133 = arith.subf %105, %132 : vector<16x32xf32>
    %cst_51 = arith.constant 9.99999974E-6 : f32
    %134 = vector.broadcast %cst_51 : f32 to vector<16x1xf32>
    %135 = arith.addf %131, %134 : vector<16x1xf32>
    %136 = math.rsqrt %135 : vector<16x1xf32>
    %137 = vector.broadcast %136 : vector<16x1xf32> to vector<16x32xf32>
    %138 = arith.mulf %133, %137 : vector<16x32xf32>
    %139 = vector.broadcast %119 : vector<1x32xf32> to vector<16x32xf32>
    %140 = arith.mulf %138, %139 : vector<16x32xf32>
    %141 = vector.broadcast %120 : vector<1x32xf32> to vector<16x32xf32>
    %142 = arith.addf %140, %141 : vector<16x32xf32>
    %c744 = arith.constant 744 : index
    %c0_52 = arith.constant 0 : index
    %143 = vector.load %arg2[%c744, %c0_52] : memref<1336x64xf32, #tpu.memory_space<vmem>>, vector<32x32xf32>
    %cst_53 = arith.constant dense<0.000000e+00> : vector<16x32xf32>
    %144 = tpu.matmul %142, %143, %cst_53 {dimension_numbers = #tpu.dot_dimension_numbers<[1], [0], [0], [1], [0, 0, 1, 1], [], []>} : vector<16x32xf32>, vector<32x32xf32>, vector<16x32xf32> -> vector<16x32xf32>
    %c776 = arith.constant 776 : index
    %c0_54 = arith.constant 0 : index
    %145 = vector.load %arg2[%c776, %c0_54] : memref<1336x64xf32, #tpu.memory_space<vmem>>, vector<1x32xf32>
    %146 = vector.broadcast %145 : vector<1x32xf32> to vector<16x32xf32>
    %147 = arith.addf %144, %146 : vector<16x32xf32>
    %c784 = arith.constant 784 : index
    %c0_55 = arith.constant 0 : index
    %148 = vector.load %arg2[%c784, %c0_55] : memref<1336x64xf32, #tpu.memory_space<vmem>>, vector<32x32xf32>
    %cst_56 = arith.constant dense<0.000000e+00> : vector<16x32xf32>
    %149 = tpu.matmul %142, %148, %cst_56 {dimension_numbers = #tpu.dot_dimension_numbers<[1], [0], [0], [1], [0, 0, 1, 1], [], []>} : vector<16x32xf32>, vector<32x32xf32>, vector<16x32xf32> -> vector<16x32xf32>
    %c816 = arith.constant 816 : index
    %c0_57 = arith.constant 0 : index
    %150 = vector.load %arg2[%c816, %c0_57] : memref<1336x64xf32, #tpu.memory_space<vmem>>, vector<1x32xf32>
    %151 = vector.broadcast %150 : vector<1x32xf32> to vector<16x32xf32>
    %152 = arith.addf %149, %151 : vector<16x32xf32>
    %c824 = arith.constant 824 : index
    %c0_58 = arith.constant 0 : index
    %153 = vector.load %arg2[%c824, %c0_58] : memref<1336x64xf32, #tpu.memory_space<vmem>>, vector<32x32xf32>
    %cst_59 = arith.constant dense<0.000000e+00> : vector<16x32xf32>
    %154 = tpu.matmul %142, %153, %cst_59 {dimension_numbers = #tpu.dot_dimension_numbers<[1], [0], [0], [1], [0, 0, 1, 1], [], []>} : vector<16x32xf32>, vector<32x32xf32>, vector<16x32xf32> -> vector<16x32xf32>
    %c856 = arith.constant 856 : index
    %c0_60 = arith.constant 0 : index
    %155 = vector.load %arg2[%c856, %c0_60] : memref<1336x64xf32, #tpu.memory_space<vmem>>, vector<1x32xf32>
    %156 = vector.broadcast %155 : vector<1x32xf32> to vector<16x32xf32>
    %157 = arith.addf %154, %156 : vector<16x32xf32>
    %158 = vector.extract_strided_slice %147 {offsets = [0, 0], sizes = [8, 32], strides = [1, 1]} : vector<16x32xf32> to vector<8x32xf32>
    %159 = vector.extract_strided_slice %152 {offsets = [0, 0], sizes = [8, 32], strides = [1, 1]} : vector<16x32xf32> to vector<8x32xf32>
    %160 = vector.extract_strided_slice %157 {offsets = [0, 0], sizes = [8, 32], strides = [1, 1]} : vector<16x32xf32> to vector<8x32xf32>
    %161 = vector.shape_cast %158 : vector<8x32xf32> to vector<1x8x32xf32>
    %162 = vector.shape_cast %118 : vector<4x32xf32> to vector<4x1x32xf32>
    %163 = vector.broadcast %161 : vector<1x8x32xf32> to vector<4x8x32xf32>
    %164 = vector.broadcast %162 : vector<4x1x32xf32> to vector<4x8x32xf32>
    %165 = arith.mulf %163, %164 : vector<4x8x32xf32>
    %166 = vector.shape_cast %165 : vector<4x8x32xf32> to vector<32x32xf32>
    %cst_61 = arith.constant dense<0.000000e+00> : vector<32x8xf32>
    %167 = tpu.matmul %166, %159, %cst_61 {dimension_numbers = #tpu.dot_dimension_numbers<[1], [1], [0], [0], [0, 0, 1, 0], [], []>} : vector<32x32xf32>, vector<8x32xf32>, vector<32x8xf32> -> vector<32x8xf32>
    %cst_62 = arith.constant 0.353553385 : f32
    %168 = vector.broadcast %cst_62 : f32 to vector<32x8xf32>
    %169 = arith.mulf %167, %168 : vector<32x8xf32>
    %cst_63 = arith.constant dense<0xFF800000> : vector<32xf32>
    %170 = vector.multi_reduction <maximumf>, %169, %cst_63 [1] : vector<32x8xf32> to vector<32xf32>
    %171 = vector.shape_cast %170 : vector<32xf32> to vector<32x1xf32>
    %172 = vector.broadcast %171 : vector<32x1xf32> to vector<32x8xf32>
    %173 = arith.subf %169, %172 : vector<32x8xf32>
    %174 = math.exp %173 : vector<32x8xf32>
    %cst_64 = arith.constant dense<0.000000e+00> : vector<32xf32>
    %175 = vector.multi_reduction <add>, %174, %cst_64 [1] : vector<32x8xf32> to vector<32xf32>
    %176 = vector.shape_cast %175 : vector<32xf32> to vector<32x1xf32>
    %177 = tpu.reciprocal %176 {approx = true} : vector<32x1xf32> -> vector<32x1xf32>
    %178 = vector.broadcast %177 : vector<32x1xf32> to vector<32x8xf32>
    %179 = arith.mulf %174, %178 : vector<32x8xf32>
    %cst_65 = arith.constant dense<0.000000e+00> : vector<32x32xf32>
    %180 = tpu.matmul %179, %160, %cst_65 {dimension_numbers = #tpu.dot_dimension_numbers<[1], [0], [0], [1], [0, 0, 1, 1], [], []>} : vector<32x8xf32>, vector<8x32xf32>, vector<32x32xf32> -> vector<32x32xf32>
    %181 = vector.shape_cast %180 : vector<32x32xf32> to vector<4x8x32xf32>
    %182 = vector.shape_cast %118 : vector<4x32xf32> to vector<4x1x32xf32>
    %183 = vector.broadcast %182 : vector<4x1x32xf32> to vector<4x8x32xf32>
    %184 = arith.mulf %181, %183 : vector<4x8x32xf32>
    %cst_66 = arith.constant dense<0.000000e+00> : vector<8x32xf32>
    %185 = vector.multi_reduction <add>, %184, %cst_66 [0] : vector<4x8x32xf32> to vector<8x32xf32>
    %186 = vector.extract_strided_slice %147 {offsets = [8, 0], sizes = [8, 32], strides = [1, 1]} : vector<16x32xf32> to vector<8x32xf32>
    %187 = vector.extract_strided_slice %152 {offsets = [8, 0], sizes = [8, 32], strides = [1, 1]} : vector<16x32xf32> to vector<8x32xf32>
    %188 = vector.extract_strided_slice %157 {offsets = [8, 0], sizes = [8, 32], strides = [1, 1]} : vector<16x32xf32> to vector<8x32xf32>
    %189 = vector.shape_cast %186 : vector<8x32xf32> to vector<1x8x32xf32>
    %190 = vector.shape_cast %118 : vector<4x32xf32> to vector<4x1x32xf32>
    %191 = vector.broadcast %189 : vector<1x8x32xf32> to vector<4x8x32xf32>
    %192 = vector.broadcast %190 : vector<4x1x32xf32> to vector<4x8x32xf32>
    %193 = arith.mulf %191, %192 : vector<4x8x32xf32>
    %194 = vector.shape_cast %193 : vector<4x8x32xf32> to vector<32x32xf32>
    %cst_67 = arith.constant dense<0.000000e+00> : vector<32x8xf32>
    %195 = tpu.matmul %194, %187, %cst_67 {dimension_numbers = #tpu.dot_dimension_numbers<[1], [1], [0], [0], [0, 0, 1, 0], [], []>} : vector<32x32xf32>, vector<8x32xf32>, vector<32x8xf32> -> vector<32x8xf32>
    %cst_68 = arith.constant 0.353553385 : f32
    %196 = vector.broadcast %cst_68 : f32 to vector<32x8xf32>
    %197 = arith.mulf %195, %196 : vector<32x8xf32>
    %cst_69 = arith.constant dense<0xFF800000> : vector<32xf32>
    %198 = vector.multi_reduction <maximumf>, %197, %cst_69 [1] : vector<32x8xf32> to vector<32xf32>
    %199 = vector.shape_cast %198 : vector<32xf32> to vector<32x1xf32>
    %200 = vector.broadcast %199 : vector<32x1xf32> to vector<32x8xf32>
    %201 = arith.subf %197, %200 : vector<32x8xf32>
    %202 = math.exp %201 : vector<32x8xf32>
    %cst_70 = arith.constant dense<0.000000e+00> : vector<32xf32>
    %203 = vector.multi_reduction <add>, %202, %cst_70 [1] : vector<32x8xf32> to vector<32xf32>
    %204 = vector.shape_cast %203 : vector<32xf32> to vector<32x1xf32>
    %205 = tpu.reciprocal %204 {approx = true} : vector<32x1xf32> -> vector<32x1xf32>
    %206 = vector.broadcast %205 : vector<32x1xf32> to vector<32x8xf32>
    %207 = arith.mulf %202, %206 : vector<32x8xf32>
    %cst_71 = arith.constant dense<0.000000e+00> : vector<32x32xf32>
    %208 = tpu.matmul %207, %188, %cst_71 {dimension_numbers = #tpu.dot_dimension_numbers<[1], [0], [0], [1], [0, 0, 1, 1], [], []>} : vector<32x8xf32>, vector<8x32xf32>, vector<32x32xf32> -> vector<32x32xf32>
    %209 = vector.shape_cast %208 : vector<32x32xf32> to vector<4x8x32xf32>
    %210 = vector.shape_cast %118 : vector<4x32xf32> to vector<4x1x32xf32>
    %211 = vector.broadcast %210 : vector<4x1x32xf32> to vector<4x8x32xf32>
    %212 = arith.mulf %209, %211 : vector<4x8x32xf32>
    %cst_72 = arith.constant dense<0.000000e+00> : vector<8x32xf32>
    %213 = vector.multi_reduction <add>, %212, %cst_72 [0] : vector<4x8x32xf32> to vector<8x32xf32>
    %214 = tpu.concatenate %185, %213 in 0 : vector<8x32xf32>, vector<8x32xf32> -> vector<16x32xf32>
    %c864 = arith.constant 864 : index
    %c0_73 = arith.constant 0 : index
    %215 = vector.load %arg2[%c864, %c0_73] : memref<1336x64xf32, #tpu.memory_space<vmem>>, vector<32x32xf32>
    %cst_74 = arith.constant dense<0.000000e+00> : vector<16x32xf32>
    %216 = tpu.matmul %214, %215, %cst_74 {dimension_numbers = #tpu.dot_dimension_numbers<[1], [0], [0], [1], [0, 0, 1, 1], [], []>} : vector<16x32xf32>, vector<32x32xf32>, vector<16x32xf32> -> vector<16x32xf32>
    %217 = arith.addf %105, %216 : vector<16x32xf32>
    %c896 = arith.constant 896 : index
    %c0_75 = arith.constant 0 : index
    %218 = vector.load %arg2[%c896, %c0_75] : memref<1336x64xf32, #tpu.memory_space<vmem>>, vector<1x32xf32>
    %219 = vector.broadcast %218 : vector<1x32xf32> to vector<16x32xf32>
    %220 = arith.addf %217, %219 : vector<16x32xf32>
    %c904 = arith.constant 904 : index
    %c0_76 = arith.constant 0 : index
    %221 = vector.load %arg2[%c904, %c0_76] : memref<1336x64xf32, #tpu.memory_space<vmem>>, vector<1x32xf32>
    %c912 = arith.constant 912 : index
    %c0_77 = arith.constant 0 : index
    %222 = vector.load %arg2[%c912, %c0_77] : memref<1336x64xf32, #tpu.memory_space<vmem>>, vector<1x32xf32>
    %cst_78 = arith.constant dense<0.000000e+00> : vector<16xf32>
    %223 = vector.multi_reduction <add>, %220, %cst_78 [1] : vector<16x32xf32> to vector<16xf32>
    %224 = vector.shape_cast %223 : vector<16xf32> to vector<16x1xf32>
    %cst_79 = arith.constant 3.200000e+01 : f32
    %225 = vector.broadcast %cst_79 : f32 to vector<16x1xf32>
    %226 = arith.divf %224, %225 : vector<16x1xf32>
    %227 = vector.broadcast %226 : vector<16x1xf32> to vector<16x32xf32>
    %228 = arith.subf %220, %227 : vector<16x32xf32>
    %229 = arith.mulf %228, %228 : vector<16x32xf32>
    %cst_80 = arith.constant dense<0.000000e+00> : vector<16xf32>
    %230 = vector.multi_reduction <add>, %229, %cst_80 [1] : vector<16x32xf32> to vector<16xf32>
    %231 = vector.shape_cast %230 : vector<16xf32> to vector<16x1xf32>
    %cst_81 = arith.constant 3.200000e+01 : f32
    %232 = vector.broadcast %cst_81 : f32 to vector<16x1xf32>
    %233 = arith.divf %231, %232 : vector<16x1xf32>
    %234 = vector.broadcast %226 : vector<16x1xf32> to vector<16x32xf32>
    %235 = arith.subf %220, %234 : vector<16x32xf32>
    %cst_82 = arith.constant 9.99999974E-6 : f32
    %236 = vector.broadcast %cst_82 : f32 to vector<16x1xf32>
    %237 = arith.addf %233, %236 : vector<16x1xf32>
    %238 = math.rsqrt %237 : vector<16x1xf32>
    %239 = vector.broadcast %238 : vector<16x1xf32> to vector<16x32xf32>
    %240 = arith.mulf %235, %239 : vector<16x32xf32>
    %241 = vector.broadcast %221 : vector<1x32xf32> to vector<16x32xf32>
    %242 = arith.mulf %240, %241 : vector<16x32xf32>
    %243 = vector.broadcast %222 : vector<1x32xf32> to vector<16x32xf32>
    %244 = arith.addf %242, %243 : vector<16x32xf32>
    %c920 = arith.constant 920 : index
    %c0_83 = arith.constant 0 : index
    %245 = vector.load %arg2[%c920, %c0_83] : memref<1336x64xf32, #tpu.memory_space<vmem>>, vector<32x64xf32>
    %cst_84 = arith.constant dense<0.000000e+00> : vector<16x64xf32>
    %246 = tpu.matmul %244, %245, %cst_84 {dimension_numbers = #tpu.dot_dimension_numbers<[1], [0], [0], [1], [0, 0, 1, 1], [], []>} : vector<16x32xf32>, vector<32x64xf32>, vector<16x64xf32> -> vector<16x64xf32>
    %c952 = arith.constant 952 : index
    %c0_85 = arith.constant 0 : index
    %247 = vector.load %arg2[%c952, %c0_85] : memref<1336x64xf32, #tpu.memory_space<vmem>>, vector<1x64xf32>
    %248 = vector.broadcast %247 : vector<1x64xf32> to vector<16x64xf32>
    %249 = arith.addf %246, %248 : vector<16x64xf32>
    %250 = math.tanh %249 : vector<16x64xf32>
    %c960 = arith.constant 960 : index
    %c0_86 = arith.constant 0 : index
    %251 = vector.load %arg2[%c960, %c0_86] : memref<1336x64xf32, #tpu.memory_space<vmem>>, vector<64x32xf32>
    %cst_87 = arith.constant dense<0.000000e+00> : vector<16x32xf32>
    %252 = tpu.matmul %250, %251, %cst_87 {dimension_numbers = #tpu.dot_dimension_numbers<[1], [0], [0], [1], [0, 0, 1, 1], [], []>} : vector<16x64xf32>, vector<64x32xf32>, vector<16x32xf32> -> vector<16x32xf32>
    %253 = arith.addf %220, %252 : vector<16x32xf32>
    %c1024 = arith.constant 1024 : index
    %c0_88 = arith.constant 0 : index
    %254 = vector.load %arg2[%c1024, %c0_88] : memref<1336x64xf32, #tpu.memory_space<vmem>>, vector<1x32xf32>
    %255 = vector.broadcast %254 : vector<1x32xf32> to vector<16x32xf32>
    %256 = arith.addf %253, %255 : vector<16x32xf32>
    %c1032 = arith.constant 1032 : index
    %c0_89 = arith.constant 0 : index
    %257 = vector.load %arg2[%c1032, %c0_89] : memref<1336x64xf32, #tpu.memory_space<vmem>>, vector<1x32xf32>
    %c1040 = arith.constant 1040 : index
    %c0_90 = arith.constant 0 : index
    %258 = vector.load %arg2[%c1040, %c0_90] : memref<1336x64xf32, #tpu.memory_space<vmem>>, vector<1x32xf32>
    %cst_91 = arith.constant dense<0.000000e+00> : vector<16xf32>
    %259 = vector.multi_reduction <add>, %256, %cst_91 [1] : vector<16x32xf32> to vector<16xf32>
    %260 = vector.shape_cast %259 : vector<16xf32> to vector<16x1xf32>
    %cst_92 = arith.constant 3.200000e+01 : f32
    %261 = vector.broadcast %cst_92 : f32 to vector<16x1xf32>
    %262 = arith.divf %260, %261 : vector<16x1xf32>
    %263 = vector.broadcast %262 : vector<16x1xf32> to vector<16x32xf32>
    %264 = arith.subf %256, %263 : vector<16x32xf32>
    %265 = arith.mulf %264, %264 : vector<16x32xf32>
    %cst_93 = arith.constant dense<0.000000e+00> : vector<16xf32>
    %266 = vector.multi_reduction <add>, %265, %cst_93 [1] : vector<16x32xf32> to vector<16xf32>
    %267 = vector.shape_cast %266 : vector<16xf32> to vector<16x1xf32>
    %cst_94 = arith.constant 3.200000e+01 : f32
    %268 = vector.broadcast %cst_94 : f32 to vector<16x1xf32>
    %269 = arith.divf %267, %268 : vector<16x1xf32>
    %270 = vector.broadcast %262 : vector<16x1xf32> to vector<16x32xf32>
    %271 = arith.subf %256, %270 : vector<16x32xf32>
    %cst_95 = arith.constant 9.99999974E-6 : f32
    %272 = vector.broadcast %cst_95 : f32 to vector<16x1xf32>
    %273 = arith.addf %269, %272 : vector<16x1xf32>
    %274 = math.rsqrt %273 : vector<16x1xf32>
    %275 = vector.broadcast %274 : vector<16x1xf32> to vector<16x32xf32>
    %276 = arith.mulf %271, %275 : vector<16x32xf32>
    %277 = vector.broadcast %257 : vector<1x32xf32> to vector<16x32xf32>
    %278 = arith.mulf %276, %277 : vector<16x32xf32>
    %279 = vector.broadcast %258 : vector<1x32xf32> to vector<16x32xf32>
    %280 = arith.addf %278, %279 : vector<16x32xf32>
    %c1048 = arith.constant 1048 : index
    %c0_96 = arith.constant 0 : index
    %281 = vector.load %arg2[%c1048, %c0_96] : memref<1336x64xf32, #tpu.memory_space<vmem>>, vector<32x32xf32>
    %cst_97 = arith.constant dense<0.000000e+00> : vector<16x32xf32>
    %282 = tpu.matmul %280, %281, %cst_97 {dimension_numbers = #tpu.dot_dimension_numbers<[1], [0], [0], [1], [0, 0, 1, 1], [], []>} : vector<16x32xf32>, vector<32x32xf32>, vector<16x32xf32> -> vector<16x32xf32>
    %c1080 = arith.constant 1080 : index
    %c0_98 = arith.constant 0 : index
    %283 = vector.load %arg2[%c1080, %c0_98] : memref<1336x64xf32, #tpu.memory_space<vmem>>, vector<1x32xf32>
    %284 = vector.broadcast %283 : vector<1x32xf32> to vector<16x32xf32>
    %285 = arith.addf %282, %284 : vector<16x32xf32>
    %c1088 = arith.constant 1088 : index
    %c0_99 = arith.constant 0 : index
    %286 = vector.load %arg2[%c1088, %c0_99] : memref<1336x64xf32, #tpu.memory_space<vmem>>, vector<32x32xf32>
    %cst_100 = arith.constant dense<0.000000e+00> : vector<16x32xf32>
    %287 = tpu.matmul %280, %286, %cst_100 {dimension_numbers = #tpu.dot_dimension_numbers<[1], [0], [0], [1], [0, 0, 1, 1], [], []>} : vector<16x32xf32>, vector<32x32xf32>, vector<16x32xf32> -> vector<16x32xf32>
    %c1120 = arith.constant 1120 : index
    %c0_101 = arith.constant 0 : index
    %288 = vector.load %arg2[%c1120, %c0_101] : memref<1336x64xf32, #tpu.memory_space<vmem>>, vector<1x32xf32>
    %289 = vector.broadcast %288 : vector<1x32xf32> to vector<16x32xf32>
    %290 = arith.addf %287, %289 : vector<16x32xf32>
    %c1128 = arith.constant 1128 : index
    %c0_102 = arith.constant 0 : index
    %291 = vector.load %arg2[%c1128, %c0_102] : memref<1336x64xf32, #tpu.memory_space<vmem>>, vector<32x32xf32>
    %cst_103 = arith.constant dense<0.000000e+00> : vector<16x32xf32>
    %292 = tpu.matmul %280, %291, %cst_103 {dimension_numbers = #tpu.dot_dimension_numbers<[1], [0], [0], [1], [0, 0, 1, 1], [], []>} : vector<16x32xf32>, vector<32x32xf32>, vector<16x32xf32> -> vector<16x32xf32>
    %c1160 = arith.constant 1160 : index
    %c0_104 = arith.constant 0 : index
    %293 = vector.load %arg2[%c1160, %c0_104] : memref<1336x64xf32, #tpu.memory_space<vmem>>, vector<1x32xf32>
    %294 = vector.broadcast %293 : vector<1x32xf32> to vector<16x32xf32>
    %295 = arith.addf %292, %294 : vector<16x32xf32>
    %296 = vector.extract_strided_slice %285 {offsets = [0, 0], sizes = [8, 32], strides = [1, 1]} : vector<16x32xf32> to vector<8x32xf32>
    %297 = vector.extract_strided_slice %290 {offsets = [0, 0], sizes = [8, 32], strides = [1, 1]} : vector<16x32xf32> to vector<8x32xf32>
    %298 = vector.extract_strided_slice %295 {offsets = [0, 0], sizes = [8, 32], strides = [1, 1]} : vector<16x32xf32> to vector<8x32xf32>
    %299 = vector.shape_cast %296 : vector<8x32xf32> to vector<1x8x32xf32>
    %300 = vector.shape_cast %118 : vector<4x32xf32> to vector<4x1x32xf32>
    %301 = vector.broadcast %299 : vector<1x8x32xf32> to vector<4x8x32xf32>
    %302 = vector.broadcast %300 : vector<4x1x32xf32> to vector<4x8x32xf32>
    %303 = arith.mulf %301, %302 : vector<4x8x32xf32>
    %304 = vector.shape_cast %303 : vector<4x8x32xf32> to vector<32x32xf32>
    %cst_105 = arith.constant dense<0.000000e+00> : vector<32x8xf32>
    %305 = tpu.matmul %304, %297, %cst_105 {dimension_numbers = #tpu.dot_dimension_numbers<[1], [1], [0], [0], [0, 0, 1, 0], [], []>} : vector<32x32xf32>, vector<8x32xf32>, vector<32x8xf32> -> vector<32x8xf32>
    %cst_106 = arith.constant 0.353553385 : f32
    %306 = vector.broadcast %cst_106 : f32 to vector<32x8xf32>
    %307 = arith.mulf %305, %306 : vector<32x8xf32>
    %cst_107 = arith.constant dense<0xFF800000> : vector<32xf32>
    %308 = vector.multi_reduction <maximumf>, %307, %cst_107 [1] : vector<32x8xf32> to vector<32xf32>
    %309 = vector.shape_cast %308 : vector<32xf32> to vector<32x1xf32>
    %310 = vector.broadcast %309 : vector<32x1xf32> to vector<32x8xf32>
    %311 = arith.subf %307, %310 : vector<32x8xf32>
    %312 = math.exp %311 : vector<32x8xf32>
    %cst_108 = arith.constant dense<0.000000e+00> : vector<32xf32>
    %313 = vector.multi_reduction <add>, %312, %cst_108 [1] : vector<32x8xf32> to vector<32xf32>
    %314 = vector.shape_cast %313 : vector<32xf32> to vector<32x1xf32>
    %315 = tpu.reciprocal %314 {approx = true} : vector<32x1xf32> -> vector<32x1xf32>
    %316 = vector.broadcast %315 : vector<32x1xf32> to vector<32x8xf32>
    %317 = arith.mulf %312, %316 : vector<32x8xf32>
    %cst_109 = arith.constant dense<0.000000e+00> : vector<32x32xf32>
    %318 = tpu.matmul %317, %298, %cst_109 {dimension_numbers = #tpu.dot_dimension_numbers<[1], [0], [0], [1], [0, 0, 1, 1], [], []>} : vector<32x8xf32>, vector<8x32xf32>, vector<32x32xf32> -> vector<32x32xf32>
    %319 = vector.shape_cast %318 : vector<32x32xf32> to vector<4x8x32xf32>
    %320 = vector.shape_cast %118 : vector<4x32xf32> to vector<4x1x32xf32>
    %321 = vector.broadcast %320 : vector<4x1x32xf32> to vector<4x8x32xf32>
    %322 = arith.mulf %319, %321 : vector<4x8x32xf32>
    %cst_110 = arith.constant dense<0.000000e+00> : vector<8x32xf32>
    %323 = vector.multi_reduction <add>, %322, %cst_110 [0] : vector<4x8x32xf32> to vector<8x32xf32>
    %324 = vector.extract_strided_slice %285 {offsets = [8, 0], sizes = [8, 32], strides = [1, 1]} : vector<16x32xf32> to vector<8x32xf32>
    %325 = vector.extract_strided_slice %290 {offsets = [8, 0], sizes = [8, 32], strides = [1, 1]} : vector<16x32xf32> to vector<8x32xf32>
    %326 = vector.extract_strided_slice %295 {offsets = [8, 0], sizes = [8, 32], strides = [1, 1]} : vector<16x32xf32> to vector<8x32xf32>
    %327 = vector.shape_cast %324 : vector<8x32xf32> to vector<1x8x32xf32>
    %328 = vector.shape_cast %118 : vector<4x32xf32> to vector<4x1x32xf32>
    %329 = vector.broadcast %327 : vector<1x8x32xf32> to vector<4x8x32xf32>
    %330 = vector.broadcast %328 : vector<4x1x32xf32> to vector<4x8x32xf32>
    %331 = arith.mulf %329, %330 : vector<4x8x32xf32>
    %332 = vector.shape_cast %331 : vector<4x8x32xf32> to vector<32x32xf32>
    %cst_111 = arith.constant dense<0.000000e+00> : vector<32x8xf32>
    %333 = tpu.matmul %332, %325, %cst_111 {dimension_numbers = #tpu.dot_dimension_numbers<[1], [1], [0], [0], [0, 0, 1, 0], [], []>} : vector<32x32xf32>, vector<8x32xf32>, vector<32x8xf32> -> vector<32x8xf32>
    %cst_112 = arith.constant 0.353553385 : f32
    %334 = vector.broadcast %cst_112 : f32 to vector<32x8xf32>
    %335 = arith.mulf %333, %334 : vector<32x8xf32>
    %cst_113 = arith.constant dense<0xFF800000> : vector<32xf32>
    %336 = vector.multi_reduction <maximumf>, %335, %cst_113 [1] : vector<32x8xf32> to vector<32xf32>
    %337 = vector.shape_cast %336 : vector<32xf32> to vector<32x1xf32>
    %338 = vector.broadcast %337 : vector<32x1xf32> to vector<32x8xf32>
    %339 = arith.subf %335, %338 : vector<32x8xf32>
    %340 = math.exp %339 : vector<32x8xf32>
    %cst_114 = arith.constant dense<0.000000e+00> : vector<32xf32>
    %341 = vector.multi_reduction <add>, %340, %cst_114 [1] : vector<32x8xf32> to vector<32xf32>
    %342 = vector.shape_cast %341 : vector<32xf32> to vector<32x1xf32>
    %343 = tpu.reciprocal %342 {approx = true} : vector<32x1xf32> -> vector<32x1xf32>
    %344 = vector.broadcast %343 : vector<32x1xf32> to vector<32x8xf32>
    %345 = arith.mulf %340, %344 : vector<32x8xf32>
    %cst_115 = arith.constant dense<0.000000e+00> : vector<32x32xf32>
    %346 = tpu.matmul %345, %326, %cst_115 {dimension_numbers = #tpu.dot_dimension_numbers<[1], [0], [0], [1], [0, 0, 1, 1], [], []>} : vector<32x8xf32>, vector<8x32xf32>, vector<32x32xf32> -> vector<32x32xf32>
    %347 = vector.shape_cast %346 : vector<32x32xf32> to vector<4x8x32xf32>
    %348 = vector.shape_cast %118 : vector<4x32xf32> to vector<4x1x32xf32>
    %349 = vector.broadcast %348 : vector<4x1x32xf32> to vector<4x8x32xf32>
    %350 = arith.mulf %347, %349 : vector<4x8x32xf32>
    %cst_116 = arith.constant dense<0.000000e+00> : vector<8x32xf32>
    %351 = vector.multi_reduction <add>, %350, %cst_116 [0] : vector<4x8x32xf32> to vector<8x32xf32>
    %352 = tpu.concatenate %323, %351 in 0 : vector<8x32xf32>, vector<8x32xf32> -> vector<16x32xf32>
    %c1168 = arith.constant 1168 : index
    %c0_117 = arith.constant 0 : index
    %353 = vector.load %arg2[%c1168, %c0_117] : memref<1336x64xf32, #tpu.memory_space<vmem>>, vector<32x32xf32>
    %cst_118 = arith.constant dense<0.000000e+00> : vector<16x32xf32>
    %354 = tpu.matmul %352, %353, %cst_118 {dimension_numbers = #tpu.dot_dimension_numbers<[1], [0], [0], [1], [0, 0, 1, 1], [], []>} : vector<16x32xf32>, vector<32x32xf32>, vector<16x32xf32> -> vector<16x32xf32>
    %355 = arith.addf %256, %354 : vector<16x32xf32>
    %c1200 = arith.constant 1200 : index
    %c0_119 = arith.constant 0 : index
    %356 = vector.load %arg2[%c1200, %c0_119] : memref<1336x64xf32, #tpu.memory_space<vmem>>, vector<1x32xf32>
    %357 = vector.broadcast %356 : vector<1x32xf32> to vector<16x32xf32>
    %358 = arith.addf %355, %357 : vector<16x32xf32>
    %c1208 = arith.constant 1208 : index
    %c0_120 = arith.constant 0 : index
    %359 = vector.load %arg2[%c1208, %c0_120] : memref<1336x64xf32, #tpu.memory_space<vmem>>, vector<1x32xf32>
    %c1216 = arith.constant 1216 : index
    %c0_121 = arith.constant 0 : index
    %360 = vector.load %arg2[%c1216, %c0_121] : memref<1336x64xf32, #tpu.memory_space<vmem>>, vector<1x32xf32>
    %cst_122 = arith.constant dense<0.000000e+00> : vector<16xf32>
    %361 = vector.multi_reduction <add>, %358, %cst_122 [1] : vector<16x32xf32> to vector<16xf32>
    %362 = vector.shape_cast %361 : vector<16xf32> to vector<16x1xf32>
    %cst_123 = arith.constant 3.200000e+01 : f32
    %363 = vector.broadcast %cst_123 : f32 to vector<16x1xf32>
    %364 = arith.divf %362, %363 : vector<16x1xf32>
    %365 = vector.broadcast %364 : vector<16x1xf32> to vector<16x32xf32>
    %366 = arith.subf %358, %365 : vector<16x32xf32>
    %367 = arith.mulf %366, %366 : vector<16x32xf32>
    %cst_124 = arith.constant dense<0.000000e+00> : vector<16xf32>
    %368 = vector.multi_reduction <add>, %367, %cst_124 [1] : vector<16x32xf32> to vector<16xf32>
    %369 = vector.shape_cast %368 : vector<16xf32> to vector<16x1xf32>
    %cst_125 = arith.constant 3.200000e+01 : f32
    %370 = vector.broadcast %cst_125 : f32 to vector<16x1xf32>
    %371 = arith.divf %369, %370 : vector<16x1xf32>
    %372 = vector.broadcast %364 : vector<16x1xf32> to vector<16x32xf32>
    %373 = arith.subf %358, %372 : vector<16x32xf32>
    %cst_126 = arith.constant 9.99999974E-6 : f32
    %374 = vector.broadcast %cst_126 : f32 to vector<16x1xf32>
    %375 = arith.addf %371, %374 : vector<16x1xf32>
    %376 = math.rsqrt %375 : vector<16x1xf32>
    %377 = vector.broadcast %376 : vector<16x1xf32> to vector<16x32xf32>
    %378 = arith.mulf %373, %377 : vector<16x32xf32>
    %379 = vector.broadcast %359 : vector<1x32xf32> to vector<16x32xf32>
    %380 = arith.mulf %378, %379 : vector<16x32xf32>
    %381 = vector.broadcast %360 : vector<1x32xf32> to vector<16x32xf32>
    %382 = arith.addf %380, %381 : vector<16x32xf32>
    %c1224 = arith.constant 1224 : index
    %c0_127 = arith.constant 0 : index
    %383 = vector.load %arg2[%c1224, %c0_127] : memref<1336x64xf32, #tpu.memory_space<vmem>>, vector<32x64xf32>
    %cst_128 = arith.constant dense<0.000000e+00> : vector<16x64xf32>
    %384 = tpu.matmul %382, %383, %cst_128 {dimension_numbers = #tpu.dot_dimension_numbers<[1], [0], [0], [1], [0, 0, 1, 1], [], []>} : vector<16x32xf32>, vector<32x64xf32>, vector<16x64xf32> -> vector<16x64xf32>
    %c1256 = arith.constant 1256 : index
    %c0_129 = arith.constant 0 : index
    %385 = vector.load %arg2[%c1256, %c0_129] : memref<1336x64xf32, #tpu.memory_space<vmem>>, vector<1x64xf32>
    %386 = vector.broadcast %385 : vector<1x64xf32> to vector<16x64xf32>
    %387 = arith.addf %384, %386 : vector<16x64xf32>
    %388 = math.tanh %387 : vector<16x64xf32>
    %c1264 = arith.constant 1264 : index
    %c0_130 = arith.constant 0 : index
    %389 = vector.load %arg2[%c1264, %c0_130] : memref<1336x64xf32, #tpu.memory_space<vmem>>, vector<64x32xf32>
    %cst_131 = arith.constant dense<0.000000e+00> : vector<16x32xf32>
    %390 = tpu.matmul %388, %389, %cst_131 {dimension_numbers = #tpu.dot_dimension_numbers<[1], [0], [0], [1], [0, 0, 1, 1], [], []>} : vector<16x64xf32>, vector<64x32xf32>, vector<16x32xf32> -> vector<16x32xf32>
    %391 = arith.addf %358, %390 : vector<16x32xf32>
    %c1328 = arith.constant 1328 : index
    %c0_132 = arith.constant 0 : index
    %392 = vector.load %arg2[%c1328, %c0_132] : memref<1336x64xf32, #tpu.memory_space<vmem>>, vector<1x32xf32>
    %393 = vector.broadcast %392 : vector<1x32xf32> to vector<16x32xf32>
    %394 = arith.addf %391, %393 : vector<16x32xf32>
    %c432 = arith.constant 432 : index
    %c0_133 = arith.constant 0 : index
    %395 = vector.load %arg2[%c432, %c0_133] : memref<1336x64xf32, #tpu.memory_space<vmem>>, vector<32x32xf32>
    %cst_134 = arith.constant dense<0.000000e+00> : vector<32x32xf32>
    %396 = tpu.matmul %28, %395, %cst_134 {dimension_numbers = #tpu.dot_dimension_numbers<[1], [0], [0], [1], [0, 0, 1, 1], [], []>} : vector<32x32xf32>, vector<32x32xf32>, vector<32x32xf32> -> vector<32x32xf32>
    %c464 = arith.constant 464 : index
    %c0_135 = arith.constant 0 : index
    %397 = vector.load %arg2[%c464, %c0_135] : memref<1336x64xf32, #tpu.memory_space<vmem>>, vector<1x32xf32>
    %398 = vector.broadcast %397 : vector<1x32xf32> to vector<32x32xf32>
    %399 = arith.addf %396, %398 : vector<32x32xf32>
    %400 = math.tanh %399 : vector<32x32xf32>
    %c472 = arith.constant 472 : index
    %c0_136 = arith.constant 0 : index
    %401 = vector.load %arg2[%c472, %c0_136] : memref<1336x64xf32, #tpu.memory_space<vmem>>, vector<32x32xf32>
    %cst_137 = arith.constant dense<0.000000e+00> : vector<32x32xf32>
    %402 = tpu.matmul %400, %401, %cst_137 {dimension_numbers = #tpu.dot_dimension_numbers<[1], [0], [0], [1], [0, 0, 1, 1], [], []>} : vector<32x32xf32>, vector<32x32xf32>, vector<32x32xf32> -> vector<32x32xf32>
    %c504 = arith.constant 504 : index
    %c0_138 = arith.constant 0 : index
    %403 = vector.load %arg2[%c504, %c0_138] : memref<1336x64xf32, #tpu.memory_space<vmem>>, vector<1x32xf32>
    %404 = vector.broadcast %403 : vector<1x32xf32> to vector<32x32xf32>
    %405 = arith.addf %402, %404 : vector<32x32xf32>
    %406 = math.tanh %405 : vector<32x32xf32>
    %407 = arith.addf %400, %406 : vector<32x32xf32>
    %c512 = arith.constant 512 : index
    %c0_139 = arith.constant 0 : index
    %408 = vector.load %arg2[%c512, %c0_139] : memref<1336x64xf32, #tpu.memory_space<vmem>>, vector<32x32xf32>
    %cst_140 = arith.constant dense<0.000000e+00> : vector<32x32xf32>
    %409 = tpu.matmul %407, %408, %cst_140 {dimension_numbers = #tpu.dot_dimension_numbers<[1], [0], [0], [1], [0, 0, 1, 1], [], []>} : vector<32x32xf32>, vector<32x32xf32>, vector<32x32xf32> -> vector<32x32xf32>
    %c544 = arith.constant 544 : index
    %c0_141 = arith.constant 0 : index
    %410 = vector.load %arg2[%c544, %c0_141] : memref<1336x64xf32, #tpu.memory_space<vmem>>, vector<1x32xf32>
    %411 = vector.broadcast %410 : vector<1x32xf32> to vector<32x32xf32>
    %412 = arith.addf %409, %411 : vector<32x32xf32>
    %413 = math.tanh %412 : vector<32x32xf32>
    %414 = arith.addf %407, %413 : vector<32x32xf32>
    %c552 = arith.constant 552 : index
    %c0_142 = arith.constant 0 : index
    %415 = vector.load %arg2[%c552, %c0_142] : memref<1336x64xf32, #tpu.memory_space<vmem>>, vector<32x8xf32>
    %cst_143 = arith.constant dense<0.000000e+00> : vector<32x8xf32>
    %416 = tpu.matmul %414, %415, %cst_143 {dimension_numbers = #tpu.dot_dimension_numbers<[1], [0], [0], [1], [0, 0, 1, 1], [], []>} : vector<32x32xf32>, vector<32x8xf32>, vector<32x8xf32> -> vector<32x8xf32>
    %c584 = arith.constant 584 : index
    %c0_144 = arith.constant 0 : index
    %417 = vector.load %arg2[%c584, %c0_144] : memref<1336x64xf32, #tpu.memory_space<vmem>>, vector<1x8xf32>
    %418 = vector.broadcast %417 : vector<1x8xf32> to vector<32x8xf32>
    %419 = arith.addf %416, %418 : vector<32x8xf32>
    %cst_145 = arith.constant dense<0xFF800000> : vector<32xf32>
    %420 = vector.multi_reduction <maximumf>, %419, %cst_145 [1] : vector<32x8xf32> to vector<32xf32>
    %421 = vector.shape_cast %420 : vector<32xf32> to vector<32x1xf32>
    %422 = vector.broadcast %421 : vector<32x1xf32> to vector<32x8xf32>
    %423 = arith.subf %419, %422 : vector<32x8xf32>
    %424 = math.exp %423 : vector<32x8xf32>
    %cst_146 = arith.constant dense<0.000000e+00> : vector<32xf32>
    %425 = vector.multi_reduction <add>, %424, %cst_146 [1] : vector<32x8xf32> to vector<32xf32>
    %426 = vector.shape_cast %425 : vector<32xf32> to vector<32x1xf32>
    %427 = tpu.reciprocal %426 {approx = true} : vector<32x1xf32> -> vector<32x1xf32>
    %428 = vector.broadcast %427 : vector<32x1xf32> to vector<32x8xf32>
    %429 = arith.mulf %424, %428 : vector<32x8xf32>
    %430 = vector.extract_strided_slice %429 {offsets = [0, 0], sizes = [16, 8], strides = [1, 1]} : vector<32x8xf32> to vector<16x8xf32>
    %431 = vector.extract_strided_slice %394 {offsets = [0, 0], sizes = [8, 32], strides = [1, 1]} : vector<16x32xf32> to vector<8x32xf32>
    %cst_147 = arith.constant dense<0.000000e+00> : vector<16x32xf32>
    %432 = tpu.matmul %430, %431, %cst_147 {dimension_numbers = #tpu.dot_dimension_numbers<[1], [0], [0], [1], [0, 0, 1, 1], [], []>} : vector<16x8xf32>, vector<8x32xf32>, vector<16x32xf32> -> vector<16x32xf32>
    %433 = vector.extract_strided_slice %429 {offsets = [16, 0], sizes = [16, 8], strides = [1, 1]} : vector<32x8xf32> to vector<16x8xf32>
    %434 = vector.extract_strided_slice %394 {offsets = [8, 0], sizes = [8, 32], strides = [1, 1]} : vector<16x32xf32> to vector<8x32xf32>
    %cst_148 = arith.constant dense<0.000000e+00> : vector<16x32xf32>
    %435 = tpu.matmul %433, %434, %cst_148 {dimension_numbers = #tpu.dot_dimension_numbers<[1], [0], [0], [1], [0, 0, 1, 1], [], []>} : vector<16x8xf32>, vector<8x32xf32>, vector<16x32xf32> -> vector<16x32xf32>
    %436 = tpu.concatenate %432, %435 in 0 : vector<16x32xf32>, vector<16x32xf32> -> vector<32x32xf32>
    %c592 = arith.constant 592 : index
    %c0_149 = arith.constant 0 : index
    %437 = vector.load %arg2[%c592, %c0_149] : memref<1336x64xf32, #tpu.memory_space<vmem>>, vector<32x32xf32>
    %cst_150 = arith.constant dense<0.000000e+00> : vector<32x32xf32>
    %438 = tpu.matmul %436, %437, %cst_150 {dimension_numbers = #tpu.dot_dimension_numbers<[1], [0], [0], [1], [0, 0, 1, 1], [], []>} : vector<32x32xf32>, vector<32x32xf32>, vector<32x32xf32> -> vector<32x32xf32>
    %c624 = arith.constant 624 : index
    %c0_151 = arith.constant 0 : index
    %439 = vector.load %arg2[%c624, %c0_151] : memref<1336x64xf32, #tpu.memory_space<vmem>>, vector<1x32xf32>
    %440 = vector.broadcast %439 : vector<1x32xf32> to vector<32x32xf32>
    %441 = arith.addf %438, %440 : vector<32x32xf32>
    %442 = math.tanh %441 : vector<32x32xf32>
    %c632 = arith.constant 632 : index
    %c0_152 = arith.constant 0 : index
    %443 = vector.load %arg2[%c632, %c0_152] : memref<1336x64xf32, #tpu.memory_space<vmem>>, vector<32x32xf32>
    %cst_153 = arith.constant dense<0.000000e+00> : vector<32x32xf32>
    %444 = tpu.matmul %442, %443, %cst_153 {dimension_numbers = #tpu.dot_dimension_numbers<[1], [0], [0], [1], [0, 0, 1, 1], [], []>} : vector<32x32xf32>, vector<32x32xf32>, vector<32x32xf32> -> vector<32x32xf32>
    %c664 = arith.constant 664 : index
    %c0_154 = arith.constant 0 : index
    %445 = vector.load %arg2[%c664, %c0_154] : memref<1336x64xf32, #tpu.memory_space<vmem>>, vector<1x32xf32>
    %446 = vector.broadcast %445 : vector<1x32xf32> to vector<32x32xf32>
    %447 = arith.addf %444, %446 : vector<32x32xf32>
    %448 = math.tanh %447 : vector<32x32xf32>
    %449 = arith.addf %442, %448 : vector<32x32xf32>
    %c672 = arith.constant 672 : index
    %c0_155 = arith.constant 0 : index
    %450 = vector.load %arg2[%c672, %c0_155] : memref<1336x64xf32, #tpu.memory_space<vmem>>, vector<32x32xf32>
    %cst_156 = arith.constant dense<0.000000e+00> : vector<32x32xf32>
    %451 = tpu.matmul %449, %450, %cst_156 {dimension_numbers = #tpu.dot_dimension_numbers<[1], [0], [0], [1], [0, 0, 1, 1], [], []>} : vector<32x32xf32>, vector<32x32xf32>, vector<32x32xf32> -> vector<32x32xf32>
    %c704 = arith.constant 704 : index
    %c0_157 = arith.constant 0 : index
    %452 = vector.load %arg2[%c704, %c0_157] : memref<1336x64xf32, #tpu.memory_space<vmem>>, vector<1x32xf32>
    %453 = vector.broadcast %452 : vector<1x32xf32> to vector<32x32xf32>
    %454 = arith.addf %451, %453 : vector<32x32xf32>
    %455 = math.tanh %454 : vector<32x32xf32>
    %456 = arith.addf %449, %455 : vector<32x32xf32>
    %c712 = arith.constant 712 : index
    %c0_158 = arith.constant 0 : index
    %457 = vector.load %arg2[%c712, %c0_158] : memref<1336x64xf32, #tpu.memory_space<vmem>>, vector<1x32xf32>
    %cst_159 = arith.constant dense<0.000000e+00> : vector<1x32xf32>
    %458 = tpu.matmul %457, %456, %cst_159 {dimension_numbers = #tpu.dot_dimension_numbers<[1], [1], [0], [0], [0, 0, 1, 0], [], []>} : vector<1x32xf32>, vector<32x32xf32>, vector<1x32xf32> -> vector<1x32xf32>
    %c720 = arith.constant 720 : index
    %c0_160 = arith.constant 0 : index
    %459 = vector.load %arg2[%c720, %c0_160] : memref<1336x64xf32, #tpu.memory_space<vmem>>, vector<1x1xf32>
    %460 = vector.broadcast %459 : vector<1x1xf32> to vector<1x32xf32>
    %461 = arith.addf %458, %460 : vector<1x32xf32>
    %c0_161 = arith.constant 0 : index
    %c0_162 = arith.constant 0 : index
    %462 = vector.load %arg3[%c0_161, %c0_162] : memref<1x32xf32, #tpu.memory_space<vmem>>, vector<1x32xf32>
    tpu.vector_store %arg3[%c0_161, %c0_162], %461 {strides = array<i32>} : memref<1x32xf32, #tpu.memory_space<vmem>>, vector<1x32xf32>,
    return
  }
  func.func @transform_0(%arg0: i32) -> (i32, i32) {
    %c0_i32 = arith.constant 0 : i32
    %c0_i32_0 = arith.constant 0 : i32
    %c0_i32_1 = arith.constant 0 : i32
    return %c0_i32, %c0_i32_0 : i32, i32
  }
  func.func @transform_1(%arg0: i32) -> (i32, i32) {
    %c0_i32 = arith.constant 0 : i32
    %c0_i32_0 = arith.constant 0 : i32
    %c0_i32_1 = arith.constant 0 : i32
    return %c0_i32, %c0_i32_0 : i32, i32
  }
  func.func @transform_2(%arg0: i32) -> (i32, i32) {
    %c0_i32 = arith.constant 0 : i32
    %c0_i32_0 = arith.constant 0 : i32
    %c0_i32_1 = arith.constant 0 : i32
    return %c0_i32, %c0_i32_0 : i32, i32
  }
}

</mosaic_0001>

<bundles_post_ra>
// kernel: lno_triple_forward.1
= control target key start
LH: loop header
LB: loop body
LE: loop exit
PB: predicated region body
PF: predicated region fallthrough
CT: control target
= control target key end

     0   :  { %7 = vsyncpa [#allocation3], 0  ;;  %s6546_s9 = smov [#allocation2]   ;;  %s7051_s0 = inlined_call_operand.vmem [shape: f32[96,3], index: 0, kind: input, shape index: {}]   ;;  %s7052_s1 = inlined_call_operand.hbm [shape: f32[1336,64], index: 1, kind: input, shape index: {}]   ;;  %s7053_s2 = inlined_call_operand.vmem [shape: f32[1,32], index: 2, kind: output, shape index: {}]  }
   0x1   :  { %s15_s10 = sshll.u32 %s6546_s9, 4  ;;  %s16_s10 = int_to_ptr.vmem [resolvable:$true] %s15_s10 }
   0x2   :  { %s6532_s11 = scalar_lea.vmem %s16_s10, 21376  ;;  %p6537_p1 = scmp.lt.s32.totalorder %s16_s10, %s16_s10 }
   0x3   :  { %p6533_p0 = scmp.ne.s32.totalorder %s16_s10, %s6532_s11  ;;  %p6538_p2 = scmp.lt.s32.totalorder %s6532_s11, %s6532_s11 }
   0x5   :  { %p6539_p3 = por %p6538_p2, %p6537_p1 }
   0x7   :  { %p6540_p4 = pnand %p6539_p3, %p6533_p0 }
   0x9   :  { %6543 = shalt.err (!%p6540_p4)
}
   0xa   :  { %s6547_s12 = smov 128   ;;  %s6548_s13 = smov 8  }
   0xb   :  { %21 = dma.hbm_to_vmem [thread:$0]  %s7052_s1, 21376, %s16_s10, [#allocation3], %s6547_s12, %s6547_s12, %s6548_s13  }
   0xc   :  { %6544 = dma.done.wait [#allocation3], 21376  }
   0xd   :  { %6545 = vsyncadd [#allocation3], 4294945920  ;;  %vm68_vm0 = vcmask 1041408   ;;  %vm43_vm1 = vcmask 15360   ;;  %v37_v0 = vld [vmem:[#allocation2] sm:$0x3] }
   0xe   :  { %v25_v1 = vld [vmem:[%s7051_s0] sm:$0xff]  ;;  %v26_v2 = vld [vmem:[%s7051_s0 + $0x8] sm:$0xff]  ;;  %5722 = vmatprep.subr.msk.mxu0 %vm68_vm0, %v37_v0  ;;  %v27_v3 = vld [vmem:[%s7051_s0 + $0x10] sm:$0xff]  ;;  %vm194_vm2 = vcmask 261120   ;;  %vm651_vm3 = vcmask 1042432   ;;  %vm638_vm4 = vcmask 23552  }
   0xf   :  { %5724 = vmatprep.mubr.msk.f32.mxu0 %vm43_vm1, %v25_v1  ;;  %5723 = vmatpush3.msk.msra.mxu0 %vm68_vm0, %v37_v0  ;;  %v28_v4 = vld [vmem:[%s7051_s0 + $0x18] sm:$0xff]  ;;  %v29_v5 = vld [vmem:[%s7051_s0 + $0x20] sm:$0xff]  ;;  %v30_v6 = vld [vmem:[%s7051_s0 + $0x28] sm:$0xff]  ;;  %vm6550_vm5 = vmmov 0   ;;  %vm1522_vm6 = vcmask 64512   ;;  %vm1582_vm7 = vcmask 130048  }
  0x10   :  { %5725 = vmatmul.mubr.msk.f32.vlgmr.msra.gmra.mxu0 %vm43_vm1, %v26_v2  ;;  %v31_v7 = vld [vmem:[%s7051_s0 + $0x30] sm:$0xff]  ;;  %v32_v8 = vld [vmem:[%s7051_s0 + $0x38] sm:$0xff]  ;;  %v188_v9 = vld [vmem:[#allocation2 + $0x28] sm:$0xff]  ;;  %vm2898_vm11 = vcmask 523264   ;;  %vm5211_vm12 = vcmask 253952  }
  0x11   :  { %5727 = vmatprep.mubr.msk.f32.mxu0 %vm43_vm1, %v27_v3  ;;  %5736 = vmatprep.subr.mxu1 %v188_v9  ;;  %v187_v10 = vld [vmem:[#allocation2 + $0x20] sm:$0xff]  ;;  %v186_v11 = vld [vmem:[#allocation2 + $0x18] sm:$0xff]  ;;  %v185_v12 = vld [vmem:[#allocation2 + $0x10] sm:$0xff] }
  0x12   :  { %5737 = vmatpush3.msra.mxu1 %v188_v9  ;;  %v5218_v13 = vld [vmem:[#allocation2 + $0x8] ss:$0 sm:$0xff]  ;;  %v343_v38 = vld [vmem:[#allocation2 + $0x50] sm:$0xff]  ;;  %v341_v40 = vld [vmem:[#allocation2 + $0x40] sm:$0xff] }
  0x13   :  { %5738 = vmatprep.subr.mxu1 %v187_v10  ;;  %5756 = vmatprep.subr.mxu0 %v343_v38  ;;  %v342_v39 = vld [vmem:[#allocation2 + $0x48] sm:$0xff]  ;;  %v340_v41 = vld [vmem:[#allocation2 + $0x38] sm:$0xff]  ;;  %v5228_v42 = vld [vmem:[#allocation2 + $0x30] ss:$0 sm:$0xff] }
  0x14   :  { %5728 = vmatmul.mubr.msk.f32.gmra.mxu0 %vm43_vm1, %v28_v4  ;;  %5739 = vmatpush3.msra.mxu1 %v187_v10 }
  0x15   :  { %5730 = vmatprep.mubr.msk.f32.mxu0 %vm43_vm1, %v29_v5  ;;  %5740 = vmatprep.subr.mxu1 %v186_v11 }
  0x16   :  { %5741 = vmatpush3.msra.mxu1 %v186_v11  ;;  %5757 = vmatpush3.msra.mxu0 %v343_v38  ;;  %v497_v11 = vld [vmem:[#allocation2 + $0x78] sm:$0xff] }
  0x17   :  { %5742 = vmatprep.subr.mxu1 %v185_v12  ;;  %5758 = vmatprep.subr.mxu0 %v342_v39 }
  0x18   :  { %5731 = vmatmul.mubr.msk.f32.gmra.mxu0 %vm43_vm1, %v30_v6  ;;  %5743 = vmatpush3.msra.mxu1 %v185_v12  ;;  %v496_v12 = vld [vmem:[#allocation2 + $0x70] sm:$0xff] }
  0x19   :  { %5733 = vmatprep.mubr.msk.f32.mxu0 %vm43_vm1, %v31_v7  ;;  %5759 = vmatpush3.msra.mxu0 %v342_v39 }
  0x1a   :  { %5760 = vmatprep.subr.mxu0 %v341_v40  ;;  %6247 = vmatprep.subr.mxu1 %v497_v11 }
  0x1b   :  { %5761 = vmatpush3.msra.mxu0 %v341_v40 }
  0x1c   :  { %5734 = vmatmul.mubr.msk.f32.gmra.mxu0 %vm43_vm1, %v32_v8  ;;  %5762 = vmatprep.subr.mxu0 %v340_v41 }
  0x1d   :  { %5763 = vmatpush3.msra.mxu0 %v340_v41  ;;  %v34_v41 = vld [vmem:[%s7051_s0 + $0x48] sm:$0xff] }
  0x1e   :  { %5776 = vmatprep.subr.mxu0 %v497_v11 }
  0xd0   :  { %v5726_v14 = vpop.f32.mrf.mxu0 }
  0xd1   :  { %v144_v15 = vadd.f32 %v5726_v14, %v5218_v13  ;;  %v494_v14 = vld [vmem:[#allocation2 + $0x60] sm:$0xff] }
  0xd2   :  { %v138_v16 = vpop.f32.mrf.mxu0 }
  0xd3   :  { %v139_v17 = vadd.f32 %v5218_v13, %v138_v16  ;;  %v5237_v16 = vld [vmem:[#allocation2 + $0x58] ss:$0 sm:$0xff] }
  0xd4   :  { %v5729_v18 = vpop.f32.mrf.mxu0 }
  0xd5   :  { %6263 = vtanh.f32 %v139_v17  ;;  %v154_v19 = vadd.f32 %v5729_v18, %v5218_v13 }
  0xd6   :  { %6265 = vtanh.f32 %v144_v15  ;;  %v148_v20 = vpop.f32.mrf.mxu0  ;;  %v632_v15 = vld [vmem:[#allocation2 + $0x88] sm:$0x7] }
  0xd7   :  { %v149_v21 = vadd.f32 %v5218_v13, %v148_v20  ;;  %6267 = vtanh.f32 %v154_v19 }
  0xd8   :  { %v5732_v22 = vpop.f32.mrf.mxu0 }
  0xd9   :  { %6269 = vtanh.f32 %v149_v21  ;;  %v164_v23 = vadd.f32 %v5732_v22, %v5218_v13 }
  0xda   :  { %v158_v24 = vpop.f32.mrf.mxu0 }
  0xdb   :  { %v159_v25 = vadd.f32 %v5218_v13, %v158_v24  ;;  %6271 = vtanh.f32 %v164_v23 }
  0xdc   :  { %v5735_v26 = vpop.f32.mrf.mxu0 }
  0xdd   :  { %6273 = vtanh.f32 %v159_v25  ;;  %v174_v27 = vadd.f32 %v5735_v26, %v5218_v13 }
  0xde   :  { %v168_v28 = vpop.f32.mrf.mxu0 }
  0xdf   :  { %v169_v29 = vadd.f32 %v5218_v13, %v168_v28  ;;  %6275 = vtanh.f32 %v174_v27  ;;  %v495_v13 = vld [vmem:[#allocation2 + $0x68] sm:$0xff] }
  0xe1   :  { %6277 = vtanh.f32 %v169_v29 }
  0xe2   :  { %v6264_v30 = vpop.eup %6263 }
  0xe3   :  { %v6266_v31 = vpop.eup %6265  ;;  %5744 = vmatprep.mubr.msk.f32.mxu1 %vm194_vm2, %v6264_v30 }
  0xe4   :  { %5745 = vmatmul.mubr.msk.f32.vlgmr.msra.gmra.mxu1 %vm194_vm2, %v6266_v31  ;;  %v6268_v32 = vpop.eup %6267 }
  0xe5   :  { %6251 = vmatpush3.msra.mxu1 %v497_v11 }
  0xe6   :  { %v6270_v33 = vpop.eup %6269  ;;  %6248 = vmatprep.subr.mxu1 %v496_v12 }
  0xe7   :  { %5747 = vmatprep.mubr.msk.f32.mxu1 %vm194_vm2, %v6270_v33  ;;  %6252 = vmatpush3.msra.mxu1 %v496_v12 }
  0xe8   :  { %5748 = vmatmul.mubr.msk.f32.gmra.mxu1 %vm194_vm2, %v6268_v32  ;;  %v6272_v34 = vpop.eup %6271  ;;  %6249 = vmatprep.subr.mxu1 %v495_v13 }
  0xe9   :  { %6253 = vmatpush3.msra.mxu1 %v495_v13 }
  0xea   :  { %v6274_v35 = vpop.eup %6273  ;;  %6250 = vmatprep.subr.mxu1 %v494_v14 }
  0xeb   :  { %5750 = vmatprep.mubr.msk.f32.mxu1 %vm194_vm2, %v6274_v35  ;;  %6254 = vmatpush3.msra.mxu1 %v494_v14 }
  0xec   :  { %5751 = vmatmul.mubr.msk.f32.gmra.mxu1 %vm194_vm2, %v6272_v34  ;;  %v6276_v36 = vpop.eup %6275 }
  0xee   :  { %v6278_v37 = vpop.eup %6277 }
  0xef   :  { %5753 = vmatprep.mubr.msk.f32.mxu1 %vm194_vm2, %v6278_v37 }
  0xf0   :  { %5754 = vmatmul.mubr.msk.f32.gmra.mxu1 %vm194_vm2, %v6276_v36 }
 0x1a4   :  { %v5746_v43 = vpop.f32.mrf.mxu1 }
 0x1a5   :  { %v291_v44 = vadd.f32 %v5746_v43, %v5228_v42  ;;  %v35_v43 = vld [vmem:[%s7051_s0 + $0x50] sm:$0xff] }
 0x1a6   :  { %v285_v45 = vpop.f32.mrf.mxu1 }
 0x1a7   :  { %v286_v46 = vadd.f32 %v5228_v42, %v285_v45  ;;  %6279 = vtanh.f32 %v291_v44 }
 0x1a8   :  { %v5749_v47 = vpop.f32.mrf.mxu1 }
 0x1a9   :  { %6281 = vtanh.f32 %v286_v46  ;;  %v301_v48 = vadd.f32 %v5749_v47, %v5228_v42  ;;  %v36_v47 = vld [vmem:[%s7051_s0 + $0x58] sm:$0xff] }
 0x1aa   :  { %v295_v49 = vpop.f32.mrf.mxu1 }
 0x1ab   :  { %v296_v50 = vadd.f32 %v5228_v42, %v295_v49  ;;  %6283 = vtanh.f32 %v301_v48 }
 0x1ac   :  { %v5752_v51 = vpop.f32.mrf.mxu1 }
 0x1ad   :  { %6285 = vtanh.f32 %v296_v50  ;;  %v311_v52 = vadd.f32 %v5752_v51, %v5228_v42 }
 0x1ae   :  { %v305_v53 = vpop.f32.mrf.mxu1 }
 0x1af   :  { %v306_v54 = vadd.f32 %v5228_v42, %v305_v53  ;;  %6287 = vtanh.f32 %v311_v52  ;;  %v747_v53 = vld [vmem:[#allocation2 + $0xb0] sm:$0xff] }
 0x1b0   :  { %v5755_v55 = vpop.f32.mrf.mxu1  ;;  %5804 = vmatprep.subr.mxu1 %v747_v53 }
 0x1b1   :  { %6289 = vtanh.f32 %v306_v54  ;;  %v321_v56 = vadd.f32 %v5755_v55, %v5228_v42  ;;  %v746_v54 = vld [vmem:[#allocation2 + $0xa8] sm:$0xff]  ;;  %v745_v55 = vld [vmem:[#allocation2 + $0xa0] sm:$0xff] }
 0x1b2   :  { %v315_v57 = vpop.f32.mrf.mxu1 }
 0x1b3   :  { %v316_v58 = vadd.f32 %v5228_v42, %v315_v57  ;;  %6291 = vtanh.f32 %v321_v56  ;;  %v744_v56 = vld [vmem:[#allocation2 + $0x98] sm:$0xff] }
 0x1b4   :  { %v6280_v59 = vpop.eup %6279 }
 0x1b5   :  { %6293 = vtanh.f32 %v316_v58  ;;  %v6613_v62 = vadd.f32 %v6280_v59, %v6266_v31  ;;  %v5255_v59 = vld [vmem:[#allocation2 + $0x90] ss:$0 sm:$0xff] }
 0x1b6   :  { %v6282_v60 = vpop.eup %6281 }
 0x1b7   :  { %v6611_v61 = vadd.f32 %v6282_v60, %v6264_v30 }
 0x1b8   :  { %v6284_v63 = vpop.eup %6283 }
 0x1b9   :  { %5764 = vmatprep.mubr.msk.f32.mxu0 %vm194_vm2, %v6611_v61  ;;  %v6621_v2 = vadd.f32 %v6284_v63, %v6268_v32 }
 0x1ba   :  { %v6286_v0 = vpop.eup %6285  ;;  %5765 = vmatmul.mubr.msk.f32.vlgmr.msra.gmra.mxu0 %vm194_vm2, %v6613_v62 }
 0x1bb   :  { %v6619_v1 = vadd.f32 %v6286_v0, %v6270_v33  ;;  %5777 = vmatpush3.msra.mxu0 %v497_v11 }
 0x1bc   :  { %v6288_v3 = vpop.eup %6287  ;;  %5778 = vmatprep.subr.mxu0 %v496_v12 }
 0x1bd   :  { %5767 = vmatprep.mubr.msk.f32.mxu0 %vm194_vm2, %v6619_v1  ;;  %v6629_v6 = vadd.f32 %v6288_v3, %v6272_v34  ;;  %5779 = vmatpush3.msra.mxu0 %v496_v12 }
 0x1be   :  { %v6290_v4 = vpop.eup %6289  ;;  %5768 = vmatmul.mubr.msk.f32.gmra.mxu0 %vm194_vm2, %v6621_v2  ;;  %5780 = vmatprep.subr.mxu0 %v495_v13 }
 0x1bf   :  { %v6627_v5 = vadd.f32 %v6290_v4, %v6274_v35  ;;  %5781 = vmatpush3.msra.mxu0 %v495_v13 }
 0x1c0   :  { %v6292_v7 = vpop.eup %6291  ;;  %5782 = vmatprep.subr.mxu0 %v494_v14 }
 0x1c1   :  { %5770 = vmatprep.mubr.msk.f32.mxu0 %vm194_vm2, %v6627_v5  ;;  %v6637_v10 = vadd.f32 %v6292_v7, %v6276_v36  ;;  %5783 = vmatpush3.msra.mxu0 %v494_v14 }
 0x1c2   :  { %v6294_v8 = vpop.eup %6293  ;;  %5771 = vmatmul.mubr.msk.f32.gmra.mxu0 %vm194_vm2, %v6629_v6  ;;  %5796 = vmatprep.subr.msk.mxu0 %vm651_vm3, %v632_v15 }
 0x1c3   :  { %v6635_v9 = vadd.f32 %v6294_v8, %v6278_v37  ;;  %v33_v37 = vld [vmem:[%s7051_s0 + $0x40] sm:$0xff] }
 0x1c5   :  { %5773 = vmatprep.mubr.msk.f32.mxu0 %vm194_vm2, %v6635_v9 }
 0x1c6   :  { %5774 = vmatmul.mubr.msk.f32.gmra.mxu0 %vm194_vm2, %v6637_v10 }
 0x27a   :  { %v5766_v17 = vpop.f32.mrf.mxu0 }
 0x27b   :  { %v445_v18 = vadd.f32 %v5766_v17, %v5237_v16  ;;  %v861_v17 = vld [vmem:[#allocation2 + $0xd8] sm:$0xff] }
 0x27c   :  { %v439_v19 = vpop.f32.mrf.mxu0 }
 0x27d   :  { %v440_v20 = vadd.f32 %v5237_v16, %v439_v19  ;;  %6295 = vtanh.f32 %v445_v18  ;;  %v860_v18 = vld [vmem:[#allocation2 + $0xd0] sm:$0xff]  ;;  %v859_v19 = vld [vmem:[#allocation2 + $0xc8] sm:$0xff] }
 0x27e   :  { %v5769_v21 = vpop.f32.mrf.mxu0 }
 0x27f   :  { %6297 = vtanh.f32 %v440_v20  ;;  %v455_v22 = vadd.f32 %v5769_v21, %v5237_v16  ;;  %v858_v20 = vld [vmem:[#allocation2 + $0xc0] sm:$0xff]  ;;  %v1081_v21 = vld [vmem:[#allocation2 + $0x128] sm:$0xff] }
 0x280   :  { %v449_v23 = vpop.f32.mrf.mxu0 }
 0x281   :  { %v450_v24 = vadd.f32 %v5237_v16, %v449_v23  ;;  %6299 = vtanh.f32 %v455_v22  ;;  %v5261_v23 = vld [vmem:[#allocation2 + $0xb8] ss:$0 sm:$0xff] }
 0x282   :  { %v5772_v25 = vpop.f32.mrf.mxu0 }
 0x283   :  { %6301 = vtanh.f32 %v450_v24  ;;  %v465_v26 = vadd.f32 %v5772_v25, %v5237_v16 }
 0x284   :  { %v459_v27 = vpop.f32.mrf.mxu0 }
 0x285   :  { %v460_v28 = vadd.f32 %v5237_v16, %v459_v27  ;;  %6303 = vtanh.f32 %v465_v26 }
 0x286   :  { %v5775_v29 = vpop.f32.mrf.mxu0 }
 0x287   :  { %6305 = vtanh.f32 %v460_v28  ;;  %v475_v30 = vadd.f32 %v5775_v29, %v5237_v16 }
 0x288   :  { %v469_v31 = vpop.f32.mrf.mxu0 }
 0x289   :  { %v470_v32 = vadd.f32 %v5237_v16, %v469_v31  ;;  %6307 = vtanh.f32 %v475_v30 }
 0x28a   :  { %v6296_v33 = vpop.eup %6295 }
 0x28b   :  { %6309 = vtanh.f32 %v470_v32  ;;  %v487_v36 = vadd.f32 %v6296_v33, %v6613_v62 }
 0x28c   :  { %v6298_v34 = vpop.eup %6297 }
 0x28d   :  { %v486_v35 = vadd.f32 %v6298_v34, %v6611_v61 }
 0x28e   :  { %v6300_v38 = vpop.eup %6299 }
 0x28f   :  { %5784 = vmatprep.mubr.msk.f32.mxu0 %vm194_vm2, %v486_v35  ;;  %v489_v42 = vadd.f32 %v6300_v38, %v6621_v2  ;;  %v6685_v2 = vld [vmem:[#allocation2 + $0x80] ss:$0 sm:$0xff] }
 0x290   :  { %v6302_v39 = vpop.eup %6301  ;;  %5785 = vmatmul.mubr.msk.f32.vlgmr.msra.gmra.mxu0 %vm194_vm2, %v487_v36 }
 0x291   :  { %5797 = vmatpush3.msk.msra.mxu0 %vm651_vm3, %v632_v15  ;;  %v488_v40 = vadd.f32 %v6302_v39, %v6619_v1  ;;  %5798 = vmatprep.mubr.msk.f32.mxu0 %vm638_vm4, %v33_v37  ;;  %v1080_v37 = vld [vmem:[#allocation2 + $0x120] sm:$0xff] }
 0x292   :  { %v6304_v44 = vpop.eup %6303  ;;  %5818 = vmatprep.subr.mxu0 %v861_v17 }
 0x293   :  { %5787 = vmatprep.mubr.msk.f32.mxu1 %vm194_vm2, %v488_v40  ;;  %v491_v48 = vadd.f32 %v6304_v44, %v6629_v6  ;;  %v1079_v40 = vld [vmem:[#allocation2 + $0x118] sm:$0xff] }
 0x294   :  { %v6306_v45 = vpop.eup %6305  ;;  %5788 = vmatmul.mubr.msk.f32.vlgmr.msra.gmra.mxu1 %vm194_vm2, %v489_v42  ;;  %5799 = vmatmul.mubr.msk.f32.vlgmr.msra.gmra.mxu0 %vm638_vm4, %v34_v41 }
 0x295   :  { %v490_v46 = vadd.f32 %v6306_v45, %v6627_v5  ;;  %5801 = vmatprep.mubr.msk.f32.mxu0 %vm638_vm4, %v35_v43  ;;  %5805 = vmatpush3.msra.mxu1 %v747_v53  ;;  %v1078_v43 = vld [vmem:[#allocation2 + $0x110] sm:$0xff] }
 0x296   :  { %v6308_v49 = vpop.eup %6307  ;;  %5806 = vmatprep.subr.mxu1 %v746_v54  ;;  %5819 = vmatpush3.msra.mxu0 %v861_v17  ;;  %v1189_v17 = vld [vmem:[#allocation2 + $0x140] sm:$0xff] }
 0x297   :  { %5790 = vmatprep.mubr.msk.f32.mxu1 %vm194_vm2, %v490_v46  ;;  %v493_v52 = vadd.f32 %v6308_v49, %v6637_v10  ;;  %5807 = vmatpush3.msra.mxu1 %v746_v54  ;;  %v973_v49 = vld [vmem:[#allocation2 + $0xf0] sm:$0xff] }
 0x298   :  { %v6310_v50 = vpop.eup %6309  ;;  %5791 = vmatmul.mubr.msk.f32.gmra.mxu1 %vm194_vm2, %v491_v48  ;;  %5802 = vmatmul.mubr.msk.f32.gmra.mxu0 %vm638_vm4, %v36_v47  ;;  %v975_v47 = vld [vmem:[#allocation2 + $0x100] sm:$0xff]  ;;  %v974_v48 = vld [vmem:[#allocation2 + $0xf8] sm:$0xff] }
 0x299   :  { %v492_v51 = vadd.f32 %v6310_v50, %v6635_v9  ;;  %5808 = vmatprep.subr.mxu1 %v745_v55  ;;  %5820 = vmatprep.subr.mxu0 %v860_v18  ;;  %v972_v50 = vld [vmem:[#allocation2 + $0xe8] sm:$0xff] }
 0x29a   :  { %5809 = vmatpush3.msra.mxu1 %v745_v55  ;;  %5821 = vmatpush3.msra.mxu0 %v860_v18 }
 0x29b   :  { %5793 = vmatprep.mubr.msk.f32.mxu1 %vm194_vm2, %v492_v51  ;;  %5810 = vmatprep.subr.mxu1 %v744_v56  ;;  %v1191_v51 = vld [vmem:[#allocation2 + $0x150] sm:$0xff] }
 0x29c   :  { %5794 = vmatmul.mubr.msk.f32.gmra.mxu1 %vm194_vm2, %v493_v52  ;;  %5822 = vmatprep.subr.mxu0 %v859_v19  ;;  %v5266_v52 = vld [vmem:[#allocation2 + $0xe0] ss:$0 sm:$0xff] }
 0x29d   :  { %5811 = vmatpush3.msra.mxu1 %v744_v56  ;;  %5823 = vmatpush3.msra.mxu0 %v859_v19  ;;  %v1188_v19 = vld [vmem:[#allocation2 + $0x138] sm:$0xff] }
 0x29e   :  { %5824 = vmatprep.subr.mxu0 %v858_v20  ;;  %5832 = vmatprep.subr.mxu1 %v975_v47 }
 0x29f   :  { %5825 = vmatpush3.msra.mxu0 %v858_v20 }
 0x2a0   :  { %5846 = vmatprep.subr.mxu0 %v1081_v21 }
 0x350   :  { %v6677_v57 = vpop.f32.mrf.mxu0 }
 0x351   :  { %v599_v44 = vadd.f32 %v6677_v57, %v6685_v2 }
 0x352   :  { %v6679_v58 = vpop.f32.mrf.mxu0 }
 0x353   :  { %v594_v42 = vadd.f32 %v6685_v2, %v6679_v58 }
 0x354   :  { %v6681_v60 = vpop.f32.mrf.mxu1  ;;  %v5800_v61 = vpop.f32.mrf.mxu0 }
 0x355   :  { %v727_v62 = vadd.f32 %v5800_v61, %v5255_v59  ;;  %v609_v46 = vadd.f32 %v6681_v60, %v6685_v2 }
 0x356   :  { %v6683_v63 = vpop.f32.mrf.mxu1  ;;  %v721_v0 = vpop.f32.mrf.mxu0 }
 0x357   :  { %v722_v1 = vadd.f32 %v5255_v59, %v721_v0  ;;  %v604_v45 = vadd.f32 %v6685_v2, %v6683_v63 }
 0x358   :  { %v5792_v3 = vpop.f32.mrf.mxu1  ;;  %v5803_v4 = vpop.f32.mrf.mxu0 }
 0x359   :  { %6311 = vtanh.f32 %v722_v1  ;;  %v6688_v5 = vadd.f32 %v5792_v3, %v6685_v2  ;;  %v737_v6 = vadd.f32 %v5803_v4, %v5255_v59 }
 0x35a   :  { %6313 = vtanh.f32 %v727_v62  ;;  %v613_v7 = vpop.f32.mrf.mxu1  ;;  %v731_v8 = vpop.f32.mrf.mxu0  ;;  %v5276_v62 = vld [vmem:[#allocation2 + $0x130] ss:$0 sm:$0xff] }
 0x35b   :  { %v6691_v9 = vadd.f32 %v6685_v2, %v613_v7  ;;  %v732_v10 = vadd.f32 %v5255_v59, %v731_v8 }
 0x35c   :  { %v5795_v11 = vpop.f32.mrf.mxu1 }
 0x35d   :  { %6315 = vtanh.f32 %v732_v10  ;;  %v6694_v12 = vadd.f32 %v5795_v11, %v6685_v2 }
 0x35e   :  { %6317 = vtanh.f32 %v737_v6  ;;  %v6700_v22 = vpop.f32.mrf.mxu1 }
 0x366   :  { %v6312_v13 = vpop.eup %6311 }
 0x367   :  { %v6314_v14 = vpop.eup %6313  ;;  %5812 = vmatprep.mubr.msk.f32.mxu1 %vm194_vm2, %v6312_v13 }
 0x368   :  { %5813 = vmatmul.mubr.msk.f32.vlgmr.msra.gmra.mxu1 %vm194_vm2, %v6314_v14 }
 0x369   :  { %5833 = vmatpush3.msra.mxu1 %v975_v47 }
 0x36a   :  { %v6316_v15 = vpop.eup %6315  ;;  %5834 = vmatprep.subr.mxu1 %v974_v48 }
 0x36b   :  { %v6318_v16 = vpop.eup %6317  ;;  %5815 = vmatprep.mubr.msk.f32.mxu1 %vm194_vm2, %v6316_v15  ;;  %5835 = vmatpush3.msra.mxu1 %v974_v48 }
 0x36c   :  { %5816 = vmatmul.mubr.msk.f32.gmra.mxu1 %vm194_vm2, %v6318_v16  ;;  %5836 = vmatprep.subr.mxu1 %v973_v49 }
 0x36d   :  { %5837 = vmatpush3.msra.mxu1 %v973_v49 }
 0x36e   :  { %5838 = vmatprep.subr.mxu1 %v972_v50 }
 0x36f   :  { %5839 = vmatpush3.msra.mxu1 %v972_v50 }
 0x370   :  { %5860 = vmatprep.subr.mxu1 %v1191_v51 }
 0x428   :  { %v5814_v24 = vpop.f32.mrf.mxu1 }
 0x429   :  { %v837_v25 = vadd.f32 %v5814_v24, %v5261_v23 }
 0x42a   :  { %v831_v26 = vpop.f32.mrf.mxu1 }
 0x42b   :  { %v832_v27 = vadd.f32 %v5261_v23, %v831_v26  ;;  %6319 = vtanh.f32 %v837_v25  ;;  %v1305_v25 = vld [vmem:[#allocation2 + $0x178] sm:$0xff]  ;;  %v1304_v26 = vld [vmem:[#allocation2 + $0x170] sm:$0xff] }
 0x42c   :  { %v5817_v28 = vpop.f32.mrf.mxu1 }
 0x42d   :  { %6321 = vtanh.f32 %v832_v27  ;;  %v847_v29 = vadd.f32 %v5817_v28, %v5261_v23  ;;  %v1303_v27 = vld [vmem:[#allocation2 + $0x168] sm:$0xff]  ;;  %v1302_v28 = vld [vmem:[#allocation2 + $0x160] sm:$0xff] }
 0x42e   :  { %v841_v30 = vpop.f32.mrf.mxu1 }
 0x42f   :  { %v842_v31 = vadd.f32 %v5261_v23, %v841_v30  ;;  %6323 = vtanh.f32 %v847_v29  ;;  %v6549_v29 = vmov 0.0  }
 0x431   :  { %6325 = vtanh.f32 %v842_v31 }
 0x438   :  { %v6320_v32 = vpop.eup %6319 }
 0x439   :  { %v6704_v35 = vadd.f32 %v6320_v32, %v6314_v14  ;;  %v1190_v14 = vld [vmem:[#allocation2 + $0x148] sm:$0xff] }
 0x43a   :  { %v6322_v33 = vpop.eup %6321  ;;  %v5271_v32 = vld [vmem:[#allocation2 + $0x108] ss:$0 sm:$0xff] }
 0x43b   :  { %v6702_v34 = vadd.f32 %v6322_v33, %v6312_v13 }
 0x43c   :  { %v6324_v36 = vpop.eup %6323 }
 0x43d   :  { %5826 = vmatprep.mubr.msk.f32.mxu0 %vm194_vm2, %v6702_v34  ;;  %v6712_v41 = vadd.f32 %v6324_v36, %v6318_v16  ;;  %v5281_v36 = vld [vmem:[#allocation2 + $0x158] ss:$0 sm:$0xff] }
 0x43e   :  { %v6326_v38 = vpop.eup %6325  ;;  %5827 = vmatmul.mubr.msk.f32.vlgmr.msra.gmra.mxu0 %vm194_vm2, %v6704_v35 }
 0x43f   :  { %5847 = vmatpush3.msra.mxu0 %v1081_v21  ;;  %v6710_v39 = vadd.f32 %v6326_v38, %v6316_v15 }
 0x440   :  { %5848 = vmatprep.subr.mxu0 %v1080_v37 }
 0x441   :  { %5829 = vmatprep.mubr.msk.f32.mxu0 %vm194_vm2, %v6710_v39  ;;  %5849 = vmatpush3.msra.mxu0 %v1080_v37 }
 0x442   :  { %5830 = vmatmul.mubr.msk.f32.gmra.mxu0 %vm194_vm2, %v6712_v41  ;;  %5850 = vmatprep.subr.mxu0 %v1079_v40 }
 0x443   :  { %5851 = vmatpush3.msra.mxu0 %v1079_v40  ;;  %5854 = vmatprep.mubr.msk.f32.mxu0 %vm194_vm2, %v594_v42 }
 0x444   :  { %5852 = vmatprep.subr.mxu0 %v1078_v43 }
 0x445   :  { %5853 = vmatpush3.msra.mxu0 %v1078_v43 }
 0x446   :  { %5855 = vmatmul.mubr.msk.f32.vlgmr.msra.gmra.mxu0 %vm194_vm2, %v599_v44  ;;  %5874 = vmatprep.subr.mxu0 %v1305_v25 }
 0x447   :  { %5857 = vmatprep.mubr.msk.f32.mxu0 %vm194_vm2, %v604_v45  ;;  %5875 = vmatpush3.msra.mxu0 %v1305_v25 }
 0x448   :  { %5876 = vmatprep.subr.mxu0 %v1304_v26 }
 0x449   :  { %5877 = vmatpush3.msra.mxu0 %v1304_v26 }
 0x44a   :  { %5858 = vmatmul.mubr.msk.f32.gmra.mxu0 %vm194_vm2, %v609_v46  ;;  %5878 = vmatprep.subr.mxu0 %v1303_v27 }
 0x44b   :  { %5879 = vmatpush3.msra.mxu0 %v1303_v27 }
 0x44c   :  { %5880 = vmatprep.subr.mxu0 %v1302_v28 }
 0x44d   :  { %5881 = vmatpush3.msra.mxu0 %v1302_v28 }
 0x44e   :  { %5902 = vmatprep.subr.mxu0 %v6549_v29 }
 0x4fe   :  { %v5828_v53 = vpop.f32.mrf.mxu0 }
 0x4ff   :  { %v951_v54 = vadd.f32 %v5828_v53, %v5266_v52 }
 0x500   :  { %v945_v55 = vpop.f32.mrf.mxu0 }
 0x501   :  { %v946_v56 = vadd.f32 %v5266_v52, %v945_v55  ;;  %6327 = vtanh.f32 %v951_v54 }
 0x502   :  { %v5831_v57 = vpop.f32.mrf.mxu0 }
 0x503   :  { %6329 = vtanh.f32 %v946_v56  ;;  %v961_v58 = vadd.f32 %v5831_v57, %v5266_v52  ;;  %v1419_v56 = vld [vmem:[#allocation2 + $0x1a0] sm:$0xff]  ;;  %v1418_v57 = vld [vmem:[#allocation2 + $0x198] sm:$0xff] }
 0x504   :  { %v955_v59 = vpop.f32.mrf.mxu0 }
 0x505   :  { %v956_v60 = vadd.f32 %v5266_v52, %v955_v59  ;;  %6331 = vtanh.f32 %v961_v58  ;;  %v1417_v58 = vld [vmem:[#allocation2 + $0x190] sm:$0xff]  ;;  %v1416_v59 = vld [vmem:[#allocation2 + $0x188] sm:$0xff] }
 0x506   :  { %v5856_v61 = vpop.f32.mrf.mxu0 }
 0x507   :  { %6333 = vtanh.f32 %v956_v60  ;;  %v1171_v1 = vadd.f32 %v5856_v61, %v5276_v62  ;;  %v5286_v60 = vld [vmem:[#allocation2 + $0x180] ss:$0 sm:$0xff] }
 0x508   :  { %v1165_v63 = vpop.f32.mrf.mxu0 }
 0x509   :  { %v1166_v0 = vadd.f32 %v5276_v62, %v1165_v63 }
 0x50a   :  { %v5859_v2 = vpop.f32.mrf.mxu0 }
 0x50b   :  { %6335 = vtanh.f32 %v1166_v0  ;;  %v1181_v6 = vadd.f32 %v5859_v2, %v5276_v62 }
 0x50c   :  { %v1175_v3 = vpop.f32.mrf.mxu0  ;;  %6337 = vtanh.f32 %v1171_v1 }
 0x50d   :  { %v1176_v4 = vadd.f32 %v5276_v62, %v1175_v3 }
 0x50e   :  { %v6328_v7 = vpop.eup %6327 }
 0x50f   :  { %6339 = vtanh.f32 %v1176_v4  ;;  %v969_v11 = vadd.f32 %v6328_v7, %v6704_v35 }
 0x510   :  { %v6330_v8 = vpop.eup %6329  ;;  %6341 = vtanh.f32 %v1181_v6 }
 0x511   :  { %v968_v10 = vadd.f32 %v6330_v8, %v6702_v34 }
 0x512   :  { %v6332_v13 = vpop.eup %6331 }
 0x513   :  { %5840 = vmatprep.mubr.msk.f32.mxu1 %vm194_vm2, %v968_v10  ;;  %v971_v18 = vadd.f32 %v6332_v13, %v6712_v41 }
 0x514   :  { %v6334_v15 = vpop.eup %6333  ;;  %5841 = vmatmul.mubr.msk.f32.vlgmr.msra.gmra.mxu1 %vm194_vm2, %v969_v11 }
 0x515   :  { %5861 = vmatpush3.msra.mxu1 %v1191_v51  ;;  %v970_v16 = vadd.f32 %v6334_v15, %v6710_v39 }
 0x516   :  { %5862 = vmatprep.subr.mxu1 %v1190_v14 }
 0x517   :  { %5843 = vmatprep.mubr.msk.f32.mxu1 %vm194_vm2, %v970_v16  ;;  %5863 = vmatpush3.msra.mxu1 %v1190_v14  ;;  %v5291_v16 = vld [vmem:[#allocation2 + $0x1a8] ss:$0 sm:$0xff] }
 0x518   :  { %v6336_v20 = vpop.eup %6335  ;;  %5844 = vmatmul.mubr.msk.f32.gmra.mxu1 %vm194_vm2, %v971_v18  ;;  %5864 = vmatprep.subr.mxu1 %v1189_v17 }
 0x519   :  { %5865 = vmatpush3.msra.mxu1 %v1189_v17  ;;  %5868 = vmatprep.mubr.msk.f32.mxu1 %vm194_vm2, %v6336_v20  ;;  %v6338_v21 = vpop.eup %6337 }
 0x51a   :  { %5866 = vmatprep.subr.mxu1 %v1188_v19 }
 0x51b   :  { %5867 = vmatpush3.msra.mxu1 %v1188_v19 }
 0x51c   :  { %v6340_v23 = vpop.eup %6339  ;;  %5869 = vmatmul.mubr.msk.f32.vlgmr.msra.gmra.mxu1 %vm194_vm2, %v6338_v21  ;;  %5888 = vmatprep.subr.mxu1 %v1419_v56 }
 0x51d   :  { %5871 = vmatprep.mubr.msk.f32.mxu1 %vm194_vm2, %v6340_v23  ;;  %v6342_v24 = vpop.eup %6341  ;;  %5889 = vmatpush3.msra.mxu1 %v1419_v56 }
 0x51e   :  { %5890 = vmatprep.subr.mxu1 %v1418_v57 }
 0x51f   :  { %5891 = vmatpush3.msra.mxu1 %v1418_v57 }
 0x520   :  { %5872 = vmatmul.mubr.msk.f32.gmra.mxu1 %vm194_vm2, %v6342_v24  ;;  %5892 = vmatprep.subr.mxu1 %v1417_v58 }
 0x521   :  { %5893 = vmatpush3.msra.mxu1 %v1417_v58 }
 0x522   :  { %5894 = vmatprep.subr.mxu1 %v1416_v59 }
 0x523   :  { %5895 = vmatpush3.msra.mxu1 %v1416_v59 }
 0x5d4   :  { %v5842_v30 = vpop.f32.mrf.mxu1 }
 0x5d5   :  { %v1065_v51 = vadd.f32 %v5842_v30, %v5271_v32 }
 0x5d6   :  { %v1059_v31 = vpop.f32.mrf.mxu1 }
 0x5d7   :  { %v1060_v53 = vadd.f32 %v5271_v32, %v1059_v31 }
 0x5d8   :  { %v5845_v33 = vpop.f32.mrf.mxu1 }
 0x5d9   :  { %v6743_v34 = vadd.f32 %v5845_v33, %v5271_v32 }
 0x5da   :  { %v1069_v35 = vpop.f32.mrf.mxu1 }
 0x5db   :  { %v6745_v37 = vadd.f32 %v5271_v32, %v1069_v35 }
 0x5dc   :  { %v5870_v38 = vpop.f32.mrf.mxu1 }
 0x5dd   :  { %v1281_v39 = vadd.f32 %v5870_v38, %v5281_v36 }
 0x5de   :  { %v1275_v40 = vpop.f32.mrf.mxu1 }
 0x5df   :  { %v1276_v41 = vadd.f32 %v5281_v36, %v1275_v40  ;;  %6343 = vtanh.f32 %v1281_v39 }
 0x5e0   :  { %v5873_v42 = vpop.f32.mrf.mxu1 }
 0x5e1   :  { %6345 = vtanh.f32 %v1276_v41  ;;  %v1291_v43 = vadd.f32 %v5873_v42, %v5281_v36 }
 0x5e2   :  { %v1285_v44 = vpop.f32.mrf.mxu1 }
 0x5e3   :  { %v1286_v45 = vadd.f32 %v5281_v36, %v1285_v44  ;;  %6347 = vtanh.f32 %v1291_v43 }
 0x5e5   :  { %6349 = vtanh.f32 %v1286_v45 }
 0x5ec   :  { %v6344_v46 = vpop.eup %6343 }
 0x5ed   :  { %v1299_v49 = vadd.f32 %v6344_v46, %v6338_v21 }
 0x5ee   :  { %v6346_v47 = vpop.eup %6345 }
 0x5ef   :  { %v1298_v48 = vadd.f32 %v6346_v47, %v6336_v20 }
 0x5f0   :  { %v6348_v50 = vpop.eup %6347 }
 0x5f1   :  { %5882 = vmatprep.mubr.msk.f32.mxu0 %vm194_vm2, %v1298_v48  ;;  %v1301_v55 = vadd.f32 %v6348_v50, %v6342_v24 }
 0x5f2   :  { %v6350_v52 = vpop.eup %6349  ;;  %5883 = vmatmul.mubr.msk.f32.vlgmr.msra.gmra.mxu0 %vm194_vm2, %v1299_v49 }
 0x5f3   :  { %5903 = vmatpush3.msra.mxu0 %v1065_v51  ;;  %v1300_v54 = vadd.f32 %v6350_v52, %v6340_v23 }
 0x5f4   :  { %5904 = vmatprep.subr.mxu0 %v6549_v29 }
 0x5f5   :  { %5905 = vmatpush3.msra.mxu0 %v1060_v53  ;;  %5885 = vmatprep.mubr.msk.f32.mxu0 %vm194_vm2, %v1300_v54 }
 0x5f6   :  { %5886 = vmatmul.mubr.msk.f32.gmra.mxu0 %vm194_vm2, %v1301_v55  ;;  %5909 = vmatprep.subr.mxu0 %v6549_v29 }
 0x5f7   :  { %5906 = vmatprep.mubr.msk.f32.mxu0 %vm6550_vm5, %v6549_v29 }
 0x6b2   :  { %v5884_v61 = vpop.f32.mrf.mxu0 }
 0x6b3   :  { %v1395_v62 = vadd.f32 %v5884_v61, %v5286_v60 }
 0x6b4   :  { %v1389_v63 = vpop.f32.mrf.mxu0 }
 0x6b5   :  { %v1390_v0 = vadd.f32 %v5286_v60, %v1389_v63  ;;  %6351 = vtanh.f32 %v1395_v62 }
 0x6b6   :  { %v5887_v1 = vpop.f32.mrf.mxu0 }
 0x6b7   :  { %6353 = vtanh.f32 %v1390_v0  ;;  %v1405_v2 = vadd.f32 %v5887_v1, %v5286_v60 }
 0x6b8   :  { %v1399_v3 = vpop.f32.mrf.mxu0 }
 0x6b9   :  { %v1400_v4 = vadd.f32 %v5286_v60, %v1399_v3  ;;  %6355 = vtanh.f32 %v1405_v2 }
 0x6bb   :  { %6357 = vtanh.f32 %v1400_v4 }
 0x6c2   :  { %v6352_v6 = vpop.eup %6351 }
 0x6c3   :  { %v1413_v10 = vadd.f32 %v6352_v6, %v1299_v49 }
 0x6c4   :  { %v6354_v7 = vpop.eup %6353 }
 0x6c5   :  { %v1412_v8 = vadd.f32 %v6354_v7, %v1298_v48 }
 0x6c6   :  { %v6356_v11 = vpop.eup %6355 }
 0x6c7   :  { %5896 = vmatprep.mubr.msk.f32.mxu1 %vm194_vm2, %v1412_v8  ;;  %v1415_v15 = vadd.f32 %v6356_v11, %v1301_v55 }
 0x6c8   :  { %v6358_v13 = vpop.eup %6357  ;;  %5897 = vmatmul.mubr.msk.f32.vlgmr.msra.gmra.mxu1 %vm194_vm2, %v1413_v10 }
 0x6c9   :  { %v1414_v14 = vadd.f32 %v6358_v13, %v1300_v54 }
 0x6cb   :  { %5899 = vmatprep.mubr.msk.f32.mxu1 %vm194_vm2, %v1414_v14 }
 0x6cc   :  { %5900 = vmatmul.mubr.msk.f32.gmra.mxu1 %vm194_vm2, %v1415_v15 }
 0x788   :  { %v5898_v17 = vpop.f32.mrf.mxu1 }
 0x789   :  { %v1509_v18 = vadd.f32 %v5898_v17, %v5291_v16 }
 0x78a   :  { %v1503_v19 = vpop.f32.mrf.mxu1 }
 0x78b   :  { %v1504_v20 = vadd.f32 %v5291_v16, %v1503_v19  ;;  %v1524_v23 = vsel %vm1522_vm6, %v1509_v18, -inf }
 0x78c   :  { %v5901_v21 = vpop.f32.mrf.mxu1 }
 0x78d   :  { %v1523_v24 = vsel %vm1522_vm6, %v1504_v20, -inf  ;;  %v1519_v25 = vadd.f32 %v5901_v21, %v5291_v16 }
 0x78e   :  { %v1525_v26 = vmax.f32 %v1523_v24, %v1524_v23  ;;  %v1513_v27 = vpop.f32.mrf.mxu1 }
 0x78f   :  { %v1514_v28 = vadd.f32 %v5291_v16, %v1513_v27  ;;  %v1657_v31 = vsel %vm1522_vm6, %v1519_v25, -inf }
 0x790   :  { %v1526_v30 = vrot.slane %v1525_v26, 4 }
 0x791   :  { %v1656_v32 = vsel %vm1522_vm6, %v1514_v28, -inf }
 0x792   :  { %v1527_v33 = vmax.f32 %v1525_v26, %v1526_v30  ;;  %v1658_v35 = vmax.f32 %v1656_v32, %v1657_v31 }
 0x794   :  { %v1528_v36 = vrot.slane %v1527_v33, 2  ;;  %v1659_v38 = vrot.slane %v1658_v35, 4 }
 0x796   :  { %v1529_v39 = vmax.f32 %v1527_v33, %v1528_v36  ;;  %v1660_v40 = vmax.f32 %v1658_v35, %v1659_v38 }
 0x798   :  { %v1530_v41 = vrot.slane %v1529_v39, 1  ;;  %v1661_v42 = vrot.slane %v1660_v40, 2 }
 0x79a   :  { %v1531_v43 = vmax.f32 %v1529_v39, %v1530_v41  ;;  %v1662_v44 = vmax.f32 %v1660_v40, %v1661_v42  ;;  %v1844_v42 = vld [vmem:[#allocation2 + $0x300] sm:$0xff] }
 0x79b   :  { %5916 = vmatprep.subr.mxu1 %v1844_v42 }
 0x79c   :  { %v1532_v45 = vsub.f32 %v1504_v20, %v1531_v43  ;;  %v1533_v46 = vsub.f32 %v1509_v18, %v1531_v43  ;;  %v1663_v47 = vrot.slane %v1662_v44, 1  ;;  %v1934_v43 = vld [vmem:[#allocation2 + $0x328] sm:$0xff]  ;;  %5917 = vmatpush3.msra.mxu1 %v1844_v42 }
 0x79e   :  { %v1534_v48 = vmul.f32 1.442695, %v1532_v45  ;;  %v1536_v49 = vmul.f32 1.442695, %v1533_v46  ;;  %v1664_v50 = vmax.f32 %v1662_v44, %v1663_v47  ;;  %v1843_v44 = vld [vmem:[#allocation2 + $0x2f8] sm:$0xff]  ;;  %v1933_v45 = vld [vmem:[#allocation2 + $0x320] sm:$0xff] }
 0x79f   :  { %v1842_v46 = vld [vmem:[#allocation2 + $0x2f0] sm:$0xff]  ;;  %5918 = vmatprep.subr.mxu1 %v1843_v44  ;;  %v1932_v47 = vld [vmem:[#allocation2 + $0x318] sm:$0xff] }
 0x7a0   :  { %6359 = vpow2.f32 %v1534_v48  ;;  %v1665_v51 = vsub.f32 %v1514_v28, %v1664_v50  ;;  %v1666_v52 = vsub.f32 %v1519_v25, %v1664_v50  ;;  %5919 = vmatpush3.msra.mxu1 %v1843_v44  ;;  %v1841_v48 = vld [vmem:[#allocation2 + $0x2e8] sm:$0xff]  ;;  %v2018_v50 = vld [vmem:[#allocation2 + $0x350] sm:$0xff] }
 0x7a1   :  { %6361 = vpow2.f32 %v1536_v49  ;;  %5920 = vmatprep.subr.mxu1 %v1842_v46  ;;  %v1931_v49 = vld [vmem:[#allocation2 + $0x310] sm:$0xff] }
 0x7a2   :  { %v1667_v53 = vmul.f32 1.442695, %v1665_v51  ;;  %v1669_v54 = vmul.f32 1.442695, %v1666_v52  ;;  %5921 = vmatpush3.msra.mxu1 %v1842_v46 }
 0x7a3   :  { %5922 = vmatprep.subr.mxu1 %v1841_v48 }
 0x7a4   :  { %6363 = vpow2.f32 %v1667_v53  ;;  %5923 = vmatpush3.msra.mxu1 %v1841_v48 }
 0x7a5   :  { %6365 = vpow2.f32 %v1669_v54  ;;  %5938 = vmatprep.subr.mxu1 %v2018_v50 }
 0x7ad   :  { %v6360_v55 = vpop.eup %6359 }
 0x7ae   :  { %v6362_v56 = vpop.eup %6361  ;;  %v1538_v57 = vsel %vm1522_vm6, %v6360_v55, 0.0 }
 0x7af   :  { %v1539_v58 = vsel %vm1522_vm6, %v6362_v56, 0.0 }
 0x7b0   :  { %v1540_v59 = vadd.f32 %v1539_v58, %v1538_v57  ;;  %v5299_v58 = vld [vmem:[#allocation2 + $0x2d8] ss:$0 sm:$0xff] }
 0x7b1   :  { %v6364_v60 = vpop.eup %6363 }
 0x7b2   :  { %v6366_v61 = vpop.eup %6365  ;;  %v1671_v62 = vsel %vm1522_vm6, %v6364_v60, 0.0  ;;  %v1541_v63 = vrot.slane %v1540_v59, 4 }
 0x7b3   :  { %v1672_v0 = vsel %vm1522_vm6, %v6366_v61, 0.0 }
 0x7b4   :  { %v1673_v1 = vadd.f32 %v1672_v0, %v1671_v62  ;;  %v1542_v2 = vadd.f32 %v1541_v63, %v1540_v59 }
 0x7b6   :  { %v1543_v3 = vrot.slane %v1542_v2, 2  ;;  %v1674_v4 = vrot.slane %v1673_v1, 4 }
 0x7b8   :  { %v1544_v6 = vadd.f32 %v1543_v3, %v1542_v2  ;;  %v1675_v7 = vadd.f32 %v1674_v4, %v1673_v1  ;;  %v2017_v3 = vld [vmem:[#allocation2 + $0x348] sm:$0xff]  ;;  %v2016_v4 = vld [vmem:[#allocation2 + $0x340] sm:$0xff] }
 0x7ba   :  { %v1545_v8 = vrot.slane %v1544_v6, 1  ;;  %v1676_v10 = vrot.slane %v1675_v7, 2 }
 0x7bc   :  { %v1546_v11 = vadd.f32 %v1545_v8, %v1544_v6  ;;  %v1677_v13 = vadd.f32 %v1676_v10, %v1675_v7  ;;  %v2015_v6 = vld [vmem:[#allocation2 + $0x338] sm:$0xff]  ;;  %v1788_v7 = vlaneseq }
 0x7be   :  { %6367 = vrcp.f32 %v1546_v11  ;;  %v1678_v14 = vrot.slane %v1677_v13, 1  ;;  %v1791_v8 = vshrl.u32 %v1788_v7, 7  ;;  %v1789_v11 = vand.u32 127, %v1788_v7 }
 0x7c0   :  { %v1679_v15 = vadd.f32 %v1678_v14, %v1677_v13  ;;  %v1794_v10 = vadd.s32 1, %v1791_v8  ;;  %v1792_v13 = vmul.u32 8, %v1791_v8 }
 0x7c2   :  { %6369 = vrcp.f32 %v1679_v15  ;;  %v1795_v14 = vmul.u32 8, %v1794_v10  ;;  %v6551_v15 = vmov 1966171168   ;;  %vm1793_vm8 = vcmp.ge.s32.totalorder %v1789_v11, %v1792_v13 }
 0x7c4   :  { %vm1796_vm9 = vcmp.lt.s32.totalorder %v1789_v11, %v1795_v14 }
 0x7c5   :  { %vm1797_vm10 = vmand %vm1793_vm8, %vm1796_vm9 }
 0x7cb   :  { %v6368_v16 = vpop.eup %6367 }
 0x7cc   :  { %v1548_v17 = vmul.f32 %v6368_v16, %v6360_v55  ;;  %v1549_v20 = vmul.f32 %v6368_v16, %v6362_v56  ;;  %v2101_v16 = vunpack.c.l.s4 %v6551_v15 }
 0x7ce   :  { %1550 = vxpose.xlu0.b32.start [1/2] (short) (narrow) %v1548_v17, 8  ;;  %v2102_v17 = vunpack.c.0.s8 %v2101_v16 }
 0x7cf   :  { %v6370_v18 = vpop.eup %6369 }
 0x7d0   :  { %v1681_v19 = vmul.f32 %v6370_v18, %v6364_v60  ;;  %v1682_v21 = vmul.f32 %v6370_v18, %v6366_v61  ;;  %v5300_v60 = vld [vmem:[#allocation2 + $0x2e0] ss:$0 sm:$0xff]  ;;  %v2105_v18 = vsub.s32 %v2102_v17, %v1791_v8 }
 0x7d2   :  { %1683 = vxpose.xlu1.b32.start [1/2] (short) (narrow) %v1681_v19, 8  ;;  %1551 = vxpose.xlu0.b32.end [2/2] (short) (narrow) %v1549_v20, 8  ;;  %v5298_v19 = vsel %vm1797_vm10, 1.0, %v6549_v29 }
 0x7d3   :  { %v2106_v20 = vrot.slane %v5298_v19, %v2105_v18 }
 0x7d6   :  { %1684 = vxpose.xlu1.b32.end [2/2] (short) (narrow) %v1682_v21, 8  ;;  %v2107_v21 = vcombine.high %v2106_v20, %v2106_v20 }
 0x84a   :  { %v1566_v23 = vpop.trf.xlu0 }
 0x84b   :  { %5907 = vmatmul.mubr.msk.f32.vlgmr.msra.gmra.mxu0 %vm1582_vm7, %v1566_v23  ;;  %v2114_v23 = vrot.slane %v2106_v20, %v2105_v18 }
 0x84c   :  { %5910 = vmatpush3.msra.mxu0 %v6743_v34  ;;  %5913 = vmatprep.mubr.msk.f32.mxu0 %vm6550_vm5, %v6549_v29 }
 0x84d   :  { %5911 = vmatprep.subr.mxu0 %v6549_v29 }
 0x84e   :  { %5912 = vmatpush3.msra.mxu0 %v6745_v37  ;;  %v1699_v24 = vpop.trf.xlu1 }
 0x84f   :  { %5914 = vmatmul.mubr.msk.f32.vlgmr.msra.gmra.mxu0 %vm1582_vm7, %v1699_v24  ;;  %5927 = vmatprep.subr.mxu0 %v1934_v43  ;;  %v2126_v24 = vsub.s32 0, %v1791_v8 }
 0x850   :  { %5928 = vmatpush3.msra.mxu0 %v1934_v43 }
 0x851   :  { %5929 = vmatprep.subr.mxu0 %v1933_v45 }
 0x852   :  { %5930 = vmatpush3.msra.mxu0 %v1933_v45 }
 0x853   :  { %5931 = vmatprep.subr.mxu0 %v1932_v47 }
 0x854   :  { %5932 = vmatpush3.msra.mxu0 %v1932_v47 }
 0x855   :  { %5933 = vmatprep.subr.mxu0 %v1931_v49 }
 0x856   :  { %5934 = vmatpush3.msra.mxu0 %v1931_v49  ;;  %v5307_v49 = vld [vmem:[#allocation2 + $0x358] ss:$0 sm:$0xff] }
 0x90b   :  { %v6772_v25 = vpop.f32.mrf.mxu0 }
 0x90c   :  { %v1802_v26 = vsel %vm194_vm2, %v6772_v25, 0.0 }
 0x90d   :  { %1803 = vadd.xlane.f32.xlu0 %v1802_v26  ;;  %v5908_v27 = vpop.f32.mrf.mxu0 }
 0x90f   :  { %v6776_v28 = vpop.f32.mrf.mxu0 }
 0x910   :  { %v1805_v34 = vsel %vm194_vm2, %v6776_v28, 0.0 }
 0x911   :  { %1806 = vadd.xlane.f32.xlu1 %v1805_v34  ;;  %v5915_v30 = vpop.f32.mrf.mxu0  ;;  %v2121_v34 = vrot.slane %v2107_v21, %v2105_v18 }
 0x912   :  { %v5301_v30 = vld [vmem:[#allocation2 + $0x308] ss:$0 sm:$0xff] }
 0x913   :  { %v2123_v42 = vcombine.high %v2121_v34, %v2121_v34 }
 0x915   :  { %v6805_v48 = vrot.slane %v2123_v42, %v2126_v24 }
 0x996   :  { %v1804_v31 = vpop.xlane.xlu0 %1803 }
 0x997   :  { %v1809_v32 = vmul.f32 0.03125, %v1804_v31  ;;  %v5304_v31 = vld [vmem:[#allocation2 + $0x330] ss:$0 sm:$0xff] }
 0x999   :  { %v1811_v37 = vsub.f32 %v6772_v25, %v1809_v32 }
 0x99a   :  { %v1807_v33 = vpop.xlane.xlu1 %1806 }
 0x99b   :  { %v1810_v35 = vmul.f32 0.03125, %v1807_v33  ;;  %v1813_v36 = vmul.f32 %v1811_v37, %v1811_v37  ;;  %v2122_v33 = vcombine.high %v2114_v23, %v2114_v23 }
 0x99d   :  { %v1812_v38 = vsub.f32 %v6776_v28, %v1810_v35  ;;  %v1815_v39 = vsel %vm194_vm2, %v1813_v36, 0.0  ;;  %v6798_v43 = vrot.slane %v2122_v33, %v2126_v24 }
 0x99e   :  { %1816 = vadd.xlane.f32.xlu1 %v1815_v39  ;;  %v6793_v39 = vrot.slane %v2121_v34, %v2126_v24 }
 0x99f   :  { %v1814_v40 = vmul.f32 %v1812_v38, %v1812_v38 }
 0x9a1   :  { %v1818_v41 = vsel %vm194_vm2, %v1814_v40, 0.0 }
 0x9a2   :  { %1819 = vadd.xlane.f32.xlu1 %v1818_v41 }
 0xa27   :  { %v1817_v51 = vpop.xlane.xlu1 %1816 }
 0xa28   :  { %v1821_v52 = vmul.f32 0.03125, %v1817_v51 }
 0xa2a   :  { %v1823_v53 = vadd.f32 1e-05, %v1821_v52 }
 0xa2b   :  { %v1820_v54 = vpop.xlane.xlu1 %1819 }
 0xa2c   :  { %6371 = vrsqrt.f32 %v1823_v53  ;;  %v1822_v55 = vmul.f32 0.03125, %v1820_v54 }
 0xa2e   :  { %v1824_v56 = vadd.f32 1e-05, %v1822_v55 }
 0xa30   :  { %6373 = vrsqrt.f32 %v1824_v56 }
 0xa39   :  { %v6372_v57 = vpop.eup %6371 }
 0xa3a   :  { %v1827_v59 = vmul.f32 %v6372_v57, %v1811_v37 }
 0xa3c   :  { %v1833_v61 = vmul.f32 %v5299_v58, %v1827_v59 }
 0xa3d   :  { %v6374_v62 = vpop.eup %6373 }
 0xa3e   :  { %v1828_v63 = vmul.f32 %v6374_v62, %v1812_v38  ;;  %v1839_v0 = vadd.f32 %v5300_v60, %v1833_v61  ;;  %v6791_v38 = vrot.slane %v2114_v23, %v2126_v24 }
 0xa40   :  { %v1834_v1 = vmul.f32 %v5299_v58, %v1828_v63  ;;  %5924 = vmatprep.mubr.msk.f32.mxu1 %vm194_vm2, %v1839_v0  ;;  %5935 = vmatprep.mubr.msk.f32.mxu0 %vm194_vm2, %v1839_v0 }
 0xa42   :  { %v1840_v2 = vadd.f32 %v5300_v60, %v1834_v1 }
 0xa44   :  { %5925 = vmatmul.mubr.msk.f32.vlgmr.msra.gmra.mxu1 %vm194_vm2, %v1840_v2  ;;  %5936 = vmatmul.mubr.msk.f32.vlgmr.msra.gmra.mxu0 %vm194_vm2, %v1840_v2 }
 0xa45   :  { %5939 = vmatpush3.msra.mxu1 %v2018_v50  ;;  %5946 = vmatprep.mubr.msk.f32.mxu1 %vm194_vm2, %v1839_v0 }
 0xa46   :  { %5940 = vmatprep.subr.mxu1 %v2017_v3 }
 0xa47   :  { %5941 = vmatpush3.msra.mxu1 %v2017_v3 }
 0xa48   :  { %5942 = vmatprep.subr.mxu1 %v2016_v4 }
 0xa49   :  { %5943 = vmatpush3.msra.mxu1 %v2016_v4 }
 0xa4a   :  { %5944 = vmatprep.subr.mxu1 %v2015_v6 }
 0xa4b   :  { %5945 = vmatpush3.msra.mxu1 %v2015_v6 }
 0xa4c   :  { %5947 = vmatmul.mubr.msk.f32.vlgmr.msra.gmra.mxu1 %vm194_vm2, %v1840_v2 }
 0xb04   :  { %v5926_v26 = vpop.f32.mrf.mxu1  ;;  %v5937_v27 = vpop.f32.mrf.mxu0 }
 0xb05   :  { %v2012_v40 = vadd.f32 %v5937_v27, %v5304_v31  ;;  %v1928_v45 = vadd.f32 %v5926_v26, %v5301_v30 }
 0xb06   :  { %v1922_v32 = vpop.f32.mrf.mxu1  ;;  %v2006_v37 = vpop.f32.mrf.mxu0 }
 0xb07   :  { %v1923_v35 = vadd.f32 %v5301_v30, %v1922_v32  ;;  %v2007_v36 = vadd.f32 %v5304_v31, %v2006_v37  ;;  %v2404_v53 = vmul.f32 %v6791_v38, %v1928_v45  ;;  %v2405_v55 = vmul.f32 %v6793_v39, %v1928_v45 }
 0xb08   :  { %v2406_v56 = vmul.f32 %v6798_v43, %v1928_v45  ;;  %v2407_v57 = vmul.f32 %v6805_v48, %v1928_v45 }
 0xb09   :  { %5949 = vmatprep.subr.msk.mxu0 %vm194_vm2, %v2007_v36  ;;  %v2144_v41 = vmul.f32 %v6791_v38, %v1923_v35  ;;  %v2145_v44 = vmul.f32 %v6793_v39, %v1923_v35  ;;  %v2146_v47 = vmul.f32 %v6798_v43, %v1923_v35  ;;  %v2147_v52 = vmul.f32 %v6805_v48, %v1923_v35 }
 0xb0a   :  { %5950 = vmatpush3.xpose.msk.msra.mxu0 %vm194_vm2, %v2007_v36 }
 0xb0b   :  { %5951 = vmatprep.mubr.msk.f32.mxu0 %vm194_vm2, %v2144_v41  ;;  %5965 = vmatprep.subr.msk.mxu0 %vm194_vm2, %v2012_v40 }
 0xb0c   :  { %v5948_v46 = vpop.f32.mrf.mxu1 }
 0xb0d   :  { %5952 = vmatmul.mubr.msk.f32.vlgmr.msra.gmra.mxu0 %vm194_vm2, %v2145_v44  ;;  %v6811_v54 = vadd.f32 %v5948_v46, %v5307_v49 }
 0xb0e   :  { %v2090_v50 = vpop.f32.mrf.mxu1  ;;  %5954 = vmatprep.mubr.msk.f32.mxu0 %vm194_vm2, %v2146_v47  ;;  %5966 = vmatpush3.xpose.msk.msra.mxu0 %vm194_vm2, %v2012_v40 }
 0xb0f   :  { %v2091_v51 = vadd.f32 %v5307_v49, %v2090_v50 }
 0xb11   :  { %5957 = vmatprep.subr.mxu1 %v2091_v51  ;;  %5955 = vmatmul.mubr.msk.f32.gmra.mxu0 %vm194_vm2, %v2147_v52 }
 0xb12   :  { %5958 = vmatpush3.msra.mxu1 %v2091_v51  ;;  %5967 = vmatprep.mubr.msk.f32.mxu0 %vm194_vm2, %v2404_v53 }
 0xb13   :  { %5973 = vmatprep.subr.mxu1 %v6811_v54 }
 0xb15   :  { %5968 = vmatmul.mubr.msk.f32.vlgmr.msra.gmra.mxu0 %vm194_vm2, %v2405_v55 }
 0xb16   :  { %5970 = vmatprep.mubr.msk.f32.mxu0 %vm194_vm2, %v2406_v56 }
 0xb19   :  { %5971 = vmatmul.mubr.msk.f32.gmra.mxu0 %vm194_vm2, %v2407_v57 }
 0xbcd   :  { %v5953_v58 = vpop.f32.mrf.mxu0 }
 0xbce   :  { %v2249_v59 = vmul.f32 0.35355338, %v5953_v58 }
 0xbcf   :  { %v2229_v60 = vpop.f32.mrf.mxu0 }
 0xbd0   :  { %v2248_v61 = vmul.f32 0.35355338, %v2229_v60  ;;  %v2255_v62 = vsel %vm1522_vm6, %v2249_v59, -inf }
 0xbd1   :  { %2256 = vmax.xlane.f32.xlu1 %v2255_v62  ;;  %v5956_v63 = vpop.f32.mrf.mxu0 }
 0xbd2   :  { %v2251_v0 = vmul.f32 0.35355338, %v5956_v63  ;;  %v2252_v1 = vsel %vm1522_vm6, %v2248_v61, -inf }
 0xbd3   :  { %2253 = vmax.xlane.f32.xlu0 %v2252_v1  ;;  %v2239_v2 = vpop.f32.mrf.mxu0 }
 0xbd4   :  { %v2250_v3 = vmul.f32 0.35355338, %v2239_v2  ;;  %v2261_v4 = vsel %vm1522_vm6, %v2251_v0, -inf }
 0xbd5   :  { %2262 = vmax.xlane.f32.xlu1 %v2261_v4  ;;  %v5969_v6 = vpop.f32.mrf.mxu0 }
 0xbd6   :  { %v2509_v7 = vmul.f32 0.35355338, %v5969_v6  ;;  %v2258_v8 = vsel %vm1522_vm6, %v2250_v3, -inf }
 0xbd7   :  { %v2489_v10 = vpop.f32.mrf.mxu0  ;;  %2259 = vmax.xlane.f32.xlu0 %v2258_v8 }
 0xbd8   :  { %v2508_v11 = vmul.f32 0.35355338, %v2489_v10  ;;  %v2515_v13 = vsel %vm1522_vm6, %v2509_v7, -inf }
 0xbd9   :  { %2516 = vmax.xlane.f32.xlu1 %v2515_v13  ;;  %v5972_v14 = vpop.f32.mrf.mxu0 }
 0xbda   :  { %v2511_v15 = vmul.f32 0.35355338, %v5972_v14  ;;  %v2512_v16 = vsel %vm1522_vm6, %v2508_v11, -inf }
 0xbdb   :  { %v2499_v17 = vpop.f32.mrf.mxu0  ;;  %2513 = vmax.xlane.f32.xlu0 %v2512_v16 }
 0xbdc   :  { %v2510_v18 = vmul.f32 0.35355338, %v2499_v17  ;;  %v2521_v19 = vsel %vm1522_vm6, %v2511_v15, -inf }
 0xbdd   :  { %2522 = vmax.xlane.f32.xlu1 %v2521_v19 }
 0xbde   :  { %v2518_v20 = vsel %vm1522_vm6, %v2510_v18, -inf }
 0xbdf   :  { %2519 = vmax.xlane.f32.xlu0 %v2518_v20 }
 0xc5a   :  { %v2257_v21 = vpop.xlane.xlu1 %2256 }
 0xc5b   :  { %v2265_v23 = vsub.f32 %v2249_v59, %v2257_v21 }
 0xc5c   :  { %v2254_v24 = vpop.xlane.xlu0 %2253 }
 0xc5d   :  { %v2270_v26 = vmul.f32 1.442695, %v2265_v23  ;;  %v2264_v27 = vsub.f32 %v2248_v61, %v2254_v24 }
 0xc5e   :  { %v2263_v34 = vpop.xlane.xlu1 %2262 }
 0xc5f   :  { %6375 = vpow2.f32 %v2270_v26  ;;  %v2268_v30 = vmul.f32 1.442695, %v2264_v27  ;;  %v2267_v31 = vsub.f32 %v2251_v0, %v2263_v34 }
 0xc60   :  { %v2260_v32 = vpop.xlane.xlu0 %2259 }
 0xc61   :  { %6377 = vpow2.f32 %v2268_v30  ;;  %v2274_v37 = vmul.f32 1.442695, %v2267_v31  ;;  %v2266_v33 = vsub.f32 %v2250_v3, %v2260_v32 }
 0xc62   :  { %v2517_v35 = vpop.xlane.xlu1 %2516 }
 0xc63   :  { %6379 = vpow2.f32 %v2274_v37  ;;  %v2272_v36 = vmul.f32 1.442695, %v2266_v33  ;;  %v2525_v40 = vsub.f32 %v2509_v7, %v2517_v35 }
 0xc64   :  { %v2514_v41 = vpop.xlane.xlu0 %2513 }
 0xc65   :  { %6381 = vpow2.f32 %v2272_v36  ;;  %v2530_v42 = vmul.f32 1.442695, %v2525_v40  ;;  %v2524_v44 = vsub.f32 %v2508_v11, %v2514_v41  ;;  %v2666_v36 = vld [vmem:[#allocation2 + $0x370] sm:$0xff]  ;;  %v2665_v40 = vld [vmem:[#allocation2 + $0x368] sm:$0xff]  ;;  %v2664_v41 = vld [vmem:[#allocation2 + $0x360] sm:$0xff] }
 0xc66   :  { %v2523_v45 = vpop.xlane.xlu1 %2522 }
 0xc67   :  { %6383 = vpow2.f32 %v2530_v42  ;;  %v2528_v46 = vmul.f32 1.442695, %v2524_v44  ;;  %v2527_v47 = vsub.f32 %v2511_v15, %v2523_v45 }
 0xc68   :  { %v2520_v49 = vpop.xlane.xlu0 %2519 }
 0xc69   :  { %6385 = vpow2.f32 %v2528_v46  ;;  %v2534_v50 = vmul.f32 1.442695, %v2527_v47  ;;  %v2526_v51 = vsub.f32 %v2510_v18, %v2520_v49 }
 0xc6b   :  { %6387 = vpow2.f32 %v2534_v50  ;;  %v2532_v52 = vmul.f32 1.442695, %v2526_v51 }
 0xc6c   :  { %v6376_v53 = vpop.eup %6375 }
 0xc6d   :  { %6389 = vpow2.f32 %v2532_v52  ;;  %v2279_v55 = vsel %vm1522_vm6, %v6376_v53, 0.0 }
 0xc6e   :  { %v6378_v56 = vpop.eup %6377  ;;  %2280 = vadd.xlane.f32.xlu1 %v2279_v55 }
 0xc6f   :  { %v2276_v57 = vsel %vm1522_vm6, %v6378_v56, 0.0 }
 0xc70   :  { %v6380_v58 = vpop.eup %6379  ;;  %2277 = vadd.xlane.f32.xlu0 %v2276_v57 }
 0xc71   :  { %v2285_v59 = vsel %vm1522_vm6, %v6380_v58, 0.0 }
 0xc72   :  { %v6382_v60 = vpop.eup %6381  ;;  %2286 = vadd.xlane.f32.xlu1 %v2285_v59 }
 0xc73   :  { %v2282_v61 = vsel %vm1522_vm6, %v6382_v60, 0.0 }
 0xc74   :  { %v6384_v62 = vpop.eup %6383  ;;  %2283 = vadd.xlane.f32.xlu0 %v2282_v61 }
 0xc75   :  { %v2539_v63 = vsel %vm1522_vm6, %v6384_v62, 0.0 }
 0xc76   :  { %v6386_v0 = vpop.eup %6385  ;;  %2540 = vadd.xlane.f32.xlu1 %v2539_v63 }
 0xc77   :  { %v2536_v1 = vsel %vm1522_vm6, %v6386_v0, 0.0 }
 0xc78   :  { %v6388_v2 = vpop.eup %6387  ;;  %2537 = vadd.xlane.f32.xlu0 %v2536_v1 }
 0xc79   :  { %v2545_v3 = vsel %vm1522_vm6, %v6388_v2, 0.0 }
 0xc7a   :  { %v6390_v4 = vpop.eup %6389  ;;  %2546 = vadd.xlane.f32.xlu1 %v2545_v3 }
 0xc7b   :  { %v2542_v6 = vsel %vm1522_vm6, %v6390_v4, 0.0 }
 0xc7c   :  { %2543 = vadd.xlane.f32.xlu0 %v2542_v6 }
 0xcf7   :  { %v2281_v7 = vpop.xlane.xlu1 %2280 }
 0xcf8   :  { %6391 = vrcp.f32 %v2281_v7 }
 0xcf9   :  { %v2278_v8 = vpop.xlane.xlu0 %2277 }
 0xcfa   :  { %6393 = vrcp.f32 %v2278_v8 }
 0xcfb   :  { %v2287_v10 = vpop.xlane.xlu1 %2286 }
 0xcfc   :  { %6395 = vrcp.f32 %v2287_v10 }
 0xcfd   :  { %v2284_v11 = vpop.xlane.xlu0 %2283 }
 0xcfe   :  { %6397 = vrcp.f32 %v2284_v11 }
 0xcff   :  { %v2541_v13 = vpop.xlane.xlu1 %2540 }
 0xd00   :  { %6399 = vrcp.f32 %v2541_v13 }
 0xd01   :  { %v2538_v14 = vpop.xlane.xlu0 %2537 }
 0xd02   :  { %6401 = vrcp.f32 %v2538_v14 }
 0xd03   :  { %v2547_v15 = vpop.xlane.xlu1 %2546 }
 0xd04   :  { %6403 = vrcp.f32 %v2547_v15  ;;  %v5330_v15 = vld [vmem:[#allocation2 + $0x380] ss:$0 sm:$0xff] }
 0xd05   :  { %v2544_v16 = vpop.xlane.xlu0 %2543  ;;  %v6392_v17 = vpop.eup %6391 }
 0xd06   :  { %6405 = vrcp.f32 %v2544_v16  ;;  %v2293_v20 = vmul.f32 %v6392_v17, %v6376_v53 }
 0xd07   :  { %v6394_v18 = vpop.eup %6393 }
 0xd08   :  { %v2292_v19 = vmul.f32 %v6394_v18, %v6378_v56 }
 0xd09   :  { %v6396_v21 = vpop.eup %6395 }
 0xd0a   :  { %5959 = vmatprep.mubr.msk.f32.mxu1 %vm1522_vm6, %v2292_v19  ;;  %v2295_v26 = vmul.f32 %v6396_v21, %v6380_v58 }
 0xd0b   :  { %v6398_v23 = vpop.eup %6397  ;;  %5960 = vmatmul.mubr.msk.f32.vlgmr.msra.gmra.mxu1 %vm1522_vm6, %v2293_v20 }
 0xd0c   :  { %5974 = vmatpush3.msra.mxu1 %v6811_v54  ;;  %v2294_v24 = vmul.f32 %v6398_v23, %v6382_v60  ;;  %v2667_v54 = vld [vmem:[#allocation2 + $0x378] sm:$0xff] }
 0xd0d   :  { %v6400_v27 = vpop.eup %6399  ;;  %5981 = vmatprep.subr.mxu0 %v2667_v54 }
 0xd0e   :  { %5962 = vmatprep.mubr.msk.f32.mxu1 %vm1522_vm6, %v2294_v24  ;;  %v2553_v31 = vmul.f32 %v6400_v27, %v6384_v62  ;;  %5982 = vmatpush3.msra.mxu0 %v2667_v54  ;;  %v2799_v54 = vld [vmem:[#allocation2 + $0x3a0] sm:$0xff] }
 0xd0f   :  { %v6402_v34 = vpop.eup %6401  ;;  %5963 = vmatmul.mubr.msk.f32.gmra.mxu1 %vm1522_vm6, %v2295_v26  ;;  %5983 = vmatprep.subr.mxu0 %v2666_v36 }
 0xd10   :  { %v2552_v30 = vmul.f32 %v6402_v34, %v6386_v0  ;;  %5984 = vmatpush3.msra.mxu0 %v2666_v36  ;;  %v2798_v36 = vld [vmem:[#allocation2 + $0x398] sm:$0xff] }
 0xd11   :  { %v6404_v32 = vpop.eup %6403  ;;  %5985 = vmatprep.subr.mxu0 %v2665_v40 }
 0xd12   :  { %5975 = vmatprep.mubr.msk.f32.mxu1 %vm1522_vm6, %v2552_v30  ;;  %v2555_v35 = vmul.f32 %v6404_v32, %v6388_v2  ;;  %5986 = vmatpush3.msra.mxu0 %v2665_v40 }
 0xd13   :  { %v6406_v37 = vpop.eup %6405  ;;  %5976 = vmatmul.mubr.msk.f32.vlgmr.msra.gmra.mxu1 %vm1522_vm6, %v2553_v31  ;;  %5987 = vmatprep.subr.mxu0 %v2664_v41 }
 0xd14   :  { %v2554_v33 = vmul.f32 %v6406_v37, %v6390_v4  ;;  %5988 = vmatpush3.msra.mxu0 %v2664_v41 }
 0xd16   :  { %5978 = vmatprep.mubr.msk.f32.mxu1 %vm1522_vm6, %v2554_v33  ;;  %v2801_v33 = vld [vmem:[#allocation2 + $0x3b0] sm:$0xff] }
 0xd17   :  { %5979 = vmatmul.mubr.msk.f32.gmra.mxu1 %vm1522_vm6, %v2555_v35  ;;  %v2800_v35 = vld [vmem:[#allocation2 + $0x3a8] sm:$0xff]  ;;  %5992 = vmatprep.subr.mxu1 %v2801_v33 }
 0xd18   :  { %5993 = vmatpush3.msra.mxu1 %v2801_v33  ;;  %v3206_v33 = vld [vmem:[#allocation2 + $0x480] sm:$0xff] }
 0xd19   :  { %5994 = vmatprep.subr.mxu1 %v2800_v35 }
 0xd1a   :  { %5995 = vmatpush3.msra.mxu1 %v2800_v35  ;;  %v3031_v35 = vld [vmem:[#allocation2 + $0x428] sm:$0xff] }
 0xd1b   :  { %5996 = vmatprep.subr.mxu1 %v2799_v54 }
 0xd1c   :  { %5997 = vmatpush3.msra.mxu1 %v2799_v54  ;;  %v3205_v54 = vld [vmem:[#allocation2 + $0x478] sm:$0xff] }
 0xd1d   :  { %5998 = vmatprep.subr.mxu1 %v2798_v36 }
 0xd1e   :  { %5999 = vmatpush3.msra.mxu1 %v2798_v36  ;;  %v3030_v36 = vld [vmem:[#allocation2 + $0x420] sm:$0xff] }
 0xdcb   :  { %v5961_v42 = vpop.f32.mrf.mxu1 }
 0xdcc   :  { %v2394_v45 = vmul.f32 %v5961_v42, %v6793_v39 }
 0xdcd   :  { %v2374_v44 = vpop.f32.mrf.mxu1 }
 0xdce   :  { %v2393_v46 = vmul.f32 %v2374_v44, %v6791_v38  ;;  %v2398_v51 = vsel %vm194_vm2, %v2394_v45, 0.0 }
 0xdcf   :  { %v5964_v47 = vpop.f32.mrf.mxu1 }
 0xdd0   :  { %v2397_v49 = vsel %vm194_vm2, %v2393_v46, 0.0  ;;  %v2396_v52 = vmul.f32 %v5964_v47, %v6805_v48 }
 0xdd1   :  { %v2384_v50 = vpop.f32.mrf.mxu1  ;;  %v2399_v55 = vadd.f32 %v2398_v51, %v2397_v49  ;;  %v5331_v49 = vld [vmem:[#allocation2 + $0x388] ss:$0 sm:$0xff] }
 0xdd2   :  { %v2395_v53 = vmul.f32 %v2384_v50, %v6798_v43  ;;  %v2402_v60 = vsel %vm194_vm2, %v2396_v52, 0.0 }
 0xdd3   :  { %v5977_v56 = vpop.f32.mrf.mxu1 }
 0xdd4   :  { %v2400_v57 = vsel %vm194_vm2, %v2395_v53, 0.0  ;;  %v2654_v61 = vmul.f32 %v5977_v56, %v6793_v39 }
 0xdd5   :  { %v2401_v58 = vadd.f32 %v2400_v57, %v2399_v55  ;;  %v2634_v59 = vpop.f32.mrf.mxu1  ;;  %v5332_v55 = vld [vmem:[#allocation2 + $0x390] ss:$0 sm:$0xff] }
 0xdd6   :  { %v2653_v62 = vmul.f32 %v2634_v59, %v6791_v38  ;;  %v2658_v3 = vsel %vm194_vm2, %v2654_v61, 0.0  ;;  %v2897_v59 = vld [vmem:[#allocation2 + $0x3f8] sm:$0xff]  ;;  %v2895_v61 = vld [vmem:[#allocation2 + $0x3e8] sm:$0xff] }
 0xdd7   :  { %v2403_v63 = vadd.f32 %v2402_v60, %v2401_v58  ;;  %v5980_v0 = vpop.f32.mrf.mxu1  ;;  %6003 = vmatprep.subr.mxu0 %v2897_v59  ;;  %v2896_v60 = vld [vmem:[#allocation2 + $0x3f0] sm:$0xff] }
 0xdd8   :  { %v2657_v1 = vsel %vm194_vm2, %v2653_v62, 0.0  ;;  %v2656_v4 = vmul.f32 %v5980_v0, %v6805_v48  ;;  %v2894_v62 = vld [vmem:[#allocation2 + $0x3e0] sm:$0xff]  ;;  %v2892_v0 = vld [vmem:[#allocation2 + $0x3d0] sm:$0xff] }
 0xdd9   :  { %v2644_v2 = vpop.f32.mrf.mxu1  ;;  %5989 = vmatprep.mubr.msk.f32.mxu0 %vm194_vm2, %v2403_v63  ;;  %v2659_v7 = vadd.f32 %v2658_v3, %v2657_v1  ;;  %v2893_v63 = vld [vmem:[#allocation2 + $0x3d8] sm:$0xff]  ;;  %v2891_v1 = vld [vmem:[#allocation2 + $0x3c8] sm:$0xff] }
 0xdda   :  { %v2655_v6 = vmul.f32 %v2644_v2, %v6798_v43  ;;  %v2662_v11 = vsel %vm194_vm2, %v2656_v4, 0.0  ;;  %v2890_v2 = vld [vmem:[#allocation2 + $0x3c0] sm:$0xff]  ;;  %v5333_v3 = vld [vmem:[#allocation2 + $0x3b8] ss:$0 sm:$0xff] }
 0xddc   :  { %v2660_v8 = vsel %vm194_vm2, %v2655_v6, 0.0 }
 0xddd   :  { %v2661_v10 = vadd.f32 %v2660_v8, %v2659_v7 }
 0xddf   :  { %v2663_v13 = vadd.f32 %v2662_v11, %v2661_v10 }
 0xde1   :  { %5990 = vmatmul.mubr.msk.f32.vlgmr.msra.gmra.mxu0 %vm194_vm2, %v2663_v13 }
 0xde2   :  { %6004 = vmatpush3.msra.mxu0 %v2897_v59  ;;  %v5340_v59 = vld [vmem:[#allocation2 + $0x410] ss:$0 sm:$0xff] }
 0xde3   :  { %6005 = vmatprep.subr.mxu0 %v2896_v60 }
 0xde4   :  { %6006 = vmatpush3.msra.mxu0 %v2896_v60 }
 0xde5   :  { %6007 = vmatprep.subr.mxu0 %v2895_v61 }
 0xde6   :  { %6008 = vmatpush3.msra.mxu0 %v2895_v61 }
 0xde7   :  { %6009 = vmatprep.subr.mxu0 %v2894_v62 }
 0xde8   :  { %6010 = vmatpush3.msra.mxu0 %v2894_v62 }
 0xde9   :  { %6011 = vmatprep.subr.mxu0 %v2893_v63 }
 0xdea   :  { %6012 = vmatpush3.msra.mxu0 %v2893_v63  ;;  %v3121_v63 = vld [vmem:[#allocation2 + $0x450] sm:$0xff] }
 0xdeb   :  { %6013 = vmatprep.subr.mxu0 %v2892_v0 }
 0xdec   :  { %6014 = vmatpush3.msra.mxu0 %v2892_v0  ;;  %v3120_v0 = vld [vmem:[#allocation2 + $0x448] sm:$0xff] }
 0xded   :  { %6015 = vmatprep.subr.mxu0 %v2891_v1 }
 0xdee   :  { %6016 = vmatpush3.msra.mxu0 %v2891_v1  ;;  %v3119_v1 = vld [vmem:[#allocation2 + $0x440] sm:$0xff] }
 0xdef   :  { %6017 = vmatprep.subr.mxu0 %v2890_v2 }
 0xdf0   :  { %6018 = vmatpush3.msra.mxu0 %v2890_v2 }
 0xdf1   :  { %6044 = vmatprep.subr.mxu0 %v3206_v33 }
 0xea1   :  { %v5991_v14 = vpop.f32.mrf.mxu0 }
 0xea2   :  { %v2750_v16 = vadd.f32 %v5991_v14, %v6776_v28  ;;  %v5338_v14 = vld [vmem:[#allocation2 + $0x400] ss:$0 sm:$0xff] }
 0xea3   :  { %v2740_v17 = vpop.f32.mrf.mxu0 }
 0xea4   :  { %v6866_v18 = vadd.f32 %v5330_v15, %v2750_v16  ;;  %v2749_v19 = vadd.f32 %v2740_v17, %v6772_v25 }
 0xea6   :  { %v6869_v20 = vadd.f32 %v5330_v15, %v2749_v19  ;;  %v2763_v21 = vsel %vm194_vm2, %v6866_v18, 0.0 }
 0xea7   :  { %2764 = vadd.xlane.f32.xlu1 %v2763_v21 }
 0xea8   :  { %v2760_v23 = vsel %vm194_vm2, %v6869_v20, 0.0 }
 0xea9   :  { %2761 = vadd.xlane.f32.xlu0 %v2760_v23 }
 0xf30   :  { %v2765_v24 = vpop.xlane.xlu1 %2764 }
 0xf31   :  { %v2767_v26 = vmul.f32 0.03125, %v2765_v24 }
 0xf32   :  { %v2762_v27 = vpop.xlane.xlu0 %2761 }
 0xf33   :  { %v2769_v28 = vsub.f32 %v6866_v18, %v2767_v26  ;;  %v2766_v34 = vmul.f32 0.03125, %v2762_v27 }
 0xf35   :  { %v2768_v30 = vsub.f32 %v6869_v20, %v2766_v34  ;;  %v2771_v31 = vmul.f32 %v2769_v28, %v2769_v28 }
 0xf37   :  { %v2775_v25 = vsel %vm194_vm2, %v2771_v31, 0.0  ;;  %v2770_v32 = vmul.f32 %v2768_v30, %v2768_v30 }
 0xf38   :  { %2776 = vadd.xlane.f32.xlu1 %v2775_v25 }
 0xf39   :  { %v2772_v37 = vsel %vm194_vm2, %v2770_v32, 0.0 }
 0xf3a   :  { %2773 = vadd.xlane.f32.xlu0 %v2772_v37  ;;  %v3032_v37 = vld [vmem:[#allocation2 + $0x430] sm:$0xff] }
 0xf3b   :  { %6022 = vmatprep.subr.mxu1 %v3032_v37 }
 0xfc1   :  { %v2777_v40 = vpop.xlane.xlu1 %2776 }
 0xfc2   :  { %v2779_v41 = vmul.f32 0.03125, %v2777_v40  ;;  %v3204_v40 = vld [vmem:[#allocation2 + $0x470] sm:$0xff] }
 0xfc3   :  { %v2774_v42 = vpop.xlane.xlu0 %2773 }
 0xfc4   :  { %v2781_v44 = vadd.f32 1e-05, %v2779_v41  ;;  %v2778_v45 = vmul.f32 0.03125, %v2774_v42  ;;  %v3029_v41 = vld [vmem:[#allocation2 + $0x418] sm:$0xff]  ;;  %v3203_v42 = vld [vmem:[#allocation2 + $0x468] sm:$0xff] }
 0xfc6   :  { %6407 = vrsqrt.f32 %v2781_v44  ;;  %v2780_v46 = vadd.f32 1e-05, %v2778_v45  ;;  %v3122_v44 = vld [vmem:[#allocation2 + $0x458] sm:$0xff] }
 0xfc8   :  { %6409 = vrsqrt.f32 %v2780_v46 }
 0xfd3   :  { %v6408_v47 = vpop.eup %6407 }
 0xfd4   :  { %v2785_v50 = vmul.f32 %v6408_v47, %v2769_v28 }
 0xfd5   :  { %v6410_v51 = vpop.eup %6409 }
 0xfd6   :  { %v2784_v52 = vmul.f32 %v6410_v51, %v2768_v30  ;;  %v2791_v53 = vmul.f32 %v5331_v49, %v2785_v50 }
 0xfd8   :  { %v2790_v56 = vmul.f32 %v5331_v49, %v2784_v52  ;;  %v2797_v58 = vadd.f32 %v5332_v55, %v2791_v53  ;;  %v5339_v53 = vld [vmem:[#allocation2 + $0x408] ss:$0 sm:$0xff] }
 0xfda   :  { %v2796_v57 = vadd.f32 %v5332_v55, %v2790_v56 }
 0xfdc   :  { %6000 = vmatprep.mubr.msk.f32.mxu1 %vm194_vm2, %v2796_v57 }
 0xfdd   :  { %6001 = vmatmul.mubr.msk.f32.vlgmr.msra.gmra.mxu1 %vm194_vm2, %v2797_v58 }
 0xfde   :  { %6023 = vmatpush3.msra.mxu1 %v3032_v37 }
 0xfdf   :  { %6024 = vmatprep.subr.mxu1 %v3031_v35 }
 0xfe0   :  { %6025 = vmatpush3.msra.mxu1 %v3031_v35 }
 0xfe1   :  { %6026 = vmatprep.subr.mxu1 %v3030_v36 }
 0xfe2   :  { %6027 = vmatpush3.msra.mxu1 %v3030_v36 }
 0xfe3   :  { %6028 = vmatprep.subr.mxu1 %v3029_v41 }
 0xfe4   :  { %6029 = vmatpush3.msra.mxu1 %v3029_v41 }
 0xfe5   :  { %6033 = vmatprep.subr.mxu1 %v3122_v44 }
0x109d   :  { %v6002_v4 = vpop.f32.mrf.mxu1 }
0x109e   :  { %v2885_v6 = vadd.f32 %v6002_v4, %v5333_v3  ;;  %v5341_v4 = vld [vmem:[#allocation2 + $0x438] ss:$0 sm:$0xff] }
0x109f   :  { %v2879_v7 = vpop.f32.mrf.mxu1 }
0x10a0   :  { %v2880_v8 = vadd.f32 %v5333_v3, %v2879_v7 }
0x10a2   :  { %6411 = vtanh.f32 %v2880_v8 }
0x10a3   :  { %6413 = vtanh.f32 %v2885_v6  ;;  %v5347_v6 = vld [vmem:[#allocation2 + $0x488] ss:$0 sm:$0xff] }
0x10af   :  { %v6412_v10 = vpop.eup %6411 }
0x10b0   :  { %v6414_v11 = vpop.eup %6413  ;;  %6019 = vmatprep.mubr.msk.f32.mxu0 %vm2898_vm11, %v6412_v10 }
0x10b1   :  { %6020 = vmatmul.mubr.msk.f32.vlgmr.msra.gmra.mxu0 %vm2898_vm11, %v6414_v11 }
0x10b2   :  { %6045 = vmatpush3.msra.mxu0 %v3206_v33 }
0x10b3   :  { %6046 = vmatprep.subr.mxu0 %v3205_v54 }
0x10b4   :  { %6047 = vmatpush3.msra.mxu0 %v3205_v54 }
0x10b5   :  { %6048 = vmatprep.subr.mxu0 %v3204_v40 }
0x10b6   :  { %6049 = vmatpush3.msra.mxu0 %v3204_v40 }
0x10b7   :  { %6050 = vmatprep.subr.mxu0 %v3203_v42 }
0x10b8   :  { %6051 = vmatpush3.msra.mxu0 %v3203_v42 }
0x1171   :  { %v6021_v13 = vpop.f32.mrf.mxu0 }
0x1172   :  { %v2981_v15 = vadd.f32 %v6021_v13, %v6866_v18 }
0x1173   :  { %v2971_v16 = vpop.f32.mrf.mxu0 }
0x1174   :  { %v6884_v17 = vadd.f32 %v5338_v14, %v2981_v15  ;;  %v2980_v19 = vadd.f32 %v2971_v16, %v6869_v20  ;;  %v5344_v16 = vld [vmem:[#allocation2 + $0x460] ss:$0 sm:$0xff] }
0x1176   :  { %v6887_v21 = vadd.f32 %v5338_v14, %v2980_v19  ;;  %v2994_v23 = vsel %vm194_vm2, %v6884_v17, 0.0 }
0x1177   :  { %2995 = vadd.xlane.f32.xlu1 %v2994_v23 }
0x1178   :  { %v2991_v24 = vsel %vm194_vm2, %v6887_v21, 0.0 }
0x1179   :  { %2992 = vadd.xlane.f32.xlu0 %v2991_v24 }
0x1200   :  { %v2996_v26 = vpop.xlane.xlu1 %2995 }
0x1201   :  { %v2998_v27 = vmul.f32 0.03125, %v2996_v26 }
0x1202   :  { %v2993_v28 = vpop.xlane.xlu0 %2992 }
0x1203   :  { %v3000_v18 = vsub.f32 %v6884_v17, %v2998_v27  ;;  %v2997_v34 = vmul.f32 0.03125, %v2993_v28 }
0x1205   :  { %v2999_v30 = vsub.f32 %v6887_v21, %v2997_v34  ;;  %v3002_v31 = vmul.f32 %v3000_v18, %v3000_v18 }
0x1207   :  { %v3006_v20 = vsel %vm194_vm2, %v3002_v31, 0.0  ;;  %v3001_v25 = vmul.f32 %v2999_v30, %v2999_v30 }
0x1208   :  { %3007 = vadd.xlane.f32.xlu1 %v3006_v20 }
0x1209   :  { %v3003_v32 = vsel %vm194_vm2, %v3001_v25, 0.0 }
0x120a   :  { %3004 = vadd.xlane.f32.xlu0 %v3003_v32 }
0x1291   :  { %v3008_v45 = vpop.xlane.xlu1 %3007 }
0x1292   :  { %v3010_v46 = vmul.f32 0.03125, %v3008_v45 }
0x1293   :  { %v3005_v47 = vpop.xlane.xlu0 %3004 }
0x1294   :  { %v3012_v49 = vadd.f32 1e-05, %v3010_v46  ;;  %v3009_v50 = vmul.f32 0.03125, %v3005_v47 }
0x1296   :  { %6415 = vrsqrt.f32 %v3012_v49  ;;  %v3011_v51 = vadd.f32 1e-05, %v3009_v50 }
0x1298   :  { %6417 = vrsqrt.f32 %v3011_v51 }
0x12a3   :  { %v6416_v52 = vpop.eup %6415 }
0x12a4   :  { %v3016_v55 = vmul.f32 %v6416_v52, %v3000_v18 }
0x12a5   :  { %v6418_v56 = vpop.eup %6417 }
0x12a6   :  { %v3015_v57 = vmul.f32 %v6418_v56, %v2999_v30  ;;  %v3022_v58 = vmul.f32 %v5339_v53, %v3016_v55 }
0x12a8   :  { %v3021_v60 = vmul.f32 %v5339_v53, %v3015_v57  ;;  %v3028_v62 = vadd.f32 %v5340_v59, %v3022_v58 }
0x12aa   :  { %v3027_v61 = vadd.f32 %v5340_v59, %v3021_v60 }
0x12ac   :  { %6030 = vmatprep.mubr.msk.f32.mxu1 %vm194_vm2, %v3027_v61  ;;  %6052 = vmatprep.mubr.msk.f32.mxu0 %vm194_vm2, %v3027_v61 }
0x12ad   :  { %6031 = vmatmul.mubr.msk.f32.vlgmr.msra.gmra.mxu1 %vm194_vm2, %v3028_v62  ;;  %6053 = vmatmul.mubr.msk.f32.vlgmr.msra.gmra.mxu0 %vm194_vm2, %v3028_v62 }
0x12ae   :  { %6034 = vmatpush3.msra.mxu1 %v3122_v44  ;;  %6041 = vmatprep.mubr.msk.f32.mxu1 %vm194_vm2, %v3027_v61 }
0x12af   :  { %6035 = vmatprep.subr.mxu1 %v3121_v63 }
0x12b0   :  { %6036 = vmatpush3.msra.mxu1 %v3121_v63 }
0x12b1   :  { %6037 = vmatprep.subr.mxu1 %v3120_v0 }
0x12b2   :  { %6038 = vmatpush3.msra.mxu1 %v3120_v0 }
0x12b3   :  { %6039 = vmatprep.subr.mxu1 %v3119_v1 }
0x12b4   :  { %6040 = vmatpush3.msra.mxu1 %v3119_v1 }
0x12b5   :  { %6042 = vmatmul.mubr.msk.f32.vlgmr.msra.gmra.mxu1 %vm194_vm2, %v3028_v62 }
0x136d   :  { %v6032_v2 = vpop.f32.mrf.mxu1  ;;  %v6054_v3 = vpop.f32.mrf.mxu0 }
0x136e   :  { %v6903_v13 = vadd.f32 %v6054_v3, %v5347_v6  ;;  %v3116_v27 = vadd.f32 %v6032_v2, %v5341_v4 }
0x136f   :  { %v3110_v7 = vpop.f32.mrf.mxu1  ;;  %v3278_v8 = vpop.f32.mrf.mxu0 }
0x1370   :  { %v3111_v10 = vadd.f32 %v5341_v4, %v3110_v7  ;;  %v3279_v11 = vadd.f32 %v5347_v6, %v3278_v8  ;;  %v3547_v34 = vmul.f32 %v3116_v27, %v6791_v38  ;;  %v3548_v30 = vmul.f32 %v3116_v27, %v6793_v39 }
0x1371   :  { %v3549_v31 = vmul.f32 %v3116_v27, %v6798_v43  ;;  %v3550_v20 = vmul.f32 %v3116_v27, %v6805_v48 }
0x1372   :  { %6063 = vmatprep.subr.mxu0 %v3279_v11  ;;  %v3287_v14 = vmul.f32 %v3111_v10, %v6791_v38  ;;  %v3288_v26 = vmul.f32 %v3111_v10, %v6793_v39  ;;  %v3289_v28 = vmul.f32 %v3111_v10, %v6798_v43  ;;  %v3290_v18 = vmul.f32 %v3111_v10, %v6805_v48 }
0x1373   :  { %6064 = vmatpush3.msra.mxu0 %v3279_v11 }
0x1374   :  { %6057 = vmatprep.mubr.msk.f32.mxu1 %vm194_vm2, %v3287_v14  ;;  %6079 = vmatprep.subr.mxu0 %v6903_v13 }
0x1375   :  { %v6043_v15 = vpop.f32.mrf.mxu1 }
0x1376   :  { %v3200_v24 = vadd.f32 %v6043_v15, %v5344_v16 }
0x1377   :  { %v3194_v19 = vpop.f32.mrf.mxu1 }
0x1378   :  { %v3195_v23 = vadd.f32 %v5344_v16, %v3194_v19 }
0x137a   :  { %6055 = vmatprep.subr.msk.mxu1 %vm194_vm2, %v3195_v23 }
0x137b   :  { %6056 = vmatpush3.xpose.msk.msra.mxu1 %vm194_vm2, %v3195_v23 }
0x137c   :  { %6071 = vmatprep.subr.msk.mxu1 %vm194_vm2, %v3200_v24 }
0x137e   :  { %6058 = vmatmul.mubr.msk.f32.vlgmr.msra.gmra.mxu1 %vm194_vm2, %v3288_v26 }
0x137f   :  { %6060 = vmatprep.mubr.msk.f32.mxu1 %vm194_vm2, %v3289_v28  ;;  %6072 = vmatpush3.xpose.msk.msra.mxu1 %vm194_vm2, %v3200_v24 }
0x1382   :  { %6061 = vmatmul.mubr.msk.f32.gmra.mxu1 %vm194_vm2, %v3290_v18 }
0x1383   :  { %6073 = vmatprep.mubr.msk.f32.mxu1 %vm194_vm2, %v3547_v34 }
0x1386   :  { %6074 = vmatmul.mubr.msk.f32.vlgmr.msra.gmra.mxu1 %vm194_vm2, %v3548_v30 }
0x1387   :  { %6076 = vmatprep.mubr.msk.f32.mxu1 %vm194_vm2, %v3549_v31 }
0x138a   :  { %6077 = vmatmul.mubr.msk.f32.gmra.mxu1 %vm194_vm2, %v3550_v20 }
0x143e   :  { %v6059_v25 = vpop.f32.mrf.mxu1 }
0x143f   :  { %v3392_v32 = vmul.f32 0.35355338, %v6059_v25 }
0x1440   :  { %v3372_v37 = vpop.f32.mrf.mxu1 }
0x1441   :  { %v3391_v33 = vmul.f32 0.35355338, %v3372_v37  ;;  %v3398_v35 = vsel %vm1522_vm6, %v3392_v32, -inf }
0x1442   :  { %3399 = vmax.xlane.f32.xlu1 %v3398_v35  ;;  %v6062_v54 = vpop.f32.mrf.mxu1 }
0x1443   :  { %v3394_v36 = vmul.f32 0.35355338, %v6062_v54  ;;  %v3395_v40 = vsel %vm1522_vm6, %v3391_v33, -inf }
0x1444   :  { %3396 = vmax.xlane.f32.xlu0 %v3395_v40  ;;  %v3382_v41 = vpop.f32.mrf.mxu1 }
0x1445   :  { %v3393_v42 = vmul.f32 0.35355338, %v3382_v41  ;;  %v3404_v44 = vsel %vm1522_vm6, %v3394_v36, -inf }
0x1446   :  { %3405 = vmax.xlane.f32.xlu1 %v3404_v44  ;;  %v6075_v45 = vpop.f32.mrf.mxu1 }
0x1447   :  { %v3652_v46 = vmul.f32 0.35355338, %v6075_v45  ;;  %v3401_v47 = vsel %vm1522_vm6, %v3393_v42, -inf }
0x1448   :  { %v3632_v49 = vpop.f32.mrf.mxu1  ;;  %3402 = vmax.xlane.f32.xlu0 %v3401_v47 }
0x1449   :  { %v3651_v50 = vmul.f32 0.35355338, %v3632_v49  ;;  %v3658_v51 = vsel %vm1522_vm6, %v3652_v46, -inf }
0x144a   :  { %3659 = vmax.xlane.f32.xlu1 %v3658_v51  ;;  %v6078_v52 = vpop.f32.mrf.mxu1 }
0x144b   :  { %v3654_v53 = vmul.f32 0.35355338, %v6078_v52  ;;  %v3655_v55 = vsel %vm1522_vm6, %v3651_v50, -inf }
0x144c   :  { %v3642_v56 = vpop.f32.mrf.mxu1  ;;  %3656 = vmax.xlane.f32.xlu0 %v3655_v55 }
0x144d   :  { %v3653_v57 = vmul.f32 0.35355338, %v3642_v56  ;;  %v3664_v58 = vsel %vm1522_vm6, %v3654_v53, -inf }
0x144e   :  { %3665 = vmax.xlane.f32.xlu1 %v3664_v58 }
0x144f   :  { %v3661_v59 = vsel %vm1522_vm6, %v3653_v57, -inf }
0x1450   :  { %3662 = vmax.xlane.f32.xlu0 %v3661_v59 }
0x14cb   :  { %v3400_v60 = vpop.xlane.xlu1 %3399 }
0x14cc   :  { %v3408_v61 = vsub.f32 %v3392_v32, %v3400_v60 }
0x14cd   :  { %v3397_v62 = vpop.xlane.xlu0 %3396 }
0x14ce   :  { %v3413_v63 = vmul.f32 1.442695, %v3408_v61  ;;  %v3407_v0 = vsub.f32 %v3391_v33, %v3397_v62 }
0x14cf   :  { %v3406_v1 = vpop.xlane.xlu1 %3405 }
0x14d0   :  { %6419 = vpow2.f32 %v3413_v63  ;;  %v3411_v2 = vmul.f32 1.442695, %v3407_v0  ;;  %v3410_v3 = vsub.f32 %v3394_v36, %v3406_v1 }
0x14d1   :  { %v3403_v4 = vpop.xlane.xlu0 %3402 }
0x14d2   :  { %6421 = vpow2.f32 %v3411_v2  ;;  %v3417_v6 = vmul.f32 1.442695, %v3410_v3  ;;  %v3409_v7 = vsub.f32 %v3393_v42, %v3403_v4 }
0x14d3   :  { %v3660_v8 = vpop.xlane.xlu1 %3659 }
0x14d4   :  { %6423 = vpow2.f32 %v3417_v6  ;;  %v3415_v10 = vmul.f32 1.442695, %v3409_v7  ;;  %v3668_v11 = vsub.f32 %v3652_v46, %v3660_v8 }
0x14d5   :  { %v3657_v14 = vpop.xlane.xlu0 %3656 }
0x14d6   :  { %6425 = vpow2.f32 %v3415_v10  ;;  %v3673_v15 = vmul.f32 1.442695, %v3668_v11  ;;  %v3667_v16 = vsub.f32 %v3651_v50, %v3657_v14  ;;  %v3809_v10 = vld [vmem:[#allocation2 + $0x4a0] sm:$0xff]  ;;  %v3808_v11 = vld [vmem:[#allocation2 + $0x498] sm:$0xff]  ;;  %v3807_v14 = vld [vmem:[#allocation2 + $0x490] sm:$0xff] }
0x14d7   :  { %v3666_v19 = vpop.xlane.xlu1 %3665 }
0x14d8   :  { %6427 = vpow2.f32 %v3673_v15  ;;  %v3671_v23 = vmul.f32 1.442695, %v3667_v16  ;;  %v3670_v24 = vsub.f32 %v3654_v53, %v3666_v19 }
0x14d9   :  { %v3663_v26 = vpop.xlane.xlu0 %3662 }
0x14da   :  { %6429 = vpow2.f32 %v3671_v23  ;;  %v3677_v27 = vmul.f32 1.442695, %v3670_v24  ;;  %v3669_v28 = vsub.f32 %v3653_v57, %v3663_v26 }
0x14dc   :  { %6431 = vpow2.f32 %v3677_v27  ;;  %v3675_v18 = vmul.f32 1.442695, %v3669_v28 }
0x14dd   :  { %v6420_v34 = vpop.eup %6419 }
0x14de   :  { %6433 = vpow2.f32 %v3675_v18  ;;  %v3422_v30 = vsel %vm1522_vm6, %v6420_v34, 0.0 }
0x14df   :  { %v6422_v31 = vpop.eup %6421  ;;  %3423 = vadd.xlane.f32.xlu1 %v3422_v30 }
0x14e0   :  { %v3419_v20 = vsel %vm1522_vm6, %v6422_v31, 0.0 }
0x14e1   :  { %v6424_v25 = vpop.eup %6423  ;;  %3420 = vadd.xlane.f32.xlu0 %v3419_v20 }
0x14e2   :  { %v3428_v32 = vsel %vm1522_vm6, %v6424_v25, 0.0 }
0x14e3   :  { %v6426_v37 = vpop.eup %6425  ;;  %3429 = vadd.xlane.f32.xlu1 %v3428_v32 }
0x14e4   :  { %v3425_v33 = vsel %vm1522_vm6, %v6426_v37, 0.0 }
0x14e5   :  { %v6428_v35 = vpop.eup %6427  ;;  %3426 = vadd.xlane.f32.xlu0 %v3425_v33 }
0x14e6   :  { %v3682_v54 = vsel %vm1522_vm6, %v6428_v35, 0.0 }
0x14e7   :  { %v6430_v36 = vpop.eup %6429  ;;  %3683 = vadd.xlane.f32.xlu1 %v3682_v54 }
0x14e8   :  { %v3679_v40 = vsel %vm1522_vm6, %v6430_v36, 0.0 }
0x14e9   :  { %v6432_v41 = vpop.eup %6431  ;;  %3680 = vadd.xlane.f32.xlu0 %v3679_v40 }
0x14ea   :  { %v3688_v42 = vsel %vm1522_vm6, %v6432_v41, 0.0 }
0x14eb   :  { %v6434_v44 = vpop.eup %6433  ;;  %3689 = vadd.xlane.f32.xlu1 %v3688_v42 }
0x14ec   :  { %v3685_v45 = vsel %vm1522_vm6, %v6434_v44, 0.0 }
0x14ed   :  { %3686 = vadd.xlane.f32.xlu0 %v3685_v45 }
0x1568   :  { %v3424_v46 = vpop.xlane.xlu1 %3423 }
0x1569   :  { %6435 = vrcp.f32 %v3424_v46 }
0x156a   :  { %v3421_v47 = vpop.xlane.xlu0 %3420 }
0x156b   :  { %6437 = vrcp.f32 %v3421_v47 }
0x156c   :  { %v3430_v49 = vpop.xlane.xlu1 %3429 }
0x156d   :  { %6439 = vrcp.f32 %v3430_v49 }
0x156e   :  { %v3427_v50 = vpop.xlane.xlu0 %3426 }
0x156f   :  { %6441 = vrcp.f32 %v3427_v50 }
0x1570   :  { %v3684_v51 = vpop.xlane.xlu1 %3683 }
0x1571   :  { %6443 = vrcp.f32 %v3684_v51  ;;  %v5370_v51 = vld [vmem:[#allocation2 + $0x4b0] ss:$0 sm:$0xff] }
0x1572   :  { %v3681_v52 = vpop.xlane.xlu0 %3680 }
0x1573   :  { %6445 = vrcp.f32 %v3681_v52 }
0x1574   :  { %v3690_v53 = vpop.xlane.xlu1 %3689 }
0x1575   :  { %6447 = vrcp.f32 %v3690_v53 }
0x1576   :  { %v3687_v55 = vpop.xlane.xlu0 %3686  ;;  %v6436_v56 = vpop.eup %6435 }
0x1577   :  { %6449 = vrcp.f32 %v3687_v55  ;;  %v3436_v59 = vmul.f32 %v6436_v56, %v6420_v34 }
0x1578   :  { %v6438_v57 = vpop.eup %6437 }
0x1579   :  { %v3435_v58 = vmul.f32 %v6438_v57, %v6422_v31 }
0x157a   :  { %v6440_v60 = vpop.eup %6439 }
0x157b   :  { %6065 = vmatprep.mubr.msk.f32.mxu0 %vm1522_vm6, %v3435_v58  ;;  %v3438_v63 = vmul.f32 %v6440_v60, %v6424_v25 }
0x157c   :  { %v6442_v61 = vpop.eup %6441  ;;  %6066 = vmatmul.mubr.msk.f32.vlgmr.msra.gmra.mxu0 %vm1522_vm6, %v3436_v59 }
0x157d   :  { %6080 = vmatpush3.msra.mxu0 %v6903_v13  ;;  %v3437_v62 = vmul.f32 %v6442_v61, %v6426_v37  ;;  %v3810_v13 = vld [vmem:[#allocation2 + $0x4a8] sm:$0xff] }
0x157e   :  { %v6444_v0 = vpop.eup %6443  ;;  %6087 = vmatprep.subr.mxu1 %v3810_v13 }
0x157f   :  { %6068 = vmatprep.mubr.msk.f32.mxu0 %vm1522_vm6, %v3437_v62  ;;  %v3696_v3 = vmul.f32 %v6444_v0, %v6428_v35  ;;  %6088 = vmatpush3.msra.mxu1 %v3810_v13 }
0x1580   :  { %v6446_v1 = vpop.eup %6445  ;;  %6069 = vmatmul.mubr.msk.f32.gmra.mxu0 %vm1522_vm6, %v3438_v63  ;;  %6089 = vmatprep.subr.mxu1 %v3809_v10 }
0x1581   :  { %v3695_v2 = vmul.f32 %v6446_v1, %v6430_v36  ;;  %6090 = vmatpush3.msra.mxu1 %v3809_v10 }
0x1582   :  { %v6448_v4 = vpop.eup %6447  ;;  %6091 = vmatprep.subr.mxu1 %v3808_v11 }
0x1583   :  { %6081 = vmatprep.mubr.msk.f32.mxu0 %vm1522_vm6, %v3695_v2  ;;  %v3698_v8 = vmul.f32 %v6448_v4, %v6432_v41  ;;  %6092 = vmatpush3.msra.mxu1 %v3808_v11  ;;  %v3944_v2 = vld [vmem:[#allocation2 + $0x4e0] sm:$0xff]  ;;  %v3942_v4 = vld [vmem:[#allocation2 + $0x4d0] sm:$0xff] }
0x1584   :  { %v6450_v6 = vpop.eup %6449  ;;  %6082 = vmatmul.mubr.msk.f32.vlgmr.msra.gmra.mxu0 %vm1522_vm6, %v3696_v3  ;;  %6093 = vmatprep.subr.mxu1 %v3807_v14  ;;  %v3943_v3 = vld [vmem:[#allocation2 + $0x4d8] sm:$0xff] }
0x1585   :  { %v3697_v7 = vmul.f32 %v6450_v6, %v6434_v44  ;;  %6094 = vmatpush3.msra.mxu1 %v3807_v14  ;;  %6098 = vmatprep.subr.mxu0 %v3944_v2  ;;  %v3941_v6 = vld [vmem:[#allocation2 + $0x4c8] sm:$0xff] }
0x1586   :  { %6099 = vmatpush3.msra.mxu0 %v3944_v2  ;;  %v4355_v2 = vld [vmem:[#allocation2 + $0x200] sm:$0xff] }
0x1587   :  { %6084 = vmatprep.mubr.msk.f32.mxu0 %vm1522_vm6, %v3697_v7  ;;  %6100 = vmatprep.subr.mxu0 %v3943_v3  ;;  %v4134_v7 = vld [vmem:[#allocation2 + $0x1c8] sm:$0xff] }
0x1588   :  { %6085 = vmatmul.mubr.msk.f32.gmra.mxu0 %vm1522_vm6, %v3698_v8 }
0x1589   :  { %6101 = vmatpush3.msra.mxu0 %v3943_v3 }
0x158a   :  { %6102 = vmatprep.subr.mxu0 %v3942_v4 }
0x158b   :  { %6103 = vmatpush3.msra.mxu0 %v3942_v4 }
0x158c   :  { %6104 = vmatprep.subr.mxu0 %v3941_v6 }
0x158d   :  { %6105 = vmatpush3.msra.mxu0 %v3941_v6 }
0x158e   :  { %6128 = vmatprep.subr.mxu0 %v4134_v7 }
0x163c   :  { %v6067_v15 = vpop.f32.mrf.mxu0 }
0x163d   :  { %v3537_v19 = vmul.f32 %v6067_v15, %v6793_v39 }
0x163e   :  { %v3517_v16 = vpop.f32.mrf.mxu0 }
0x163f   :  { %v3536_v23 = vmul.f32 %v3517_v16, %v6791_v38  ;;  %v3541_v28 = vsel %vm194_vm2, %v3537_v19, 0.0  ;;  %v5371_v19 = vld [vmem:[#allocation2 + $0x4b8] ss:$0 sm:$0xff] }
0x1640   :  { %v6070_v24 = vpop.f32.mrf.mxu0 }
0x1641   :  { %v3540_v26 = vsel %vm194_vm2, %v3536_v23, 0.0  ;;  %v3539_v18 = vmul.f32 %v6070_v24, %v6805_v48 }
0x1642   :  { %v3527_v27 = vpop.f32.mrf.mxu0  ;;  %v3542_v30 = vadd.f32 %v3541_v28, %v3540_v26  ;;  %v5372_v28 = vld [vmem:[#allocation2 + $0x4c0] ss:$0 sm:$0xff] }
0x1643   :  { %v3538_v34 = vmul.f32 %v3527_v27, %v6798_v43  ;;  %v3545_v37 = vsel %vm194_vm2, %v3539_v18, 0.0 }
0x1644   :  { %v6083_v31 = vpop.f32.mrf.mxu0 }
0x1645   :  { %v3543_v20 = vsel %vm194_vm2, %v3538_v34, 0.0  ;;  %v3797_v33 = vmul.f32 %v6083_v31, %v6793_v39  ;;  %v4133_v31 = vld [vmem:[#allocation2 + $0x1c0] sm:$0xff] }
0x1646   :  { %v3544_v25 = vadd.f32 %v3543_v20, %v3542_v30  ;;  %v3777_v32 = vpop.f32.mrf.mxu0  ;;  %v4132_v20 = vld [vmem:[#allocation2 + $0x1b8] sm:$0xff] }
0x1647   :  { %v3796_v35 = vmul.f32 %v3777_v32, %v6791_v38  ;;  %v3801_v42 = vsel %vm194_vm2, %v3797_v33, 0.0  ;;  %v6523_v32 = vld [vmem:[#allocation2 + $0x80] ss:$0 sm:$0xff] }
0x1648   :  { %v3546_v54 = vadd.f32 %v3545_v37, %v3544_v25  ;;  %v6086_v36 = vpop.f32.mrf.mxu0  ;;  %v4131_v25 = vld [vmem:[#allocation2 + $0x1b0] sm:$0xff]  ;;  %v624_v37 = vadd.f32 %v6523_v32, %v6700_v22  ;;  %v4039_v33 = vld [vmem:[#allocation2 + $0x520] sm:$0xff]  ;;  %v4036_v22 = vld [vmem:[#allocation2 + $0x508] sm:$0xff] }
0x1649   :  { %v3800_v40 = vsel %vm194_vm2, %v3796_v35, 0.0  ;;  %v3799_v44 = vmul.f32 %v6086_v36, %v6805_v48  ;;  %v4038_v35 = vld [vmem:[#allocation2 + $0x518] sm:$0xff] }
0x164a   :  { %v3787_v41 = vpop.f32.mrf.mxu0  ;;  %6095 = vmatprep.mubr.msk.f32.mxu1 %vm194_vm2, %v3546_v54  ;;  %v3802_v46 = vadd.f32 %v3801_v42, %v3800_v40  ;;  %v4037_v54 = vld [vmem:[#allocation2 + $0x510] sm:$0xff]  ;;  %v4034_v36 = vld [vmem:[#allocation2 + $0x4f8] sm:$0xff]  ;;  %v4242_v42 = vld [vmem:[#allocation2 + $0x1e0] sm:$0xff] }
0x164b   :  { %v3798_v45 = vmul.f32 %v3787_v41, %v6798_v43  ;;  %v3805_v39 = vsel %vm194_vm2, %v3799_v44, 0.0  ;;  %v4244_v40 = vld [vmem:[#allocation2 + $0x1f0] sm:$0xff]  ;;  %v4243_v41 = vld [vmem:[#allocation2 + $0x1e8] sm:$0xff]  ;;  %v4241_v44 = vld [vmem:[#allocation2 + $0x1d8] sm:$0xff] }
0x164c   :  { %v4471_v32 = vld [vmem:[#allocation2 + $0x238] sm:$0xff] }
0x164d   :  { %v3803_v47 = vsel %vm194_vm2, %v3798_v45, 0.0  ;;  %v4358_v45 = vld [vmem:[#allocation2 + $0x218] sm:$0xff] }
0x164e   :  { %v3804_v49 = vadd.f32 %v3803_v47, %v3802_v46  ;;  %v5373_v46 = vld [vmem:[#allocation2 + $0x4e8] ss:$0 sm:$0xff] }
0x1650   :  { %v3806_v38 = vadd.f32 %v3805_v39, %v3804_v49 }
0x1652   :  { %6096 = vmatmul.mubr.msk.f32.vlgmr.msra.gmra.mxu1 %vm194_vm2, %v3806_v38 }
0x1712   :  { %v6097_v50 = vpop.f32.mrf.mxu1 }
0x1713   :  { %v3893_v52 = vadd.f32 %v6097_v50, %v6884_v17  ;;  %v5379_v50 = vld [vmem:[#allocation2 + $0x1d0] ss:$0 sm:$0xff] }
0x1714   :  { %v3883_v53 = vpop.f32.mrf.mxu1 }
0x1715   :  { %v6970_v55 = vadd.f32 %v5370_v51, %v3893_v52  ;;  %v3892_v48 = vadd.f32 %v3883_v53, %v6887_v21 }
0x1717   :  { %v6973_v56 = vadd.f32 %v5370_v51, %v3892_v48  ;;  %v3906_v43 = vsel %vm194_vm2, %v6970_v55, 0.0 }
0x1718   :  { %3907 = vadd.xlane.f32.xlu1 %v3906_v43 }
0x1719   :  { %v3903_v57 = vsel %vm194_vm2, %v6973_v56, 0.0 }
0x171a   :  { %3904 = vadd.xlane.f32.xlu0 %v3903_v57 }
0x17a1   :  { %v3908_v58 = vpop.xlane.xlu1 %3907 }
0x17a2   :  { %v3910_v59 = vmul.f32 0.03125, %v3908_v58 }
0x17a3   :  { %v3905_v60 = vpop.xlane.xlu0 %3904 }
0x17a4   :  { %v3912_v17 = vsub.f32 %v6970_v55, %v3910_v59  ;;  %v3909_v61 = vmul.f32 0.03125, %v3905_v60 }
0x17a6   :  { %v3911_v62 = vsub.f32 %v6973_v56, %v3909_v61  ;;  %v3914_v63 = vmul.f32 %v3912_v17, %v3912_v17 }
0x17a8   :  { %v3918_v21 = vsel %vm194_vm2, %v3914_v63, 0.0  ;;  %v3913_v0 = vmul.f32 %v3911_v62, %v3911_v62 }
0x17a9   :  { %3919 = vadd.xlane.f32.xlu1 %v3918_v21 }
0x17aa   :  { %v3915_v1 = vsel %vm194_vm2, %v3913_v0, 0.0  ;;  %v4357_v0 = vld [vmem:[#allocation2 + $0x210] sm:$0xff] }
0x17ab   :  { %3916 = vadd.xlane.f32.xlu0 %v3915_v1  ;;  %v4356_v1 = vld [vmem:[#allocation2 + $0x208] sm:$0xff] }
0x1832   :  { %v3920_v8 = vpop.xlane.xlu1 %3919 }
0x1833   :  { %v3922_v13 = vmul.f32 0.03125, %v3920_v8 }
0x1834   :  { %v3917_v10 = vpop.xlane.xlu0 %3916 }
0x1835   :  { %v3924_v11 = vadd.f32 1e-05, %v3922_v13  ;;  %v3921_v14 = vmul.f32 0.03125, %v3917_v10  ;;  %v5384_v13 = vld [vmem:[#allocation2 + $0x1f8] ss:$0 sm:$0xff] }
0x1837   :  { %6451 = vrsqrt.f32 %v3924_v11  ;;  %v3923_v15 = vadd.f32 1e-05, %v3921_v14 }
0x1839   :  { %6453 = vrsqrt.f32 %v3923_v15 }
0x1844   :  { %v6452_v16 = vpop.eup %6451 }
0x1845   :  { %v3928_v23 = vmul.f32 %v6452_v16, %v3912_v17 }
0x1846   :  { %v6454_v24 = vpop.eup %6453 }
0x1847   :  { %v3927_v26 = vmul.f32 %v6454_v24, %v3911_v62  ;;  %v3934_v27 = vmul.f32 %v5371_v19, %v3928_v23 }
0x1849   :  { %v3933_v18 = vmul.f32 %v5371_v19, %v3927_v26  ;;  %v3940_v30 = vadd.f32 %v5372_v28, %v3934_v27 }
0x184b   :  { %v3939_v34 = vadd.f32 %v5372_v28, %v3933_v18 }
0x184d   :  { %6106 = vmatprep.mubr.msk.f32.mxu0 %vm194_vm2, %v3939_v34 }
0x184e   :  { %6107 = vmatmul.mubr.msk.f32.vlgmr.msra.gmra.mxu0 %vm194_vm2, %v3940_v30 }
0x184f   :  { %6129 = vmatpush3.msra.mxu0 %v4134_v7  ;;  %6136 = vmatprep.mubr.msk.f32.mxu0 %vm194_vm2, %v6691_v9  ;;  %v4040_v9 = vld [vmem:[#allocation2 + $0x528] sm:$0xff]  ;;  %v5378_v7 = vld [vmem:[#allocation2 + $0x530] ss:$0 sm:$0xff] }
0x1850   :  { %6130 = vmatprep.subr.mxu0 %v4133_v31  ;;  %6109 = vmatprep.subr.mxu1 %v4040_v9 }
0x1851   :  { %6131 = vmatpush3.msra.mxu0 %v4133_v31  ;;  %6110 = vmatpush3.msra.mxu1 %v4040_v9  ;;  %v4469_v9 = vld [vmem:[#allocation2 + $0x228] sm:$0xff] }
0x1852   :  { %6132 = vmatprep.subr.mxu0 %v4132_v20  ;;  %6111 = vmatprep.subr.mxu1 %v4039_v33 }
0x1853   :  { %6133 = vmatpush3.msra.mxu0 %v4132_v20  ;;  %6112 = vmatpush3.msra.mxu1 %v4039_v33  ;;  %v5389_v33 = vld [vmem:[#allocation2 + $0x220] ss:$0 sm:$0xff] }
0x1854   :  { %6134 = vmatprep.subr.mxu0 %v4131_v25  ;;  %6113 = vmatprep.subr.mxu1 %v4038_v35 }
0x1855   :  { %6135 = vmatpush3.msra.mxu0 %v4131_v25  ;;  %6114 = vmatpush3.msra.mxu1 %v4038_v35 }
0x1856   :  { %6137 = vmatmul.mubr.msk.f32.vlgmr.msra.gmra.mxu0 %vm194_vm2, %v6688_v5  ;;  %6115 = vmatprep.subr.mxu1 %v4037_v54  ;;  %v4035_v5 = vld [vmem:[#allocation2 + $0x500] sm:$0xff] }
0x1857   :  { %6139 = vmatprep.mubr.msk.f32.mxu0 %vm194_vm2, %v624_v37  ;;  %6116 = vmatpush3.msra.mxu1 %v4037_v54  ;;  %v4470_v37 = vld [vmem:[#allocation2 + $0x230] sm:$0xff] }
0x1858   :  { %6117 = vmatprep.subr.mxu1 %v4036_v22  ;;  %6142 = vmatprep.subr.mxu0 %v4244_v40 }
0x1859   :  { %6118 = vmatpush3.msra.mxu1 %v4036_v22  ;;  %6143 = vmatpush3.msra.mxu0 %v4244_v40 }
0x185a   :  { %6140 = vmatmul.mubr.msk.f32.gmra.mxu0 %vm194_vm2, %v6694_v12  ;;  %6119 = vmatprep.subr.mxu1 %v4035_v5  ;;  %v4033_v12 = vld [vmem:[#allocation2 + $0x4f0] sm:$0xff] }
0x185b   :  { %6120 = vmatpush3.msra.mxu1 %v4035_v5  ;;  %6144 = vmatprep.subr.mxu0 %v4243_v41 }
0x185c   :  { %6121 = vmatprep.subr.mxu1 %v4034_v36  ;;  %6145 = vmatpush3.msra.mxu0 %v4243_v41 }
0x185d   :  { %6122 = vmatpush3.msra.mxu1 %v4034_v36  ;;  %6146 = vmatprep.subr.mxu0 %v4242_v42 }
0x185e   :  { %6123 = vmatprep.subr.mxu1 %v4033_v12  ;;  %6147 = vmatpush3.msra.mxu0 %v4242_v42 }
0x185f   :  { %6124 = vmatpush3.msra.mxu1 %v4033_v12  ;;  %6148 = vmatprep.subr.mxu0 %v4241_v44 }
0x1860   :  { %6149 = vmatpush3.msra.mxu0 %v4241_v44  ;;  %6156 = vmatprep.subr.mxu1 %v4358_v45 }
0x190e   :  { %v6108_v47 = vpop.f32.mrf.mxu0 }
0x190f   :  { %v4028_v49 = vadd.f32 %v6108_v47, %v5373_v46 }
0x1910   :  { %v4022_v39 = vpop.f32.mrf.mxu0 }
0x1911   :  { %v4023_v38 = vadd.f32 %v5373_v46, %v4022_v39 }
0x1913   :  { %6455 = vtanh.f32 %v4023_v38 }
0x1914   :  { %6457 = vtanh.f32 %v4028_v49 }
0x1916   :  { %v6138_v51 = vpop.f32.mrf.mxu0 }
0x1917   :  { %v4224_v52 = vadd.f32 %v6138_v51, %v5379_v50 }
0x1918   :  { %v4218_v53 = vpop.f32.mrf.mxu0 }
0x1919   :  { %v4219_v48 = vadd.f32 %v5379_v50, %v4218_v53 }
0x191a   :  { %v6141_v43 = vpop.f32.mrf.mxu0 }
0x191b   :  { %6459 = vtanh.f32 %v4219_v48  ;;  %v4234_v57 = vadd.f32 %v6141_v43, %v5379_v50 }
0x191c   :  { %6461 = vtanh.f32 %v4224_v52  ;;  %v4228_v58 = vpop.f32.mrf.mxu0 }
0x191d   :  { %v4229_v59 = vadd.f32 %v5379_v50, %v4228_v58  ;;  %v5394_v50 = vld [vmem:[#allocation2 + $0x248] ss:$0 sm:$0xff] }
0x191f   :  { %6463 = vtanh.f32 %v4229_v59 }
0x1920   :  { %v6456_v60 = vpop.eup %6455  ;;  %6465 = vtanh.f32 %v4234_v57 }
0x1921   :  { %v6458_v17 = vpop.eup %6457  ;;  %6125 = vmatprep.mubr.msk.f32.mxu1 %vm2898_vm11, %v6456_v60 }
0x1922   :  { %6126 = vmatmul.mubr.msk.f32.vlgmr.msra.gmra.mxu1 %vm2898_vm11, %v6458_v17 }
0x1923   :  { %6157 = vmatpush3.msra.mxu1 %v4358_v45 }
0x1924   :  { %6158 = vmatprep.subr.mxu1 %v4357_v0 }
0x1925   :  { %6159 = vmatpush3.msra.mxu1 %v4357_v0 }
0x1926   :  { %6160 = vmatprep.subr.mxu1 %v4356_v1 }
0x1927   :  { %6161 = vmatpush3.msra.mxu1 %v4356_v1 }
0x1928   :  { %v6460_v61 = vpop.eup %6459  ;;  %6162 = vmatprep.subr.mxu1 %v4355_v2 }
0x1929   :  { %v6462_v62 = vpop.eup %6461  ;;  %6150 = vmatprep.mubr.msk.f32.mxu0 %vm194_vm2, %v6460_v61  ;;  %6163 = vmatpush3.msra.mxu1 %v4355_v2 }
0x192a   :  { %6151 = vmatmul.mubr.msk.f32.vlgmr.msra.gmra.mxu0 %vm194_vm2, %v6462_v62 }
0x192c   :  { %v6464_v63 = vpop.eup %6463 }
0x192d   :  { %v6466_v21 = vpop.eup %6465  ;;  %6153 = vmatprep.mubr.msk.f32.mxu0 %vm194_vm2, %v6464_v63 }
0x192e   :  { %6154 = vmatmul.mubr.msk.f32.gmra.mxu0 %vm194_vm2, %v6466_v21 }
0x19e2   :  { %v6127_v3 = vpop.f32.mrf.mxu1 }
0x19e4   :  { %v4113_v4 = vpop.f32.mrf.mxu1 }
0x19e5   :  { %v4122_v6 = vadd.f32 %v4113_v4, %v6973_v56  ;;  %v4123_v56 = vadd.f32 %v6127_v3, %v6970_v55  ;;  %v4472_v55 = vld [vmem:[#allocation2 + $0x240] sm:$0xff] }
0x19e6   :  { %6170 = vmatprep.subr.mxu0 %v4472_v55 }
0x19e7   :  { %v4129_v8 = vadd.f32 %v5378_v7, %v4122_v6  ;;  %v7002_v31 = vadd.f32 %v5378_v7, %v4123_v56  ;;  %6171 = vmatpush3.msra.mxu0 %v4472_v55  ;;  %v4783_v56 = vld [vmem:[#allocation2 + $0x260] sm:$0xff] }
0x19e8   :  { %6172 = vmatprep.subr.mxu0 %v4471_v32 }
0x19e9   :  { %6184 = vmatprep.subr.mxu1 %v4129_v8  ;;  %6173 = vmatpush3.msra.mxu0 %v4471_v32 }
0x19ea   :  { %v6152_v10 = vpop.f32.mrf.mxu0  ;;  %6174 = vmatprep.subr.mxu0 %v4470_v37 }
0x19eb   :  { %v4334_v11 = vadd.f32 %v6152_v10, %v5384_v13  ;;  %6175 = vmatpush3.msra.mxu0 %v4470_v37 }
0x19ec   :  { %v4328_v14 = vpop.f32.mrf.mxu0  ;;  %6176 = vmatprep.subr.mxu0 %v4469_v9 }
0x19ed   :  { %v4329_v15 = vadd.f32 %v5384_v13, %v4328_v14  ;;  %6467 = vtanh.f32 %v4334_v11  ;;  %6177 = vmatpush3.msra.mxu0 %v4469_v9 }
0x19ee   :  { %v6155_v16 = vpop.f32.mrf.mxu0 }
0x19ef   :  { %6469 = vtanh.f32 %v4329_v15  ;;  %v4344_v19 = vadd.f32 %v6155_v16, %v5384_v13 }
0x19f0   :  { %v4338_v23 = vpop.f32.mrf.mxu0 }
0x19f1   :  { %v4339_v24 = vadd.f32 %v5384_v13, %v4338_v23  ;;  %6471 = vtanh.f32 %v4344_v19 }
0x19f3   :  { %6473 = vtanh.f32 %v4339_v24 }
0x19fa   :  { %v6468_v26 = vpop.eup %6467 }
0x19fb   :  { %v4352_v18 = vadd.f32 %v6468_v26, %v6462_v62 }
0x19fc   :  { %v6470_v27 = vpop.eup %6469 }
0x19fd   :  { %v4351_v28 = vadd.f32 %v6470_v27, %v6460_v61  ;;  %v4784_v27 = vld [vmem:[#allocation2 + $0x268] sm:$0xff] }
0x19fe   :  { %v6472_v34 = vpop.eup %6471  ;;  %6194 = vmatprep.subr.mxu0 %v4784_v27 }
0x19ff   :  { %6164 = vmatprep.mubr.msk.f32.mxu1 %vm194_vm2, %v4351_v28  ;;  %v4354_v25 = vadd.f32 %v6472_v34, %v6466_v21 }
0x1a00   :  { %v6474_v30 = vpop.eup %6473  ;;  %6165 = vmatmul.mubr.msk.f32.vlgmr.msra.gmra.mxu1 %vm194_vm2, %v4352_v18 }
0x1a01   :  { %6185 = vmatpush3.msra.mxu1 %v4129_v8  ;;  %v4353_v20 = vadd.f32 %v6474_v30, %v6464_v63 }
0x1a02   :  { %6189 = vmatprep.subr.mxu1 %v7002_v31 }
0x1a03   :  { %6167 = vmatprep.mubr.msk.f32.mxu1 %vm194_vm2, %v4353_v20 }
0x1a04   :  { %6168 = vmatmul.mubr.msk.f32.gmra.mxu1 %vm194_vm2, %v4354_v25 }
0x1ac0   :  { %v6166_v35 = vpop.f32.mrf.mxu1 }
0x1ac1   :  { %v4448_v54 = vadd.f32 %v6166_v35, %v5389_v33 }
0x1ac2   :  { %v4442_v22 = vpop.f32.mrf.mxu1 }
0x1ac3   :  { %v4443_v5 = vadd.f32 %v5389_v33, %v4442_v22  ;;  %6475 = vtanh.f32 %v4448_v54  ;;  %v4782_v54 = vld [vmem:[#allocation2 + $0x258] sm:$0xff]  ;;  %v4781_v22 = vld [vmem:[#allocation2 + $0x250] sm:$0xff] }
0x1ac4   :  { %v6169_v36 = vpop.f32.mrf.mxu1 }
0x1ac5   :  { %6477 = vtanh.f32 %v4443_v5  ;;  %v4458_v12 = vadd.f32 %v6169_v36, %v5389_v33 }
0x1ac6   :  { %v4452_v40 = vpop.f32.mrf.mxu1 }
0x1ac7   :  { %v4453_v41 = vadd.f32 %v5389_v33, %v4452_v40  ;;  %6479 = vtanh.f32 %v4458_v12  ;;  %v4894_v40 = vld [vmem:[#allocation2 + $0x290] sm:$0xff] }
0x1ac9   :  { %6481 = vtanh.f32 %v4453_v41  ;;  %v4893_v41 = vld [vmem:[#allocation2 + $0x288] sm:$0xff] }
0x1ad0   :  { %v6476_v42 = vpop.eup %6475 }
0x1ad1   :  { %v4466_v46 = vadd.f32 %v6476_v42, %v4352_v18  ;;  %v4892_v42 = vld [vmem:[#allocation2 + $0x280] sm:$0xff] }
0x1ad2   :  { %v6478_v44 = vpop.eup %6477 }
0x1ad3   :  { %v4465_v45 = vadd.f32 %v6478_v44, %v4351_v28  ;;  %v4891_v44 = vld [vmem:[#allocation2 + $0x278] sm:$0xff] }
0x1ad4   :  { %v6480_v47 = vpop.eup %6479 }
0x1ad5   :  { %6178 = vmatprep.mubr.msk.f32.mxu0 %vm194_vm2, %v4465_v45  ;;  %v4468_v38 = vadd.f32 %v6480_v47, %v4354_v25  ;;  %v5403_v45 = vld [vmem:[#allocation2 + $0x270] ss:$0 sm:$0xff] }
0x1ad6   :  { %v6482_v49 = vpop.eup %6481  ;;  %6179 = vmatmul.mubr.msk.f32.vlgmr.msra.gmra.mxu0 %vm194_vm2, %v4466_v46 }
0x1ad7   :  { %v4467_v39 = vadd.f32 %v6482_v49, %v4353_v20  ;;  %6195 = vmatpush3.msra.mxu0 %v4784_v27 }
0x1ad8   :  { %6196 = vmatprep.subr.mxu0 %v4783_v56 }
0x1ad9   :  { %6181 = vmatprep.mubr.msk.f32.mxu0 %vm194_vm2, %v4467_v39  ;;  %6197 = vmatpush3.msra.mxu0 %v4783_v56 }
0x1ada   :  { %6182 = vmatmul.mubr.msk.f32.gmra.mxu0 %vm194_vm2, %v4468_v38  ;;  %6198 = vmatprep.subr.mxu0 %v4782_v54 }
0x1adb   :  { %6199 = vmatpush3.msra.mxu0 %v4782_v54  ;;  %v5119_v54 = vld [vmem:[#allocation2 + $0x2c8] sm:$0x1] }
0x1adc   :  { %6200 = vmatprep.subr.mxu0 %v4781_v22 }
0x1add   :  { %6201 = vmatpush3.msra.mxu0 %v4781_v22 }
0x1b96   :  { %v6180_v51 = vpop.f32.mrf.mxu0 }
0x1b97   :  { %v4562_v52 = vadd.f32 %v6180_v51, %v5394_v50 }
0x1b98   :  { %v4556_v53 = vpop.f32.mrf.mxu0 }
0x1b99   :  { %v4557_v48 = vadd.f32 %v5394_v50, %v4556_v53  ;;  %v4578_v43 = vsel %vm1522_vm6, %v4562_v52, -inf }
0x1b9a   :  { %4579 = vmax.xlane.f32.xlu1 %v4578_v43  ;;  %v6183_v57 = vpop.f32.mrf.mxu0 }
0x1b9b   :  { %v4572_v58 = vadd.f32 %v6183_v57, %v5394_v50  ;;  %v4575_v59 = vsel %vm1522_vm6, %v4557_v48, -inf }
0x1b9c   :  { %v4566_v60 = vpop.f32.mrf.mxu0  ;;  %4576 = vmax.xlane.f32.xlu0 %v4575_v59  ;;  %v5007_v59 = vld [vmem:[#allocation2 + $0x2b0] sm:$0xff] }
0x1b9d   :  { %v4567_v17 = vadd.f32 %v5394_v50, %v4566_v60  ;;  %v4584_v61 = vsel %vm1522_vm6, %v4572_v58, -inf  ;;  %v5006_v60 = vld [vmem:[#allocation2 + $0x2a8] sm:$0xff] }
0x1b9e   :  { %4585 = vmax.xlane.f32.xlu1 %v4584_v61  ;;  %v5408_v61 = vld [vmem:[#allocation2 + $0x298] ss:$0 sm:$0xff] }
0x1b9f   :  { %v4581_v62 = vsel %vm1522_vm6, %v4567_v17, -inf }
0x1ba0   :  { %4582 = vmax.xlane.f32.xlu0 %v4581_v62 }
0x1c23   :  { %v4580_v63 = vpop.xlane.xlu1 %4579 }
0x1c24   :  { %v4588_v21 = vsub.f32 %v4562_v52, %v4580_v63 }
0x1c25   :  { %v4577_v0 = vpop.xlane.xlu0 %4576 }
0x1c26   :  { %v4593_v1 = vmul.f32 1.442695, %v4588_v21  ;;  %v4587_v2 = vsub.f32 %v4557_v48, %v4577_v0 }
0x1c27   :  { %v4586_v3 = vpop.xlane.xlu1 %4585 }
0x1c28   :  { %6483 = vpow2.f32 %v4593_v1  ;;  %v4591_v4 = vmul.f32 1.442695, %v4587_v2  ;;  %v4590_v6 = vsub.f32 %v4572_v58, %v4586_v3  ;;  %v5008_v58 = vld [vmem:[#allocation2 + $0x2b8] sm:$0xff] }
0x1c29   :  { %v4583_v7 = vpop.xlane.xlu0 %4582  ;;  %6222 = vmatprep.subr.mxu0 %v5008_v58 }
0x1c2a   :  { %6485 = vpow2.f32 %v4591_v4  ;;  %v4597_v8 = vmul.f32 1.442695, %v4590_v6  ;;  %v4589_v13 = vsub.f32 %v4567_v17, %v4583_v7  ;;  %v5005_v17 = vld [vmem:[#allocation2 + $0x2a0] sm:$0xff] }
0x1c2c   :  { %6487 = vpow2.f32 %v4597_v8  ;;  %v4595_v10 = vmul.f32 1.442695, %v4589_v13 }
0x1c2e   :  { %6489 = vpow2.f32 %v4595_v10 }
0x1c35   :  { %v6484_v11 = vpop.eup %6483 }
0x1c36   :  { %v4602_v14 = vsel %vm1522_vm6, %v6484_v11, 0.0 }
0x1c37   :  { %v6486_v15 = vpop.eup %6485  ;;  %4603 = vadd.xlane.f32.xlu1 %v4602_v14 }
0x1c38   :  { %v4599_v16 = vsel %vm1522_vm6, %v6486_v15, 0.0 }
0x1c39   :  { %v6488_v19 = vpop.eup %6487  ;;  %4600 = vadd.xlane.f32.xlu0 %v4599_v16  ;;  %v5120_v16 = vld [vmem:[#allocation2 + $0x2d0] sm:$0x1] }
0x1c3a   :  { %v4608_v23 = vsel %vm1522_vm6, %v6488_v19, 0.0 }
0x1c3b   :  { %v6490_v24 = vpop.eup %6489  ;;  %4609 = vadd.xlane.f32.xlu1 %v4608_v23 }
0x1c3c   :  { %v4605_v26 = vsel %vm1522_vm6, %v6490_v24, 0.0 }
0x1c3d   :  { %4606 = vadd.xlane.f32.xlu0 %v4605_v26  ;;  %v5413_v26 = vld [vmem:[#allocation2 + $0x2c0] ss:$0 sm:$0xff] }
0x1cc0   :  { %v4604_v28 = vpop.xlane.xlu1 %4603 }
0x1cc1   :  { %6491 = vrcp.f32 %v4604_v28 }
0x1cc2   :  { %v4601_v18 = vpop.xlane.xlu0 %4600 }
0x1cc3   :  { %6493 = vrcp.f32 %v4601_v18 }
0x1cc4   :  { %v4610_v34 = vpop.xlane.xlu1 %4609 }
0x1cc5   :  { %6495 = vrcp.f32 %v4610_v34 }
0x1cc6   :  { %v4607_v30 = vpop.xlane.xlu0 %4606 }
0x1cc7   :  { %6497 = vrcp.f32 %v4607_v30 }
0x1cce   :  { %v6492_v20 = vpop.eup %6491 }
0x1ccf   :  { %v4616_v32 = vmul.f32 %v6492_v20, %v6484_v11 }
0x1cd0   :  { %v6494_v25 = vpop.eup %6493 }
0x1cd1   :  { %v4615_v55 = vmul.f32 %v6494_v25, %v6486_v15 }
0x1cd2   :  { %v6496_v37 = vpop.eup %6495 }
0x1cd3   :  { %6186 = vmatprep.mubr.msk.f32.mxu1 %vm1522_vm6, %v4615_v55  ;;  %v4618_v35 = vmul.f32 %v6496_v37, %v6488_v19  ;;  %v6552_v19 = vmov 0  }
0x1cd4   :  { %v6498_v9 = vpop.eup %6497  ;;  %6187 = vmatmul.mubr.msk.f32.vlgmr.msra.gmra.mxu1 %vm1522_vm6, %v4616_v32  ;;  %6262 = vset.pattern.permute.xlu0 %v6552_v19 }
0x1cd5   :  { %6190 = vmatpush3.msra.mxu1 %v7002_v31  ;;  %v4617_v33 = vmul.f32 %v6498_v9, %v6490_v24  ;;  %5123 = vperm.xlu0 %6262, %v5120_v16  }
0x1cd6   :  { %6208 = vmatprep.subr.mxu1 %v4894_v40 }
0x1cd7   :  { %6191 = vmatprep.mubr.msk.f32.mxu1 %vm1522_vm6, %v4617_v33 }
0x1cd8   :  { %6192 = vmatmul.mubr.msk.f32.vlgmr.msra.gmra.mxu1 %vm1522_vm6, %v4618_v35 }
0x1cd9   :  { %6209 = vmatpush3.msra.mxu1 %v4894_v40 }
0x1cda   :  { %6210 = vmatprep.subr.mxu1 %v4893_v41 }
0x1cdb   :  { %6211 = vmatpush3.msra.mxu1 %v4893_v41 }
0x1cdc   :  { %6212 = vmatprep.subr.mxu1 %v4892_v42 }
0x1cdd   :  { %6213 = vmatpush3.msra.mxu1 %v4892_v42 }
0x1cde   :  { %6214 = vmatprep.subr.mxu1 %v4891_v44 }
0x1cdf   :  { %6215 = vmatpush3.msra.mxu1 %v4891_v44 }
0x1ce0   :  { %6236 = vmatprep.subr.mxu1 %v6549_v29 }
0x1d50   :  { %v5124_v22 = vpop.permute.xlu0 %5123 }
0x1d94   :  { %v6188_v5 = vpop.f32.mrf.mxu1 }
0x1d96   :  { %v4691_v36 = vpop.f32.mrf.mxu1 }
0x1d97   :  { %6202 = vmatprep.mubr.msk.f32.mxu0 %vm194_vm2, %v4691_v36 }
0x1d98   :  { %v6193_v12 = vpop.f32.mrf.mxu1  ;;  %6203 = vmatmul.mubr.msk.f32.vlgmr.msra.gmra.mxu0 %vm194_vm2, %v6188_v5 }
0x1d99   :  { %6223 = vmatpush3.msra.mxu0 %v5008_v58 }
0x1d9a   :  { %v4772_v31 = vpop.f32.mrf.mxu1  ;;  %6224 = vmatprep.subr.mxu0 %v5007_v59 }
0x1d9b   :  { %6205 = vmatprep.mubr.msk.f32.mxu0 %vm194_vm2, %v4772_v31  ;;  %6225 = vmatpush3.msra.mxu0 %v5007_v59 }
0x1d9c   :  { %6206 = vmatmul.mubr.msk.f32.gmra.mxu0 %vm194_vm2, %v6193_v12  ;;  %6226 = vmatprep.subr.mxu0 %v5006_v60 }
0x1d9d   :  { %6227 = vmatpush3.msra.mxu0 %v5006_v60 }
0x1d9e   :  { %6228 = vmatprep.subr.mxu0 %v5005_v17 }
0x1d9f   :  { %6229 = vmatpush3.msra.mxu0 %v5005_v17 }
0x1e58   :  { %v6204_v46 = vpop.f32.mrf.mxu0 }
0x1e59   :  { %v4874_v47 = vadd.f32 %v6204_v46, %v5403_v45 }
0x1e5a   :  { %v4868_v49 = vpop.f32.mrf.mxu0 }
0x1e5b   :  { %v4869_v39 = vadd.f32 %v5403_v45, %v4868_v49 }
0x1e5c   :  { %v6207_v38 = vpop.f32.mrf.mxu0 }
0x1e5d   :  { %6499 = vtanh.f32 %v4869_v39  ;;  %v4884_v50 = vadd.f32 %v6207_v38, %v5403_v45 }
0x1e5e   :  { %6501 = vtanh.f32 %v4874_v47  ;;  %v4878_v51 = vpop.f32.mrf.mxu0 }
0x1e5f   :  { %v4879_v52 = vadd.f32 %v5403_v45, %v4878_v51 }
0x1e61   :  { %6503 = vtanh.f32 %v4879_v52 }
0x1e62   :  { %6505 = vtanh.f32 %v4884_v50 }
0x1e6a   :  { %v6500_v53 = vpop.eup %6499 }
0x1e6b   :  { %v6502_v48 = vpop.eup %6501  ;;  %6216 = vmatprep.mubr.msk.f32.mxu1 %vm194_vm2, %v6500_v53 }
0x1e6c   :  { %6217 = vmatmul.mubr.msk.f32.vlgmr.msra.gmra.mxu1 %vm194_vm2, %v6502_v48 }
0x1e6e   :  { %v6504_v43 = vpop.eup %6503 }
0x1e6f   :  { %v6506_v57 = vpop.eup %6505  ;;  %6219 = vmatprep.mubr.msk.f32.mxu1 %vm194_vm2, %v6504_v43 }
0x1e70   :  { %6220 = vmatmul.mubr.msk.f32.gmra.mxu1 %vm194_vm2, %v6506_v57 }
0x1e71   :  { %6244 = vmatprep.mubr.msk.f32.mxu1 %vm6550_vm5, %v6549_v29 }
0x1f2c   :  { %v6218_v62 = vpop.f32.mrf.mxu1 }
0x1f2d   :  { %v4984_v63 = vadd.f32 %v6218_v62, %v5408_v61 }
0x1f2e   :  { %v4978_v21 = vpop.f32.mrf.mxu1 }
0x1f2f   :  { %v4979_v0 = vadd.f32 %v5408_v61, %v4978_v21  ;;  %6507 = vtanh.f32 %v4984_v63 }
0x1f30   :  { %v6221_v1 = vpop.f32.mrf.mxu1 }
0x1f31   :  { %6509 = vtanh.f32 %v4979_v0  ;;  %v4994_v2 = vadd.f32 %v6221_v1, %v5408_v61 }
0x1f32   :  { %v4988_v3 = vpop.f32.mrf.mxu1 }
0x1f33   :  { %v4989_v4 = vadd.f32 %v5408_v61, %v4988_v3  ;;  %6511 = vtanh.f32 %v4994_v2 }
0x1f35   :  { %6513 = vtanh.f32 %v4989_v4 }
0x1f3c   :  { %v6508_v6 = vpop.eup %6507 }
0x1f3d   :  { %v5002_v13 = vadd.f32 %v6508_v6, %v6502_v48 }
0x1f3e   :  { %v6510_v7 = vpop.eup %6509 }
0x1f3f   :  { %v5001_v8 = vadd.f32 %v6510_v7, %v6500_v53 }
0x1f40   :  { %v6512_v10 = vpop.eup %6511 }
0x1f41   :  { %6230 = vmatprep.mubr.msk.f32.mxu0 %vm194_vm2, %v5001_v8  ;;  %v5004_v15 = vadd.f32 %v6512_v10, %v6506_v57 }
0x1f42   :  { %v6514_v11 = vpop.eup %6513  ;;  %6231 = vmatmul.mubr.msk.f32.vlgmr.msra.gmra.mxu0 %vm194_vm2, %v5002_v13 }
0x1f43   :  { %v5003_v14 = vadd.f32 %v6514_v11, %v6504_v43 }
0x1f45   :  { %6233 = vmatprep.mubr.msk.f32.mxu0 %vm194_vm2, %v5003_v14 }
0x1f46   :  { %6234 = vmatmul.mubr.msk.f32.gmra.mxu0 %vm194_vm2, %v5004_v15 }
0x2002   :  { %v6232_v23 = vpop.f32.mrf.mxu0 }
0x2003   :  { %v5098_v34 = vadd.f32 %v6232_v23, %v5413_v26 }
0x2004   :  { %v5092_v24 = vpop.f32.mrf.mxu0 }
0x2005   :  { %v5093_v30 = vadd.f32 %v5413_v26, %v5092_v24 }
0x2006   :  { %v6235_v27 = vpop.f32.mrf.mxu0 }
0x2007   :  { %v5108_v56 = vadd.f32 %v6235_v27, %v5413_v26 }
0x2008   :  { %v5102_v28 = vpop.f32.mrf.mxu0 }
0x2009   :  { %6515 = vtanh.f32 %v5108_v56  ;;  %v5103_v18 = vadd.f32 %v5413_v26, %v5102_v28 }
0x200b   :  { %6517 = vtanh.f32 %v5103_v18 }
0x200c   :  { %6519 = vtanh.f32 %v5098_v34 }
0x200d   :  { %6521 = vtanh.f32 %v5093_v30 }
0x2016   :  { %v6516_v20 = vpop.eup %6515 }
0x2017   :  { %v5118_v25 = vadd.f32 %v6516_v20, %v5004_v15 }
0x2018   :  { %v6518_v55 = vpop.eup %6517 }
0x2019   :  { %6237 = vmatpush3.xpose.msk.msra.mxu1 %vm194_vm2, %v5118_v25  ;;  %v5117_v32 = vadd.f32 %v6518_v55, %v5003_v14  ;;  %v6520_v37 = vpop.eup %6519 }
0x201a   :  { %6238 = vmatprep.subr.mxu1 %v6549_v29  ;;  %v5116_v9 = vadd.f32 %v6520_v37, %v5002_v13  ;;  %v6522_v33 = vpop.eup %6521 }
0x201b   :  { %v5115_v35 = vadd.f32 %v6522_v33, %v5001_v8 }
0x201d   :  { %6239 = vmatpush3.xpose.msk.msra.mxu1 %vm194_vm2, %v5117_v32 }
0x201e   :  { %6240 = vmatprep.subr.mxu1 %v6549_v29 }
0x2021   :  { %6241 = vmatpush3.xpose.msk.msra.mxu1 %vm194_vm2, %v5116_v9 }
0x2022   :  { %6242 = vmatprep.subr.mxu1 %v6549_v29 }
0x2025   :  { %6243 = vmatpush3.xpose.msk.msra.mxu1 %vm194_vm2, %v5115_v35 }
0x2028   :  { %6245 = vmatmul.mubr.msk.f32.vlgmr.msra.gmra.mxu1 %vm194_vm2, %v5119_v54 }
0x20e8   :  { %v5207_v5 = vpop.f32.mrf.mxu1 }
0x20e9   :  { %v5208_v36 = vadd.f32 %v5207_v5, %v5124_v22 }
0x20ea   :  { %v6246_v12 = vpop.f32.mrf.mxu1 }
0x20eb   :  { %5212 = vst.msk [vmem:[%s7053_s2] sm:$0x1] %vm5211_vm12, %v5208_v36 }
0x20ec   :  { %5217 = vsyncpa [#allocation3], 1 }

</bundles_post_ra>
